<compile_context>
chip_gen: v7x
topology: tpu7x:2x2x1
jax: 0.10.0
libtpu: 0.0.40
codegen_flags: <defaults>
</compile_context>

<pallas_src>
import jax
import jax.numpy as jnp
from jax.experimental import pallas as pl
from jax.experimental.pallas import tpu as pltpu

EPS = 1e-5
NEG_SLOPE = 0.2
_ROW_TILE_TARGET = 256            # raise to 512-1024 at production sizes
_VMEM_LIMIT = 32 * 1024 * 1024


def _row_tile(m):
    """Largest row tile <= target that divides m and keeps sublane alignment."""
    if m <= _ROW_TILE_TARGET:
        return m
    t = _ROW_TILE_TARGET
    while t >= 8:
        if m % t == 0 and t % 8 == 0:
            return t
        t -= 8
    return m


# ----------------------------- Pallas kernels ------------------------------

def _moments_kernel(y_ref, mu_ref, o_ref):
    """Accumulate per-channel sum(y-mu) and sum((y-mu)^2) across the M grid."""
    @pl.when(pl.program_id(0) == 0)
    def _():
        o_ref[...] = jnp.zeros_like(o_ref)

    d = y_ref[...].astype(jnp.float32) - mu_ref[...]
    o_ref[0:1, :] += jnp.sum(d, axis=0, keepdims=True)
    o_ref[1:2, :] += jnp.sum(d * d, axis=0, keepdims=True)


def _bn_lrelu_kernel(y_ref, sc_ref, sh_ref, o_ref):
    """out = LeakyReLU(y * scale + shift)   (BN pre-folded to scale/shift)."""
    z = y_ref[...].astype(jnp.float32) * sc_ref[...] + sh_ref[...]
    o_ref[...] = jnp.where(z > 0, z, NEG_SLOPE * z).astype(o_ref.dtype)


def _make_conv_kernel(n_phase, ho, wo, cin, cout, fuse_skip):
    """3x3 conv as 9 shifted (ho*wo, cin) @ (cin, cout) matmuls on VMEM slabs.

    n_phase == 1: stride-1; the slab is the zero-padded image.
    n_phase == 4: stride-2; slabs are the 4 even/odd phases of the padded image
                  so every tap is a unit-stride window into one phase.
    fuse_skip  : epilogue adds conv bias, BN-normalized skip branch + residual.
    """
    taps = [(dy, dx) for dy in range(3) for dx in range(3)]

    def kernel(*refs):
        x_refs = refs[:n_phase]
        w_ref = refs[n_phase]
        if fuse_skip:
            b_ref, skip_ref, ssc_ref, ssh_ref, o_ref = refs[n_phase + 1:]
        else:
            o_ref = refs[n_phase + 1]

        acc = jnp.zeros((ho * wo, cout), jnp.float32)
        for t, (dy, dx) in enumerate(taps):
            if n_phase == 1:
                xs = x_refs[0][0, dy:dy + ho, dx:dx + wo, :]
            else:
                ph = (dy % 2) * 2 + (dx % 2)
                r, c = dy // 2, dx // 2
                xs = x_refs[ph][0, r:r + ho, c:c + wo, :]
            xt = xs.reshape(ho * wo, cin)
            acc = acc + jnp.dot(xt, w_ref[t],
                                preferred_element_type=jnp.float32)

        if fuse_skip:
            acc = acc + b_ref[...]
            sk = skip_ref[0].reshape(ho * wo, cout).astype(jnp.float32)
            acc = acc + sk * ssc_ref[...] + ssh_ref[...]

        o_ref[...] = acc.reshape(1, ho, wo, cout).astype(o_ref.dtype)

    return kernel


# ------------------------------- wrappers ----------------------------------

def _batch_moments(y2d):
    """Per-channel (mean, biased var) of a [M, C] tensor; two-pass, tiled."""
    m, c = y2d.shape
    tm = _row_tile(m)

    def call(mu):
        return pl.pallas_call(
            _moments_kernel,
            out_shape=jax.ShapeDtypeStruct((2, c), jnp.float32),
            grid=(m // tm,),
            in_specs=[pl.BlockSpec((tm, c), lambda i: (i, 0)),
                      pl.BlockSpec((1, c), lambda i: (0, 0))],
            out_specs=pl.BlockSpec((2, c), lambda i: (0, 0)),
            compiler_params=pltpu.CompilerParams(
                dimension_semantics=("arbitrary",),
                vmem_limit_bytes=_VMEM_LIMIT),
        )(y2d, mu)

    s0 = call(jnp.zeros((1, c), jnp.float32))
    mean = s0[0] / m
    s1 = call(mean.reshape(1, c))          # centered second pass for precision
    var = s1[1] / m
    return mean, var


def _bn_lrelu(y2d, scale, shift, out_dtype):
    """Tiled elementwise apply: LeakyReLU(y*scale + shift) -> out_dtype."""
    m, c = y2d.shape
    tm = _row_tile(m)
    return pl.pallas_call(
        _bn_lrelu_kernel,
        out_shape=jax.ShapeDtypeStruct((m, c), out_dtype),
        grid=(m // tm,),
        in_specs=[pl.BlockSpec((tm, c), lambda i: (i, 0)),
                  pl.BlockSpec((1, c), lambda i: (0, 0)),
                  pl.BlockSpec((1, c), lambda i: (0, 0))],
        out_specs=pl.BlockSpec((tm, c), lambda i: (i, 0)),
        compiler_params=pltpu.CompilerParams(
            dimension_semantics=("parallel",),
            vmem_limit_bytes=_VMEM_LIMIT),
    )(y2d, scale.reshape(1, c).astype(jnp.float32),
      shift.reshape(1, c).astype(jnp.float32))


def _conv3x3(x_nhwc, w_taps, *, stride, bias=None, skip=None,
             skip_scale=None, skip_shift=None, out_dtype=jnp.float32):
    """3x3 conv, padding=1, stride in {1,2}; optional fused bias+skip epilogue."""
    n, h, w, cin = x_nhwc.shape
    cout = w_taps.shape[-1]
    assert stride in (1, 2)
    ho = (h - 1) // stride + 1
    wo = (w - 1) // stride + 1

    xp = jnp.pad(x_nhwc, ((0, 0), (1, 1), (1, 1), (0, 0)))
    if stride == 1:
        phases = [xp]
        pshape = (1, h + 2, w + 2, cin)
    else:
        assert h % 2 == 0 and w % 2 == 0, "stride-2 path assumes even H, W"
        phases = [xp[:, 0::2, 0::2, :], xp[:, 0::2, 1::2, :],
                  xp[:, 1::2, 0::2, :], xp[:, 1::2, 1::2, :]]
        pshape = (1, ho + 1, wo + 1, cin)

    fuse_skip = skip is not None
    kernel = _make_conv_kernel(len(phases), ho, wo, cin, cout, fuse_skip)

    in_specs = [pl.BlockSpec(pshape, lambda i: (i, 0, 0, 0)) for _ in phases]
    in_specs.append(pl.BlockSpec((9, cin, cout), lambda i: (0, 0, 0)))
    args = list(phases) + [w_taps]
    if fuse_skip:
        in_specs += [pl.BlockSpec((1, cout), lambda i: (0, 0)),
                     pl.BlockSpec((1, ho, wo, cout), lambda i: (i, 0, 0, 0)),
                     pl.BlockSpec((1, cout), lambda i: (0, 0)),
                     pl.BlockSpec((1, cout), lambda i: (0, 0))]
        args += [bias.reshape(1, cout).astype(jnp.float32),
                 skip,
                 skip_scale.reshape(1, cout).astype(jnp.float32),
                 skip_shift.reshape(1, cout).astype(jnp.float32)]

    flops = int(2 * n * ho * wo * 9 * cin * cout)
    bytes_accessed = int(sum(p.size * p.dtype.itemsize for p in phases)
                         + w_taps.size * w_taps.dtype.itemsize
                         + n * ho * wo * cout * 4
                         + (skip.size * skip.dtype.itemsize if fuse_skip else 0))

    return pl.pallas_call(
        kernel,
        out_shape=jax.ShapeDtypeStruct((n, ho, wo, cout), out_dtype),
        grid=(n,),
        in_specs=in_specs,
        out_specs=pl.BlockSpec((1, ho, wo, cout), lambda i: (i, 0, 0, 0)),
        compiler_params=pltpu.CompilerParams(
            dimension_semantics=("parallel",),
            vmem_limit_bytes=_VMEM_LIMIT),
        cost_estimate=pl.CostEstimate(flops=flops, transcendentals=0,
                                      bytes_accessed=bytes_accessed),
    )(*args)


# ------------------------------ parameters ---------------------------------

def _conv_init(key, cin, cout, k=3):
    wk, bk = jax.random.split(key)
    fan_in = k * k * cin
    bound = 1.0 / jnp.sqrt(jnp.float32(fan_in))
    w = jax.random.uniform(wk, (k, k, cin, cout), jnp.float32, -bound, bound)
    b = jax.random.uniform(bk, (cout,), jnp.float32, -bound, bound)
    return w, b


def init_params(key, in_channels, out_channels, mid_channels=None):
    if not mid_channels:
        mid_channels = out_channels
    k1, k2, k3 = jax.random.split(key, 3)
    p = {}
    # conv_block: Conv3x3 stride=s  (bias dropped: cancelled by batch-stat BN1)
    p["w1"], _ = _conv_init(k1, in_channels, mid_channels)
    # conv_block: Conv3x3 stride=1  (bias kept: no BN after it)
    p["w2"], p["b2"] = _conv_init(k2, mid_channels, out_channels)
    # conv_skip:  Conv3x3 stride=s  (bias dropped: cancelled by batch-stat BNs)
    p["ws"], _ = _conv_init(k3, in_channels, out_channels)
    # BatchNorm2d affine params (PyTorch defaults: weight=1, bias=0)
    p["bn0_g"] = jnp.ones((in_channels,), jnp.float32)
    p["bn0_b"] = jnp.zeros((in_channels,), jnp.float32)
    p["bn1_g"] = jnp.ones((mid_channels,), jnp.float32)
    p["bn1_b"] = jnp.zeros((mid_channels,), jnp.float32)
    p["bns_g"] = jnp.ones((out_channels,), jnp.float32)
    p["bns_b"] = jnp.zeros((out_channels,), jnp.float32)
    return p


# ----------------------------- ResidualConv --------------------------------

def residual_conv(x_nchw, p, stride=2):
    """ResidualConv forward: [N,Cin,H,W] -> [N,Cout,H/stride,W/stride]."""
    n, cin, h, w = x_nchw.shape
    cmid = p["w1"].shape[-1]
    cout = p["w2"].shape[-1]

    x = jnp.transpose(x_nchw, (0, 2, 3, 1)).astype(jnp.float32)   # NHWC

    # ---- BN0(x) + LeakyReLU (batch stats, folded to one scale/shift FMA) ----
    x2d = x.reshape(n * h * w, cin)
    mean0, var0 = _batch_moments(x2d)
    sc0 = p["bn0_g"] * jax.lax.rsqrt(var0 + EPS)
    sh0 = p["bn0_b"] - mean0 * sc0
    pre = _bn_lrelu(x2d, sc0, sh0, jnp.bfloat16).reshape(n, h, w, cin)

    # ---- stride-s convs: conv_block conv1 (on pre) and conv_skip (on raw x) --
    w1 = p["w1"].reshape(9, cin, cmid).astype(jnp.bfloat16)
    ws = p["ws"].reshape(9, cin, cout).astype(jnp.bfloat16)
    y1 = _conv3x3(pre, w1, stride=stride)                          # f32
    yskip = _conv3x3(x.astype(jnp.bfloat16), ws, stride=stride)    # f32
    _, ho, wo, _ = y1.shape

    # ---- BN1(y1) + LeakyReLU -------------------------------------------------
    mean1, var1 = _batch_moments(y1.reshape(n * ho * wo, cmid))
    sc1 = p["bn1_g"] * jax.lax.rsqrt(var1 + EPS)
    sh1 = p["bn1_b"] - mean1 * sc1
    a1 = _bn_lrelu(y1.reshape(n * ho * wo, cmid), sc1, sh1,
                   jnp.bfloat16).reshape(n, ho, wo, cmid)

    # ---- BN_skip folded to scale/shift (applied inside the final conv) -------
    means, varss = _batch_moments(yskip.reshape(n * ho * wo, cout))
    scs = p["bns_g"] * jax.lax.rsqrt(varss + EPS)
    shs = p["bns_b"] - means * scs

    # ---- final stride-1 conv + bias + BN(skip) + residual add, fully fused ---
    w2 = p["w2"].reshape(9, cmid, cout).astype(jnp.bfloat16)
    out = _conv3x3(a1, w2, stride=1, bias=p["b2"],
                   skip=yskip, skip_scale=scs, skip_shift=shs)
    return jnp.transpose(out, (0, 3, 1, 2))                        # NHWC->NCHW


if __name__ == "__main__":
    key = jax.random.PRNGKey(0)
    kx, kp = jax.random.split(key)

    N, Cin, H, W = 2, 4, 16, 16
    Cout = 8

    x = jax.random.normal(kx, (N, Cin, H, W), jnp.float32)
    params = init_params(kp, Cin, Cout)

    y = jax.jit(residual_conv)(x, params)
    jax.block_until_ready(y)

    assert y.shape == (N, Cout, H // 2, W // 2), y.shape
    assert bool(jnp.all(jnp.isfinite(y)))
    print("KERNEL_OK")
</pallas_src>

<mosaic_0001>
module attributes {stable_mosaic.version = 11 : i64} {
  func.func @_moments_kernel(%arg0: i32, %arg1: memref<256x4xf32, #tpu.memory_space<vmem>>, %arg2: memref<1x4xf32, #tpu.memory_space<vmem>>, %arg3: memref<2x4xf32, #tpu.memory_space<vmem>>) attributes {dimension_semantics = [#tpu.dimension_semantics<arbitrary>], iteration_bounds = array<i64: 2>, scalar_prefetch = 0 : i64, scratch_operands = 0 : i64, tpu.core_type = #tpu.core_type<tc>, window_params = [{transform_indices = @transform_0, window_bounds = array<i64: 256, 4>}, {pipeline_mode = #tpu.pipeline_mode<synchronous>, transform_indices = @transform_1, window_bounds = array<i64: 1, 4>}, {pipeline_mode = #tpu.pipeline_mode<synchronous>, transform_indices = @transform_2, window_bounds = array<i64: 2, 4>}]} {
    %c0_i32 = arith.constant 0 : i32
    %0 = arith.cmpi eq, %arg0, %c0_i32 : i32
    %1 = arith.extui %0 : i1 to i32
    %c0_i32_0 = arith.constant 0 : i32
    %2 = arith.cmpi ne, %1, %c0_i32_0 : i32
    scf.if %2 {
      %cst_12 = arith.constant 0.000000e+00 : f32
      %18 = vector.broadcast %cst_12 : f32 to vector<2x4xf32>
      %c0_13 = arith.constant 0 : index
      %c0_14 = arith.constant 0 : index
      %19 = vector.load %arg3[%c0_13, %c0_14] : memref<2x4xf32, #tpu.memory_space<vmem>>, vector<2x4xf32>
      tpu.vector_store %arg3[%c0_13, %c0_14], %18 {strides = array<i32>} : memref<2x4xf32, #tpu.memory_space<vmem>>, vector<2x4xf32>,
    } else {
    }
    %c0 = arith.constant 0 : index
    %c0_1 = arith.constant 0 : index
    %3 = vector.load %arg1[%c0, %c0_1] : memref<256x4xf32, #tpu.memory_space<vmem>>, vector<256x4xf32>
    %c0_2 = arith.constant 0 : index
    %c0_3 = arith.constant 0 : index
    %4 = vector.load %arg2[%c0_2, %c0_3] : memref<1x4xf32, #tpu.memory_space<vmem>>, vector<1x4xf32>
    %5 = vector.broadcast %4 : vector<1x4xf32> to vector<256x4xf32>
    %6 = arith.subf %3, %5 : vector<256x4xf32>
    %c0_4 = arith.constant 0 : index
    %c0_5 = arith.constant 0 : index
    %7 = vector.load %arg3[%c0_4, %c0_5] : memref<2x4xf32, #tpu.memory_space<vmem>>, vector<1x4xf32>
    %cst = arith.constant dense<0.000000e+00> : vector<4xf32>
    %8 = vector.multi_reduction <add>, %6, %cst [0] : vector<256x4xf32> to vector<4xf32>
    %9 = vector.shape_cast %8 : vector<4xf32> to vector<1x4xf32>
    %10 = arith.addf %7, %9 : vector<1x4xf32>
    %c0_6 = arith.constant 0 : index
    %c0_7 = arith.constant 0 : index
    %11 = vector.load %arg3[%c0_6, %c0_7] : memref<2x4xf32, #tpu.memory_space<vmem>>, vector<1x4xf32>
    tpu.vector_store %arg3[%c0_6, %c0_7], %10 {strides = array<i32>} : memref<2x4xf32, #tpu.memory_space<vmem>>, vector<1x4xf32>,
    %c1 = arith.constant 1 : index
    %c0_8 = arith.constant 0 : index
    %12 = vector.load %arg3[%c1, %c0_8] : memref<2x4xf32, #tpu.memory_space<vmem>>, vector<1x4xf32>
    %13 = arith.mulf %6, %6 : vector<256x4xf32>
    %cst_9 = arith.constant dense<0.000000e+00> : vector<4xf32>
    %14 = vector.multi_reduction <add>, %13, %cst_9 [0] : vector<256x4xf32> to vector<4xf32>
    %15 = vector.shape_cast %14 : vector<4xf32> to vector<1x4xf32>
    %16 = arith.addf %12, %15 : vector<1x4xf32>
    %c1_10 = arith.constant 1 : index
    %c0_11 = arith.constant 0 : index
    %17 = vector.load %arg3[%c1_10, %c0_11] : memref<2x4xf32, #tpu.memory_space<vmem>>, vector<1x4xf32>
    tpu.vector_store %arg3[%c1_10, %c0_11], %16 {strides = array<i32>} : memref<2x4xf32, #tpu.memory_space<vmem>>, vector<1x4xf32>,
    return
  }
  func.func @transform_0(%arg0: i32) -> (i32, i32) {
    %c0_i32 = arith.constant 0 : i32
    %c0_i32_0 = arith.constant 0 : i32
    return %arg0, %c0_i32 : i32, i32
  }
  func.func @transform_1(%arg0: i32) -> (i32, i32) {
    %c0_i32 = arith.constant 0 : i32
    %c0_i32_0 = arith.constant 0 : i32
    %c0_i32_1 = arith.constant 0 : i32
    return %c0_i32, %c0_i32_0 : i32, i32
  }
  func.func @transform_2(%arg0: i32) -> (i32, i32) {
    %c0_i32 = arith.constant 0 : i32
    %c0_i32_0 = arith.constant 0 : i32
    %c0_i32_1 = arith.constant 0 : i32
    return %c0_i32, %c0_i32_0 : i32, i32
  }
}

module attributes {stable_mosaic.version = 11 : i64} {
  func.func @_bn_lrelu_kernel(%arg0: i32, %arg1: memref<256x4xf32, #tpu.memory_space<vmem>>, %arg2: memref<1x4xf32, #tpu.memory_space<vmem>>, %arg3: memref<1x4xf32, #tpu.memory_space<vmem>>, %arg4: memref<256x4xbf16, #tpu.memory_space<vmem>>) attributes {dimension_semantics = [#tpu.dimension_semantics<parallel>], iteration_bounds = array<i64: 2>, scalar_prefetch = 0 : i64, scratch_operands = 0 : i64, tpu.core_type = #tpu.core_type<tc>, window_params = [{transform_indices = @transform_0, window_bounds = array<i64: 256, 4>}, {pipeline_mode = #tpu.pipeline_mode<synchronous>, transform_indices = @transform_1, window_bounds = array<i64: 1, 4>}, {pipeline_mode = #tpu.pipeline_mode<synchronous>, transform_indices = @transform_2, window_bounds = array<i64: 1, 4>}, {transform_indices = @transform_3, window_bounds = array<i64: 256, 4>}]} {
    %c0 = arith.constant 0 : index
    %c0_0 = arith.constant 0 : index
    %0 = vector.load %arg1[%c0, %c0_0] : memref<256x4xf32, #tpu.memory_space<vmem>>, vector<256x4xf32>
    %c0_1 = arith.constant 0 : index
    %c0_2 = arith.constant 0 : index
    %1 = vector.load %arg2[%c0_1, %c0_2] : memref<1x4xf32, #tpu.memory_space<vmem>>, vector<1x4xf32>
    %2 = vector.broadcast %1 : vector<1x4xf32> to vector<256x4xf32>
    %3 = arith.mulf %0, %2 : vector<256x4xf32>
    %c0_3 = arith.constant 0 : index
    %c0_4 = arith.constant 0 : index
    %4 = vector.load %arg3[%c0_3, %c0_4] : memref<1x4xf32, #tpu.memory_space<vmem>>, vector<1x4xf32>
    %5 = vector.broadcast %4 : vector<1x4xf32> to vector<256x4xf32>
    %6 = arith.addf %3, %5 : vector<256x4xf32>
    %cst = arith.constant 0.000000e+00 : f32
    %7 = vector.broadcast %cst : f32 to vector<256x4xf32>
    %8 = arith.cmpf ogt, %6, %7 : vector<256x4xf32>
    %cst_5 = arith.constant 2.000000e-01 : f32
    %9 = vector.broadcast %cst_5 : f32 to vector<256x4xf32>
    %10 = arith.mulf %9, %6 : vector<256x4xf32>
    %11 = arith.select %8, %6, %10 : vector<256x4xi1>, vector<256x4xf32>
    %12 = arith.truncf %11 : vector<256x4xf32> to vector<256x4xbf16>
    %c0_6 = arith.constant 0 : index
    %c0_7 = arith.constant 0 : index
    %13 = vector.load %arg4[%c0_6, %c0_7] : memref<256x4xbf16, #tpu.memory_space<vmem>>, vector<256x4xbf16>
    tpu.vector_store %arg4[%c0_6, %c0_7], %12 {strides = array<i32>} : memref<256x4xbf16, #tpu.memory_space<vmem>>, vector<256x4xbf16>,
    return
  }
  func.func @transform_0(%arg0: i32) -> (i32, i32) {
    %c0_i32 = arith.constant 0 : i32
    %c0_i32_0 = arith.constant 0 : i32
    return %arg0, %c0_i32 : i32, i32
  }
  func.func @transform_1(%arg0: i32) -> (i32, i32) {
    %c0_i32 = arith.constant 0 : i32
    %c0_i32_0 = arith.constant 0 : i32
    %c0_i32_1 = arith.constant 0 : i32
    return %c0_i32, %c0_i32_0 : i32, i32
  }
  func.func @transform_2(%arg0: i32) -> (i32, i32) {
    %c0_i32 = arith.constant 0 : i32
    %c0_i32_0 = arith.constant 0 : i32
    %c0_i32_1 = arith.constant 0 : i32
    return %c0_i32, %c0_i32_0 : i32, i32
  }
  func.func @transform_3(%arg0: i32) -> (i32, i32) {
    %c0_i32 = arith.constant 0 : i32
    %c0_i32_0 = arith.constant 0 : i32
    return %arg0, %c0_i32 : i32, i32
  }
}

module attributes {stable_mosaic.version = 11 : i64} {
  func.func @_moments_kernel(%arg0: i32, %arg1: memref<128x8xf32, #tpu.memory_space<vmem>>, %arg2: memref<1x8xf32, #tpu.memory_space<vmem>>, %arg3: memref<2x8xf32, #tpu.memory_space<vmem>>) attributes {dimension_semantics = [#tpu.dimension_semantics<arbitrary>], iteration_bounds = array<i64: 1>, scalar_prefetch = 0 : i64, scratch_operands = 0 : i64, tpu.core_type = #tpu.core_type<tc>, window_params = [{transform_indices = @transform_0, window_bounds = array<i64: 128, 8>}, {pipeline_mode = #tpu.pipeline_mode<synchronous>, transform_indices = @transform_1, window_bounds = array<i64: 1, 8>}, {pipeline_mode = #tpu.pipeline_mode<synchronous>, transform_indices = @transform_2, window_bounds = array<i64: 2, 8>}]} {
    %c0_i32 = arith.constant 0 : i32
    %0 = arith.cmpi eq, %arg0, %c0_i32 : i32
    %1 = arith.extui %0 : i1 to i32
    %c0_i32_0 = arith.constant 0 : i32
    %2 = arith.cmpi ne, %1, %c0_i32_0 : i32
    scf.if %2 {
      %cst_12 = arith.constant 0.000000e+00 : f32
      %18 = vector.broadcast %cst_12 : f32 to vector<2x8xf32>
      %c0_13 = arith.constant 0 : index
      %c0_14 = arith.constant 0 : index
      %19 = vector.load %arg3[%c0_13, %c0_14] : memref<2x8xf32, #tpu.memory_space<vmem>>, vector<2x8xf32>
      tpu.vector_store %arg3[%c0_13, %c0_14], %18 {strides = array<i32>} : memref<2x8xf32, #tpu.memory_space<vmem>>, vector<2x8xf32>,
    } else {
    }
    %c0 = arith.constant 0 : index
    %c0_1 = arith.constant 0 : index
    %3 = vector.load %arg1[%c0, %c0_1] : memref<128x8xf32, #tpu.memory_space<vmem>>, vector<128x8xf32>
    %c0_2 = arith.constant 0 : index
    %c0_3 = arith.constant 0 : index
    %4 = vector.load %arg2[%c0_2, %c0_3] : memref<1x8xf32, #tpu.memory_space<vmem>>, vector<1x8xf32>
    %5 = vector.broadcast %4 : vector<1x8xf32> to vector<128x8xf32>
    %6 = arith.subf %3, %5 : vector<128x8xf32>
    %c0_4 = arith.constant 0 : index
    %c0_5 = arith.constant 0 : index
    %7 = vector.load %arg3[%c0_4, %c0_5] : memref<2x8xf32, #tpu.memory_space<vmem>>, vector<1x8xf32>
    %cst = arith.constant dense<0.000000e+00> : vector<8xf32>
    %8 = vector.multi_reduction <add>, %6, %cst [0] : vector<128x8xf32> to vector<8xf32>
    %9 = vector.shape_cast %8 : vector<8xf32> to vector<1x8xf32>
    %10 = arith.addf %7, %9 : vector<1x8xf32>
    %c0_6 = arith.constant 0 : index
    %c0_7 = arith.constant 0 : index
    %11 = vector.load %arg3[%c0_6, %c0_7] : memref<2x8xf32, #tpu.memory_space<vmem>>, vector<1x8xf32>
    tpu.vector_store %arg3[%c0_6, %c0_7], %10 {strides = array<i32>} : memref<2x8xf32, #tpu.memory_space<vmem>>, vector<1x8xf32>,
    %c1 = arith.constant 1 : index
    %c0_8 = arith.constant 0 : index
    %12 = vector.load %arg3[%c1, %c0_8] : memref<2x8xf32, #tpu.memory_space<vmem>>, vector<1x8xf32>
    %13 = arith.mulf %6, %6 : vector<128x8xf32>
    %cst_9 = arith.constant dense<0.000000e+00> : vector<8xf32>
    %14 = vector.multi_reduction <add>, %13, %cst_9 [0] : vector<128x8xf32> to vector<8xf32>
    %15 = vector.shape_cast %14 : vector<8xf32> to vector<1x8xf32>
    %16 = arith.addf %12, %15 : vector<1x8xf32>
    %c1_10 = arith.constant 1 : index
    %c0_11 = arith.constant 0 : index
    %17 = vector.load %arg3[%c1_10, %c0_11] : memref<2x8xf32, #tpu.memory_space<vmem>>, vector<1x8xf32>
    tpu.vector_store %arg3[%c1_10, %c0_11], %16 {strides = array<i32>} : memref<2x8xf32, #tpu.memory_space<vmem>>, vector<1x8xf32>,
    return
  }
  func.func @transform_0(%arg0: i32) -> (i32, i32) {
    %c0_i32 = arith.constant 0 : i32
    %c0_i32_0 = arith.constant 0 : i32
    return %arg0, %c0_i32 : i32, i32
  }
  func.func @transform_1(%arg0: i32) -> (i32, i32) {
    %c0_i32 = arith.constant 0 : i32
    %c0_i32_0 = arith.constant 0 : i32
    %c0_i32_1 = arith.constant 0 : i32
    return %c0_i32, %c0_i32_0 : i32, i32
  }
  func.func @transform_2(%arg0: i32) -> (i32, i32) {
    %c0_i32 = arith.constant 0 : i32
    %c0_i32_0 = arith.constant 0 : i32
    %c0_i32_1 = arith.constant 0 : i32
    return %c0_i32, %c0_i32_0 : i32, i32
  }
}

module attributes {stable_mosaic.version = 11 : i64} {
  func.func @kernel(%arg0: i32, %arg1: memref<1x9x9x4xbf16, #tpu.memory_space<vmem>>, %arg2: memref<1x9x9x4xbf16, #tpu.memory_space<vmem>>, %arg3: memref<1x9x9x4xbf16, #tpu.memory_space<vmem>>, %arg4: memref<1x9x9x4xbf16, #tpu.memory_space<vmem>>, %arg5: memref<9x4x8xbf16, #tpu.memory_space<vmem>>, %arg6: memref<1x8x8x8xf32, #tpu.memory_space<vmem>>) attributes {dimension_semantics = [#tpu.dimension_semantics<parallel>], iteration_bounds = array<i64: 2>, scalar_prefetch = 0 : i64, scratch_operands = 0 : i64, tpu.core_type = #tpu.core_type<tc>, window_params = [{transform_indices = @transform_0, window_bounds = array<i64: 1, 9, 9, 4>}, {transform_indices = @transform_1, window_bounds = array<i64: 1, 9, 9, 4>}, {transform_indices = @transform_2, window_bounds = array<i64: 1, 9, 9, 4>}, {transform_indices = @transform_3, window_bounds = array<i64: 1, 9, 9, 4>}, {pipeline_mode = #tpu.pipeline_mode<synchronous>, transform_indices = @transform_4, window_bounds = array<i64: 9, 4, 8>}, {transform_indices = @transform_5, window_bounds = array<i64: 1, 8, 8, 8>}]} {
    %cst = arith.constant 0.000000e+00 : f32
    %0 = vector.broadcast %cst : f32 to vector<64x8xf32>
    %c0 = arith.constant 0 : index
    %c0_0 = arith.constant 0 : index
    %c0_1 = arith.constant 0 : index
    %c0_2 = arith.constant 0 : index
    %1 = vector.load %arg1[%c0, %c0_0, %c0_1, %c0_2] : memref<1x9x9x4xbf16, #tpu.memory_space<vmem>>, vector<1x8x8x4xbf16>
    %2 = vector.shape_cast %1 : vector<1x8x8x4xbf16> to vector<8x8x4xbf16>
    %3 = vector.shape_cast %2 : vector<8x8x4xbf16> to vector<64x4xbf16>
    %c0_3 = arith.constant 0 : index
    %c0_4 = arith.constant 0 : index
    %c0_5 = arith.constant 0 : index
    %4 = vector.load %arg5[%c0_3, %c0_4, %c0_5] : memref<9x4x8xbf16, #tpu.memory_space<vmem>>, vector<1x4x8xbf16>
    %5 = vector.shape_cast %4 : vector<1x4x8xbf16> to vector<4x8xbf16>
    %cst_6 = arith.constant dense<0.000000e+00> : vector<64x8xf32>
    %6 = tpu.matmul %3, %5, %cst_6 {dimension_numbers = #tpu.dot_dimension_numbers<[1], [0], [0], [1], [0, 0, 1, 1], [], []>} : vector<64x4xbf16>, vector<4x8xbf16>, vector<64x8xf32> -> vector<64x8xf32>
    %7 = arith.addf %0, %6 : vector<64x8xf32>
    %c0_7 = arith.constant 0 : index
    %c0_8 = arith.constant 0 : index
    %c0_9 = arith.constant 0 : index
    %c0_10 = arith.constant 0 : index
    %8 = vector.load %arg2[%c0_7, %c0_8, %c0_9, %c0_10] : memref<1x9x9x4xbf16, #tpu.memory_space<vmem>>, vector<1x8x8x4xbf16>
    %9 = vector.shape_cast %8 : vector<1x8x8x4xbf16> to vector<8x8x4xbf16>
    %10 = vector.shape_cast %9 : vector<8x8x4xbf16> to vector<64x4xbf16>
    %c1 = arith.constant 1 : index
    %c0_11 = arith.constant 0 : index
    %c0_12 = arith.constant 0 : index
    %11 = vector.load %arg5[%c1, %c0_11, %c0_12] : memref<9x4x8xbf16, #tpu.memory_space<vmem>>, vector<1x4x8xbf16>
    %12 = vector.shape_cast %11 : vector<1x4x8xbf16> to vector<4x8xbf16>
    %cst_13 = arith.constant dense<0.000000e+00> : vector<64x8xf32>
    %13 = tpu.matmul %10, %12, %cst_13 {dimension_numbers = #tpu.dot_dimension_numbers<[1], [0], [0], [1], [0, 0, 1, 1], [], []>} : vector<64x4xbf16>, vector<4x8xbf16>, vector<64x8xf32> -> vector<64x8xf32>
    %14 = arith.addf %7, %13 : vector<64x8xf32>
    %c0_14 = arith.constant 0 : index
    %c0_15 = arith.constant 0 : index
    %c1_16 = arith.constant 1 : index
    %c0_17 = arith.constant 0 : index
    %15 = vector.load %arg1[%c0_14, %c0_15, %c1_16, %c0_17] : memref<1x9x9x4xbf16, #tpu.memory_space<vmem>>, vector<1x8x8x4xbf16>
    %16 = vector.shape_cast %15 : vector<1x8x8x4xbf16> to vector<8x8x4xbf16>
    %17 = vector.shape_cast %16 : vector<8x8x4xbf16> to vector<64x4xbf16>
    %c2 = arith.constant 2 : index
    %c0_18 = arith.constant 0 : index
    %c0_19 = arith.constant 0 : index
    %18 = vector.load %arg5[%c2, %c0_18, %c0_19] : memref<9x4x8xbf16, #tpu.memory_space<vmem>>, vector<1x4x8xbf16>
    %19 = vector.shape_cast %18 : vector<1x4x8xbf16> to vector<4x8xbf16>
    %cst_20 = arith.constant dense<0.000000e+00> : vector<64x8xf32>
    %20 = tpu.matmul %17, %19, %cst_20 {dimension_numbers = #tpu.dot_dimension_numbers<[1], [0], [0], [1], [0, 0, 1, 1], [], []>} : vector<64x4xbf16>, vector<4x8xbf16>, vector<64x8xf32> -> vector<64x8xf32>
    %21 = arith.addf %14, %20 : vector<64x8xf32>
    %c0_21 = arith.constant 0 : index
    %c0_22 = arith.constant 0 : index
    %c0_23 = arith.constant 0 : index
    %c0_24 = arith.constant 0 : index
    %22 = vector.load %arg3[%c0_21, %c0_22, %c0_23, %c0_24] : memref<1x9x9x4xbf16, #tpu.memory_space<vmem>>, vector<1x8x8x4xbf16>
    %23 = vector.shape_cast %22 : vector<1x8x8x4xbf16> to vector<8x8x4xbf16>
    %24 = vector.shape_cast %23 : vector<8x8x4xbf16> to vector<64x4xbf16>
    %c3 = arith.constant 3 : index
    %c0_25 = arith.constant 0 : index
    %c0_26 = arith.constant 0 : index
    %25 = vector.load %arg5[%c3, %c0_25, %c0_26] : memref<9x4x8xbf16, #tpu.memory_space<vmem>>, vector<1x4x8xbf16>
    %26 = vector.shape_cast %25 : vector<1x4x8xbf16> to vector<4x8xbf16>
    %cst_27 = arith.constant dense<0.000000e+00> : vector<64x8xf32>
    %27 = tpu.matmul %24, %26, %cst_27 {dimension_numbers = #tpu.dot_dimension_numbers<[1], [0], [0], [1], [0, 0, 1, 1], [], []>} : vector<64x4xbf16>, vector<4x8xbf16>, vector<64x8xf32> -> vector<64x8xf32>
    %28 = arith.addf %21, %27 : vector<64x8xf32>
    %c0_28 = arith.constant 0 : index
    %c0_29 = arith.constant 0 : index
    %c0_30 = arith.constant 0 : index
    %c0_31 = arith.constant 0 : index
    %29 = vector.load %arg4[%c0_28, %c0_29, %c0_30, %c0_31] : memref<1x9x9x4xbf16, #tpu.memory_space<vmem>>, vector<1x8x8x4xbf16>
    %30 = vector.shape_cast %29 : vector<1x8x8x4xbf16> to vector<8x8x4xbf16>
    %31 = vector.shape_cast %30 : vector<8x8x4xbf16> to vector<64x4xbf16>
    %c4 = arith.constant 4 : index
    %c0_32 = arith.constant 0 : index
    %c0_33 = arith.constant 0 : index
    %32 = vector.load %arg5[%c4, %c0_32, %c0_33] : memref<9x4x8xbf16, #tpu.memory_space<vmem>>, vector<1x4x8xbf16>
    %33 = vector.shape_cast %32 : vector<1x4x8xbf16> to vector<4x8xbf16>
    %cst_34 = arith.constant dense<0.000000e+00> : vector<64x8xf32>
    %34 = tpu.matmul %31, %33, %cst_34 {dimension_numbers = #tpu.dot_dimension_numbers<[1], [0], [0], [1], [0, 0, 1, 1], [], []>} : vector<64x4xbf16>, vector<4x8xbf16>, vector<64x8xf32> -> vector<64x8xf32>
    %35 = arith.addf %28, %34 : vector<64x8xf32>
    %c0_35 = arith.constant 0 : index
    %c0_36 = arith.constant 0 : index
    %c1_37 = arith.constant 1 : index
    %c0_38 = arith.constant 0 : index
    %36 = vector.load %arg3[%c0_35, %c0_36, %c1_37, %c0_38] : memref<1x9x9x4xbf16, #tpu.memory_space<vmem>>, vector<1x8x8x4xbf16>
    %37 = vector.shape_cast %36 : vector<1x8x8x4xbf16> to vector<8x8x4xbf16>
    %38 = vector.shape_cast %37 : vector<8x8x4xbf16> to vector<64x4xbf16>
    %c5 = arith.constant 5 : index
    %c0_39 = arith.constant 0 : index
    %c0_40 = arith.constant 0 : index
    %39 = vector.load %arg5[%c5, %c0_39, %c0_40] : memref<9x4x8xbf16, #tpu.memory_space<vmem>>, vector<1x4x8xbf16>
    %40 = vector.shape_cast %39 : vector<1x4x8xbf16> to vector<4x8xbf16>
    %cst_41 = arith.constant dense<0.000000e+00> : vector<64x8xf32>
    %41 = tpu.matmul %38, %40, %cst_41 {dimension_numbers = #tpu.dot_dimension_numbers<[1], [0], [0], [1], [0, 0, 1, 1], [], []>} : vector<64x4xbf16>, vector<4x8xbf16>, vector<64x8xf32> -> vector<64x8xf32>
    %42 = arith.addf %35, %41 : vector<64x8xf32>
    %c0_42 = arith.constant 0 : index
    %c1_43 = arith.constant 1 : index
    %c0_44 = arith.constant 0 : index
    %c0_45 = arith.constant 0 : index
    %43 = vector.load %arg1[%c0_42, %c1_43, %c0_44, %c0_45] : memref<1x9x9x4xbf16, #tpu.memory_space<vmem>>, vector<1x8x8x4xbf16>
    %44 = vector.shape_cast %43 : vector<1x8x8x4xbf16> to vector<8x8x4xbf16>
    %45 = vector.shape_cast %44 : vector<8x8x4xbf16> to vector<64x4xbf16>
    %c6 = arith.constant 6 : index
    %c0_46 = arith.constant 0 : index
    %c0_47 = arith.constant 0 : index
    %46 = vector.load %arg5[%c6, %c0_46, %c0_47] : memref<9x4x8xbf16, #tpu.memory_space<vmem>>, vector<1x4x8xbf16>
    %47 = vector.shape_cast %46 : vector<1x4x8xbf16> to vector<4x8xbf16>
    %cst_48 = arith.constant dense<0.000000e+00> : vector<64x8xf32>
    %48 = tpu.matmul %45, %47, %cst_48 {dimension_numbers = #tpu.dot_dimension_numbers<[1], [0], [0], [1], [0, 0, 1, 1], [], []>} : vector<64x4xbf16>, vector<4x8xbf16>, vector<64x8xf32> -> vector<64x8xf32>
    %49 = arith.addf %42, %48 : vector<64x8xf32>
    %c0_49 = arith.constant 0 : index
    %c1_50 = arith.constant 1 : index
    %c0_51 = arith.constant 0 : index
    %c0_52 = arith.constant 0 : index
    %50 = vector.load %arg2[%c0_49, %c1_50, %c0_51, %c0_52] : memref<1x9x9x4xbf16, #tpu.memory_space<vmem>>, vector<1x8x8x4xbf16>
    %51 = vector.shape_cast %50 : vector<1x8x8x4xbf16> to vector<8x8x4xbf16>
    %52 = vector.shape_cast %51 : vector<8x8x4xbf16> to vector<64x4xbf16>
    %c7 = arith.constant 7 : index
    %c0_53 = arith.constant 0 : index
    %c0_54 = arith.constant 0 : index
    %53 = vector.load %arg5[%c7, %c0_53, %c0_54] : memref<9x4x8xbf16, #tpu.memory_space<vmem>>, vector<1x4x8xbf16>
    %54 = vector.shape_cast %53 : vector<1x4x8xbf16> to vector<4x8xbf16>
    %cst_55 = arith.constant dense<0.000000e+00> : vector<64x8xf32>
    %55 = tpu.matmul %52, %54, %cst_55 {dimension_numbers = #tpu.dot_dimension_numbers<[1], [0], [0], [1], [0, 0, 1, 1], [], []>} : vector<64x4xbf16>, vector<4x8xbf16>, vector<64x8xf32> -> vector<64x8xf32>
    %56 = arith.addf %49, %55 : vector<64x8xf32>
    %c0_56 = arith.constant 0 : index
    %c1_57 = arith.constant 1 : index
    %c1_58 = arith.constant 1 : index
    %c0_59 = arith.constant 0 : index
    %57 = vector.load %arg1[%c0_56, %c1_57, %c1_58, %c0_59] : memref<1x9x9x4xbf16, #tpu.memory_space<vmem>>, vector<1x8x8x4xbf16>
    %58 = vector.shape_cast %57 : vector<1x8x8x4xbf16> to vector<8x8x4xbf16>
    %59 = vector.shape_cast %58 : vector<8x8x4xbf16> to vector<64x4xbf16>
    %c8 = arith.constant 8 : index
    %c0_60 = arith.constant 0 : index
    %c0_61 = arith.constant 0 : index
    %60 = vector.load %arg5[%c8, %c0_60, %c0_61] : memref<9x4x8xbf16, #tpu.memory_space<vmem>>, vector<1x4x8xbf16>
    %61 = vector.shape_cast %60 : vector<1x4x8xbf16> to vector<4x8xbf16>
    %cst_62 = arith.constant dense<0.000000e+00> : vector<64x8xf32>
    %62 = tpu.matmul %59, %61, %cst_62 {dimension_numbers = #tpu.dot_dimension_numbers<[1], [0], [0], [1], [0, 0, 1, 1], [], []>} : vector<64x4xbf16>, vector<4x8xbf16>, vector<64x8xf32> -> vector<64x8xf32>
    %63 = arith.addf %56, %62 : vector<64x8xf32>
    %64 = vector.shape_cast %63 : vector<64x8xf32> to vector<1x8x8x8xf32>
    %c0_63 = arith.constant 0 : index
    %c0_64 = arith.constant 0 : index
    %c0_65 = arith.constant 0 : index
    %c0_66 = arith.constant 0 : index
    %65 = vector.load %arg6[%c0_63, %c0_64, %c0_65, %c0_66] : memref<1x8x8x8xf32, #tpu.memory_space<vmem>>, vector<1x8x8x8xf32>
    tpu.vector_store %arg6[%c0_63, %c0_64, %c0_65, %c0_66], %64 {strides = array<i32>} : memref<1x8x8x8xf32, #tpu.memory_space<vmem>>, vector<1x8x8x8xf32>,
    return
  }
  func.func @transform_0(%arg0: i32) -> (i32, i32, i32, i32) {
    %c0_i32 = arith.constant 0 : i32
    %c0_i32_0 = arith.constant 0 : i32
    %c0_i32_1 = arith.constant 0 : i32
    %c0_i32_2 = arith.constant 0 : i32
    return %arg0, %c0_i32, %c0_i32_0, %c0_i32_1 : i32, i32, i32, i32
  }
  func.func @transform_1(%arg0: i32) -> (i32, i32, i32, i32) {
    %c0_i32 = arith.constant 0 : i32
    %c0_i32_0 = arith.constant 0 : i32
    %c0_i32_1 = arith.constant 0 : i32
    %c0_i32_2 = arith.constant 0 : i32
    return %arg0, %c0_i32, %c0_i32_0, %c0_i32_1 : i32, i32, i32, i32
  }
  func.func @transform_2(%arg0: i32) -> (i32, i32, i32, i32) {
    %c0_i32 = arith.constant 0 : i32
    %c0_i32_0 = arith.constant 0 : i32
    %c0_i32_1 = arith.constant 0 : i32
    %c0_i32_2 = arith.constant 0 : i32
    return %arg0, %c0_i32, %c0_i32_0, %c0_i32_1 : i32, i32, i32, i32
  }
  func.func @transform_3(%arg0: i32) -> (i32, i32, i32, i32) {
    %c0_i32 = arith.constant 0 : i32
    %c0_i32_0 = arith.constant 0 : i32
    %c0_i32_1 = arith.constant 0 : i32
    %c0_i32_2 = arith.constant 0 : i32
    return %arg0, %c0_i32, %c0_i32_0, %c0_i32_1 : i32, i32, i32, i32
  }
  func.func @transform_4(%arg0: i32) -> (i32, i32, i32) {
    %c0_i32 = arith.constant 0 : i32
    %c0_i32_0 = arith.constant 0 : i32
    %c0_i32_1 = arith.constant 0 : i32
    %c0_i32_2 = arith.constant 0 : i32
    return %c0_i32, %c0_i32_0, %c0_i32_1 : i32, i32, i32
  }
  func.func @transform_5(%arg0: i32) -> (i32, i32, i32, i32) {
    %c0_i32 = arith.constant 0 : i32
    %c0_i32_0 = arith.constant 0 : i32
    %c0_i32_1 = arith.constant 0 : i32
    %c0_i32_2 = arith.constant 0 : i32
    return %arg0, %c0_i32, %c0_i32_0, %c0_i32_1 : i32, i32, i32, i32
  }
}

module attributes {stable_mosaic.version = 11 : i64} {
  func.func @_bn_lrelu_kernel(%arg0: i32, %arg1: memref<128x8xf32, #tpu.memory_space<vmem>>, %arg2: memref<1x8xf32, #tpu.memory_space<vmem>>, %arg3: memref<1x8xf32, #tpu.memory_space<vmem>>, %arg4: memref<128x8xbf16, #tpu.memory_space<vmem>>) attributes {dimension_semantics = [#tpu.dimension_semantics<parallel>], iteration_bounds = array<i64: 1>, scalar_prefetch = 0 : i64, scratch_operands = 0 : i64, tpu.core_type = #tpu.core_type<tc>, window_params = [{transform_indices = @transform_0, window_bounds = array<i64: 128, 8>}, {pipeline_mode = #tpu.pipeline_mode<synchronous>, transform_indices = @transform_1, window_bounds = array<i64: 1, 8>}, {pipeline_mode = #tpu.pipeline_mode<synchronous>, transform_indices = @transform_2, window_bounds = array<i64: 1, 8>}, {transform_indices = @transform_3, window_bounds = array<i64: 128, 8>}]} {
    %c0 = arith.constant 0 : index
    %c0_0 = arith.constant 0 : index
    %0 = vector.load %arg1[%c0, %c0_0] : memref<128x8xf32, #tpu.memory_space<vmem>>, vector<128x8xf32>
    %c0_1 = arith.constant 0 : index
    %c0_2 = arith.constant 0 : index
    %1 = vector.load %arg2[%c0_1, %c0_2] : memref<1x8xf32, #tpu.memory_space<vmem>>, vector<1x8xf32>
    %2 = vector.broadcast %1 : vector<1x8xf32> to vector<128x8xf32>
    %3 = arith.mulf %0, %2 : vector<128x8xf32>
    %c0_3 = arith.constant 0 : index
    %c0_4 = arith.constant 0 : index
    %4 = vector.load %arg3[%c0_3, %c0_4] : memref<1x8xf32, #tpu.memory_space<vmem>>, vector<1x8xf32>
    %5 = vector.broadcast %4 : vector<1x8xf32> to vector<128x8xf32>
    %6 = arith.addf %3, %5 : vector<128x8xf32>
    %cst = arith.constant 0.000000e+00 : f32
    %7 = vector.broadcast %cst : f32 to vector<128x8xf32>
    %8 = arith.cmpf ogt, %6, %7 : vector<128x8xf32>
    %cst_5 = arith.constant 2.000000e-01 : f32
    %9 = vector.broadcast %cst_5 : f32 to vector<128x8xf32>
    %10 = arith.mulf %9, %6 : vector<128x8xf32>
    %11 = arith.select %8, %6, %10 : vector<128x8xi1>, vector<128x8xf32>
    %12 = arith.truncf %11 : vector<128x8xf32> to vector<128x8xbf16>
    %c0_6 = arith.constant 0 : index
    %c0_7 = arith.constant 0 : index
    %13 = vector.load %arg4[%c0_6, %c0_7] : memref<128x8xbf16, #tpu.memory_space<vmem>>, vector<128x8xbf16>
    tpu.vector_store %arg4[%c0_6, %c0_7], %12 {strides = array<i32>} : memref<128x8xbf16, #tpu.memory_space<vmem>>, vector<128x8xbf16>,
    return
  }
  func.func @transform_0(%arg0: i32) -> (i32, i32) {
    %c0_i32 = arith.constant 0 : i32
    %c0_i32_0 = arith.constant 0 : i32
    return %arg0, %c0_i32 : i32, i32
  }
  func.func @transform_1(%arg0: i32) -> (i32, i32) {
    %c0_i32 = arith.constant 0 : i32
    %c0_i32_0 = arith.constant 0 : i32
    %c0_i32_1 = arith.constant 0 : i32
    return %c0_i32, %c0_i32_0 : i32, i32
  }
  func.func @transform_2(%arg0: i32) -> (i32, i32) {
    %c0_i32 = arith.constant 0 : i32
    %c0_i32_0 = arith.constant 0 : i32
    %c0_i32_1 = arith.constant 0 : i32
    return %c0_i32, %c0_i32_0 : i32, i32
  }
  func.func @transform_3(%arg0: i32) -> (i32, i32) {
    %c0_i32 = arith.constant 0 : i32
    %c0_i32_0 = arith.constant 0 : i32
    return %arg0, %c0_i32 : i32, i32
  }
}

module attributes {stable_mosaic.version = 11 : i64} {
  func.func @kernel(%arg0: i32, %arg1: memref<1x10x10x8xbf16, #tpu.memory_space<vmem>>, %arg2: memref<9x8x8xbf16, #tpu.memory_space<vmem>>, %arg3: memref<1x8xf32, #tpu.memory_space<vmem>>, %arg4: memref<1x8x8x8xf32, #tpu.memory_space<vmem>>, %arg5: memref<1x8xf32, #tpu.memory_space<vmem>>, %arg6: memref<1x8xf32, #tpu.memory_space<vmem>>, %arg7: memref<1x8x8x8xf32, #tpu.memory_space<vmem>>) attributes {dimension_semantics = [#tpu.dimension_semantics<parallel>], iteration_bounds = array<i64: 2>, scalar_prefetch = 0 : i64, scratch_operands = 0 : i64, tpu.core_type = #tpu.core_type<tc>, window_params = [{transform_indices = @transform_0, window_bounds = array<i64: 1, 10, 10, 8>}, {pipeline_mode = #tpu.pipeline_mode<synchronous>, transform_indices = @transform_1, window_bounds = array<i64: 9, 8, 8>}, {pipeline_mode = #tpu.pipeline_mode<synchronous>, transform_indices = @transform_2, window_bounds = array<i64: 1, 8>}, {transform_indices = @transform_3, window_bounds = array<i64: 1, 8, 8, 8>}, {pipeline_mode = #tpu.pipeline_mode<synchronous>, transform_indices = @transform_4, window_bounds = array<i64: 1, 8>}, {pipeline_mode = #tpu.pipeline_mode<synchronous>, transform_indices = @transform_5, window_bounds = array<i64: 1, 8>}, {transform_indices = @transform_6, window_bounds = array<i64: 1, 8, 8, 8>}]} {
    %cst = arith.constant 0.000000e+00 : f32
    %0 = vector.broadcast %cst : f32 to vector<64x8xf32>
    %c0 = arith.constant 0 : index
    %c0_0 = arith.constant 0 : index
    %c0_1 = arith.constant 0 : index
    %c0_2 = arith.constant 0 : index
    %1 = vector.load %arg1[%c0, %c0_0, %c0_1, %c0_2] : memref<1x10x10x8xbf16, #tpu.memory_space<vmem>>, vector<1x8x8x8xbf16>
    %2 = vector.shape_cast %1 : vector<1x8x8x8xbf16> to vector<8x8x8xbf16>
    %3 = vector.shape_cast %2 : vector<8x8x8xbf16> to vector<64x8xbf16>
    %c0_3 = arith.constant 0 : index
    %c0_4 = arith.constant 0 : index
    %c0_5 = arith.constant 0 : index
    %4 = vector.load %arg2[%c0_3, %c0_4, %c0_5] : memref<9x8x8xbf16, #tpu.memory_space<vmem>>, vector<1x8x8xbf16>
    %5 = vector.shape_cast %4 : vector<1x8x8xbf16> to vector<8x8xbf16>
    %cst_6 = arith.constant dense<0.000000e+00> : vector<64x8xf32>
    %6 = tpu.matmul %3, %5, %cst_6 {dimension_numbers = #tpu.dot_dimension_numbers<[1], [0], [0], [1], [0, 0, 1, 1], [], []>} : vector<64x8xbf16>, vector<8x8xbf16>, vector<64x8xf32> -> vector<64x8xf32>
    %7 = arith.addf %0, %6 : vector<64x8xf32>
    %c0_7 = arith.constant 0 : index
    %c0_8 = arith.constant 0 : index
    %c1 = arith.constant 1 : index
    %c0_9 = arith.constant 0 : index
    %8 = vector.load %arg1[%c0_7, %c0_8, %c1, %c0_9] : memref<1x10x10x8xbf16, #tpu.memory_space<vmem>>, vector<1x8x8x8xbf16>
    %9 = vector.shape_cast %8 : vector<1x8x8x8xbf16> to vector<8x8x8xbf16>
    %10 = vector.shape_cast %9 : vector<8x8x8xbf16> to vector<64x8xbf16>
    %c1_10 = arith.constant 1 : index
    %c0_11 = arith.constant 0 : index
    %c0_12 = arith.constant 0 : index
    %11 = vector.load %arg2[%c1_10, %c0_11, %c0_12] : memref<9x8x8xbf16, #tpu.memory_space<vmem>>, vector<1x8x8xbf16>
    %12 = vector.shape_cast %11 : vector<1x8x8xbf16> to vector<8x8xbf16>
    %cst_13 = arith.constant dense<0.000000e+00> : vector<64x8xf32>
    %13 = tpu.matmul %10, %12, %cst_13 {dimension_numbers = #tpu.dot_dimension_numbers<[1], [0], [0], [1], [0, 0, 1, 1], [], []>} : vector<64x8xbf16>, vector<8x8xbf16>, vector<64x8xf32> -> vector<64x8xf32>
    %14 = arith.addf %7, %13 : vector<64x8xf32>
    %c0_14 = arith.constant 0 : index
    %c0_15 = arith.constant 0 : index
    %c2 = arith.constant 2 : index
    %c0_16 = arith.constant 0 : index
    %15 = vector.load %arg1[%c0_14, %c0_15, %c2, %c0_16] : memref<1x10x10x8xbf16, #tpu.memory_space<vmem>>, vector<1x8x8x8xbf16>
    %16 = vector.shape_cast %15 : vector<1x8x8x8xbf16> to vector<8x8x8xbf16>
    %17 = vector.shape_cast %16 : vector<8x8x8xbf16> to vector<64x8xbf16>
    %c2_17 = arith.constant 2 : index
    %c0_18 = arith.constant 0 : index
    %c0_19 = arith.constant 0 : index
    %18 = vector.load %arg2[%c2_17, %c0_18, %c0_19] : memref<9x8x8xbf16, #tpu.memory_space<vmem>>, vector<1x8x8xbf16>
    %19 = vector.shape_cast %18 : vector<1x8x8xbf16> to vector<8x8xbf16>
    %cst_20 = arith.constant dense<0.000000e+00> : vector<64x8xf32>
    %20 = tpu.matmul %17, %19, %cst_20 {dimension_numbers = #tpu.dot_dimension_numbers<[1], [0], [0], [1], [0, 0, 1, 1], [], []>} : vector<64x8xbf16>, vector<8x8xbf16>, vector<64x8xf32> -> vector<64x8xf32>
    %21 = arith.addf %14, %20 : vector<64x8xf32>
    %c0_21 = arith.constant 0 : index
    %c1_22 = arith.constant 1 : index
    %c0_23 = arith.constant 0 : index
    %c0_24 = arith.constant 0 : index
    %22 = vector.load %arg1[%c0_21, %c1_22, %c0_23, %c0_24] : memref<1x10x10x8xbf16, #tpu.memory_space<vmem>>, vector<1x8x8x8xbf16>
    %23 = vector.shape_cast %22 : vector<1x8x8x8xbf16> to vector<8x8x8xbf16>
    %24 = vector.shape_cast %23 : vector<8x8x8xbf16> to vector<64x8xbf16>
    %c3 = arith.constant 3 : index
    %c0_25 = arith.constant 0 : index
    %c0_26 = arith.constant 0 : index
    %25 = vector.load %arg2[%c3, %c0_25, %c0_26] : memref<9x8x8xbf16, #tpu.memory_space<vmem>>, vector<1x8x8xbf16>
    %26 = vector.shape_cast %25 : vector<1x8x8xbf16> to vector<8x8xbf16>
    %cst_27 = arith.constant dense<0.000000e+00> : vector<64x8xf32>
    %27 = tpu.matmul %24, %26, %cst_27 {dimension_numbers = #tpu.dot_dimension_numbers<[1], [0], [0], [1], [0, 0, 1, 1], [], []>} : vector<64x8xbf16>, vector<8x8xbf16>, vector<64x8xf32> -> vector<64x8xf32>
    %28 = arith.addf %21, %27 : vector<64x8xf32>
    %c0_28 = arith.constant 0 : index
    %c1_29 = arith.constant 1 : index
    %c1_30 = arith.constant 1 : index
    %c0_31 = arith.constant 0 : index
    %29 = vector.load %arg1[%c0_28, %c1_29, %c1_30, %c0_31] : memref<1x10x10x8xbf16, #tpu.memory_space<vmem>>, vector<1x8x8x8xbf16>
    %30 = vector.shape_cast %29 : vector<1x8x8x8xbf16> to vector<8x8x8xbf16>
    %31 = vector.shape_cast %30 : vector<8x8x8xbf16> to vector<64x8xbf16>
    %c4 = arith.constant 4 : index
    %c0_32 = arith.constant 0 : index
    %c0_33 = arith.constant 0 : index
    %32 = vector.load %arg2[%c4, %c0_32, %c0_33] : memref<9x8x8xbf16, #tpu.memory_space<vmem>>, vector<1x8x8xbf16>
    %33 = vector.shape_cast %32 : vector<1x8x8xbf16> to vector<8x8xbf16>
    %cst_34 = arith.constant dense<0.000000e+00> : vector<64x8xf32>
    %34 = tpu.matmul %31, %33, %cst_34 {dimension_numbers = #tpu.dot_dimension_numbers<[1], [0], [0], [1], [0, 0, 1, 1], [], []>} : vector<64x8xbf16>, vector<8x8xbf16>, vector<64x8xf32> -> vector<64x8xf32>
    %35 = arith.addf %28, %34 : vector<64x8xf32>
    %c0_35 = arith.constant 0 : index
    %c1_36 = arith.constant 1 : index
    %c2_37 = arith.constant 2 : index
    %c0_38 = arith.constant 0 : index
    %36 = vector.load %arg1[%c0_35, %c1_36, %c2_37, %c0_38] : memref<1x10x10x8xbf16, #tpu.memory_space<vmem>>, vector<1x8x8x8xbf16>
    %37 = vector.shape_cast %36 : vector<1x8x8x8xbf16> to vector<8x8x8xbf16>
    %38 = vector.shape_cast %37 : vector<8x8x8xbf16> to vector<64x8xbf16>
    %c5 = arith.constant 5 : index
    %c0_39 = arith.constant 0 : index
    %c0_40 = arith.constant 0 : index
    %39 = vector.load %arg2[%c5, %c0_39, %c0_40] : memref<9x8x8xbf16, #tpu.memory_space<vmem>>, vector<1x8x8xbf16>
    %40 = vector.shape_cast %39 : vector<1x8x8xbf16> to vector<8x8xbf16>
    %cst_41 = arith.constant dense<0.000000e+00> : vector<64x8xf32>
    %41 = tpu.matmul %38, %40, %cst_41 {dimension_numbers = #tpu.dot_dimension_numbers<[1], [0], [0], [1], [0, 0, 1, 1], [], []>} : vector<64x8xbf16>, vector<8x8xbf16>, vector<64x8xf32> -> vector<64x8xf32>
    %42 = arith.addf %35, %41 : vector<64x8xf32>
    %c0_42 = arith.constant 0 : index
    %c2_43 = arith.constant 2 : index
    %c0_44 = arith.constant 0 : index
    %c0_45 = arith.constant 0 : index
    %43 = vector.load %arg1[%c0_42, %c2_43, %c0_44, %c0_45] : memref<1x10x10x8xbf16, #tpu.memory_space<vmem>>, vector<1x8x8x8xbf16>
    %44 = vector.shape_cast %43 : vector<1x8x8x8xbf16> to vector<8x8x8xbf16>
    %45 = vector.shape_cast %44 : vector<8x8x8xbf16> to vector<64x8xbf16>
    %c6 = arith.constant 6 : index
    %c0_46 = arith.constant 0 : index
    %c0_47 = arith.constant 0 : index
    %46 = vector.load %arg2[%c6, %c0_46, %c0_47] : memref<9x8x8xbf16, #tpu.memory_space<vmem>>, vector<1x8x8xbf16>
    %47 = vector.shape_cast %46 : vector<1x8x8xbf16> to vector<8x8xbf16>
    %cst_48 = arith.constant dense<0.000000e+00> : vector<64x8xf32>
    %48 = tpu.matmul %45, %47, %cst_48 {dimension_numbers = #tpu.dot_dimension_numbers<[1], [0], [0], [1], [0, 0, 1, 1], [], []>} : vector<64x8xbf16>, vector<8x8xbf16>, vector<64x8xf32> -> vector<64x8xf32>
    %49 = arith.addf %42, %48 : vector<64x8xf32>
    %c0_49 = arith.constant 0 : index
    %c2_50 = arith.constant 2 : index
    %c1_51 = arith.constant 1 : index
    %c0_52 = arith.constant 0 : index
    %50 = vector.load %arg1[%c0_49, %c2_50, %c1_51, %c0_52] : memref<1x10x10x8xbf16, #tpu.memory_space<vmem>>, vector<1x8x8x8xbf16>
    %51 = vector.shape_cast %50 : vector<1x8x8x8xbf16> to vector<8x8x8xbf16>
    %52 = vector.shape_cast %51 : vector<8x8x8xbf16> to vector<64x8xbf16>
    %c7 = arith.constant 7 : index
    %c0_53 = arith.constant 0 : index
    %c0_54 = arith.constant 0 : index
    %53 = vector.load %arg2[%c7, %c0_53, %c0_54] : memref<9x8x8xbf16, #tpu.memory_space<vmem>>, vector<1x8x8xbf16>
    %54 = vector.shape_cast %53 : vector<1x8x8xbf16> to vector<8x8xbf16>
    %cst_55 = arith.constant dense<0.000000e+00> : vector<64x8xf32>
    %55 = tpu.matmul %52, %54, %cst_55 {dimension_numbers = #tpu.dot_dimension_numbers<[1], [0], [0], [1], [0, 0, 1, 1], [], []>} : vector<64x8xbf16>, vector<8x8xbf16>, vector<64x8xf32> -> vector<64x8xf32>
    %56 = arith.addf %49, %55 : vector<64x8xf32>
    %c0_56 = arith.constant 0 : index
    %c2_57 = arith.constant 2 : index
    %c2_58 = arith.constant 2 : index
    %c0_59 = arith.constant 0 : index
    %57 = vector.load %arg1[%c0_56, %c2_57, %c2_58, %c0_59] : memref<1x10x10x8xbf16, #tpu.memory_space<vmem>>, vector<1x8x8x8xbf16>
    %58 = vector.shape_cast %57 : vector<1x8x8x8xbf16> to vector<8x8x8xbf16>
    %59 = vector.shape_cast %58 : vector<8x8x8xbf16> to vector<64x8xbf16>
    %c8 = arith.constant 8 : index
    %c0_60 = arith.constant 0 : index
    %c0_61 = arith.constant 0 : index
    %60 = vector.load %arg2[%c8, %c0_60, %c0_61] : memref<9x8x8xbf16, #tpu.memory_space<vmem>>, vector<1x8x8xbf16>
    %61 = vector.shape_cast %60 : vector<1x8x8xbf16> to vector<8x8xbf16>
    %cst_62 = arith.constant dense<0.000000e+00> : vector<64x8xf32>
    %62 = tpu.matmul %59, %61, %cst_62 {dimension_numbers = #tpu.dot_dimension_numbers<[1], [0], [0], [1], [0, 0, 1, 1], [], []>} : vector<64x8xbf16>, vector<8x8xbf16>, vector<64x8xf32> -> vector<64x8xf32>
    %63 = arith.addf %56, %62 : vector<64x8xf32>
    %c0_63 = arith.constant 0 : index
    %c0_64 = arith.constant 0 : index
    %64 = vector.load %arg3[%c0_63, %c0_64] : memref<1x8xf32, #tpu.memory_space<vmem>>, vector<1x8xf32>
    %65 = vector.broadcast %64 : vector<1x8xf32> to vector<64x8xf32>
    %66 = arith.addf %63, %65 : vector<64x8xf32>
    %c0_65 = arith.constant 0 : index
    %c0_66 = arith.constant 0 : index
    %c0_67 = arith.constant 0 : index
    %c0_68 = arith.constant 0 : index
    %67 = vector.load %arg4[%c0_65, %c0_66, %c0_67, %c0_68] : memref<1x8x8x8xf32, #tpu.memory_space<vmem>>, vector<1x8x8x8xf32>
    %68 = vector.shape_cast %67 : vector<1x8x8x8xf32> to vector<8x8x8xf32>
    %69 = vector.shape_cast %68 : vector<8x8x8xf32> to vector<64x8xf32>
    %c0_69 = arith.constant 0 : index
    %c0_70 = arith.constant 0 : index
    %70 = vector.load %arg5[%c0_69, %c0_70] : memref<1x8xf32, #tpu.memory_space<vmem>>, vector<1x8xf32>
    %71 = vector.broadcast %70 : vector<1x8xf32> to vector<64x8xf32>
    %72 = arith.mulf %69, %71 : vector<64x8xf32>
    %73 = arith.addf %66, %72 : vector<64x8xf32>
    %c0_71 = arith.constant 0 : index
    %c0_72 = arith.constant 0 : index
    %74 = vector.load %arg6[%c0_71, %c0_72] : memref<1x8xf32, #tpu.memory_space<vmem>>, vector<1x8xf32>
    %75 = vector.broadcast %74 : vector<1x8xf32> to vector<64x8xf32>
    %76 = arith.addf %73, %75 : vector<64x8xf32>
    %77 = vector.shape_cast %76 : vector<64x8xf32> to vector<1x8x8x8xf32>
    %c0_73 = arith.constant 0 : index
    %c0_74 = arith.constant 0 : index
    %c0_75 = arith.constant 0 : index
    %c0_76 = arith.constant 0 : index
    %78 = vector.load %arg7[%c0_73, %c0_74, %c0_75, %c0_76] : memref<1x8x8x8xf32, #tpu.memory_space<vmem>>, vector<1x8x8x8xf32>
    tpu.vector_store %arg7[%c0_73, %c0_74, %c0_75, %c0_76], %77 {strides = array<i32>} : memref<1x8x8x8xf32, #tpu.memory_space<vmem>>, vector<1x8x8x8xf32>,
    return
  }
  func.func @transform_0(%arg0: i32) -> (i32, i32, i32, i32) {
    %c0_i32 = arith.constant 0 : i32
    %c0_i32_0 = arith.constant 0 : i32
    %c0_i32_1 = arith.constant 0 : i32
    %c0_i32_2 = arith.constant 0 : i32
    return %arg0, %c0_i32, %c0_i32_0, %c0_i32_1 : i32, i32, i32, i32
  }
  func.func @transform_1(%arg0: i32) -> (i32, i32, i32) {
    %c0_i32 = arith.constant 0 : i32
    %c0_i32_0 = arith.constant 0 : i32
    %c0_i32_1 = arith.constant 0 : i32
    %c0_i32_2 = arith.constant 0 : i32
    return %c0_i32, %c0_i32_0, %c0_i32_1 : i32, i32, i32
  }
  func.func @transform_2(%arg0: i32) -> (i32, i32) {
    %c0_i32 = arith.constant 0 : i32
    %c0_i32_0 = arith.constant 0 : i32
    %c0_i32_1 = arith.constant 0 : i32
    return %c0_i32, %c0_i32_0 : i32, i32
  }
  func.func @transform_3(%arg0: i32) -> (i32, i32, i32, i32) {
    %c0_i32 = arith.constant 0 : i32
    %c0_i32_0 = arith.constant 0 : i32
    %c0_i32_1 = arith.constant 0 : i32
    %c0_i32_2 = arith.constant 0 : i32
    return %arg0, %c0_i32, %c0_i32_0, %c0_i32_1 : i32, i32, i32, i32
  }
  func.func @transform_4(%arg0: i32) -> (i32, i32) {
    %c0_i32 = arith.constant 0 : i32
    %c0_i32_0 = arith.constant 0 : i32
    %c0_i32_1 = arith.constant 0 : i32
    return %c0_i32, %c0_i32_0 : i32, i32
  }
  func.func @transform_5(%arg0: i32) -> (i32, i32) {
    %c0_i32 = arith.constant 0 : i32
    %c0_i32_0 = arith.constant 0 : i32
    %c0_i32_1 = arith.constant 0 : i32
    return %c0_i32, %c0_i32_0 : i32, i32
  }
  func.func @transform_6(%arg0: i32) -> (i32, i32, i32, i32) {
    %c0_i32 = arith.constant 0 : i32
    %c0_i32_0 = arith.constant 0 : i32
    %c0_i32_1 = arith.constant 0 : i32
    %c0_i32_2 = arith.constant 0 : i32
    return %arg0, %c0_i32, %c0_i32_0, %c0_i32_1 : i32, i32, i32, i32
  }
}

</mosaic_0001>

<bundles_post_ra>
// kernel: residual_conv.11
= control target key start
LH: loop header
LB: loop body
LE: loop exit
PB: predicated region body
PF: predicated region fallthrough
CT: control target
= control target key end

     0   :  { %s457_s9 = smov 0   ;;  %s623_s0 = inlined_call_operand.vmem [shape: f32[512,4], index: 0, kind: input, shape index: {}]   ;;  %s624_s1 = inlined_call_operand.vmem [shape: f32[1,4], index: 1, kind: input, shape index: {}]   ;;  %s625_s2 = inlined_call_operand.vmem [shape: f32[2,4], index: 2, kind: output, shape index: {}]  }
   0x1 LB: > { %s414_s10 = sadd.s32 4294967295, %s439_s9   ;;  %p417_p0 = scmp.ge.s32.totalorder %s439_s9, 1  ;;  %s439_s9 = sphi %s457_s9, %s12_s9  }
   0x2   : > { %p108_p1 = scmp.lt.s32.totalorder %s439_s9, 3 }
   0x4   : > { %p109_p2 = pnand %p417_p0, %p108_p1 }
   0x5   : > { %s418_s11 = sshll.u32 (!%p109_p2), %s414_s10, 5  ;;  %p420_p4 = scmp.ne.s32.totalorder (!%p109_p2), %s414_s10, 0 }
   0x6   : > { %112 = sbr.rel (%p109_p2) target bundleno = 108 (0x6c), region = 28  ;;  %p126_p3 = scmp.lt.s32.totalorder (!%p109_p2), %s418_s11, 63 }
   0xd   : > { %s627_s11 = smov (!%p126_p3, %s418_s11), 63  ;;  %134 = sbr.rel (%p420_p4) target bundleno = 20 (0x14), region = 32 }
   0xe   : > { %s419_s12 = sshll.u32 %s627_s11, 3  ;;  %vm135_vm0 = vcmask (!%p420_p4), 25600   ;;  %v441_v0 = vmov (!%p420_p4), 0.0  }
   0xf   : > { %s468_s15 = scalar_lea.vmem %s623_s0, %s419_s12  ;;  %136 = vst.msk [vmem:[%s625_s2] sm:$0x3] (!%p420_p4), %vm135_vm0, %v441_v0 }
  0x14 PF: > { %v137_v1 = vld [vmem:[%s468_s15] sm:$0xff]  ;;  %v138_v2 = vld [vmem:[%s468_s15 + $0x8] sm:$0xff]  ;;  %v139_v3 = vld [vmem:[%s468_s15 + $0x10] sm:$0xff]  ;;  %vm209_vm1 = vcmask 31744   ;;  %vm280_vm2 = vcmask 24576  }
  0x15   : > { %v479_v4 = vld [vmem:[%s624_s1] ss:$0 sm:$0xff]  ;;  %v140_v5 = vld [vmem:[%s468_s15 + $0x18] sm:$0xff]  ;;  %v142_v14 = vld [vmem:[%s468_s15 + $0x28] sm:$0xff] }
  0x16   : > { %v176_v6 = vsub.f32 %v137_v1, %v479_v4  ;;  %v177_v7 = vsub.f32 %v138_v2, %v479_v4  ;;  %v178_v8 = vsub.f32 %v139_v3, %v479_v4  ;;  %v141_v9 = vld [vmem:[%s468_s15 + $0x20] sm:$0xff]  ;;  %v179_v10 = vsub.f32 %v140_v5, %v479_v4  ;;  %v143_v18 = vld [vmem:[%s468_s15 + $0x30] sm:$0xff]  ;;  %v144_v22 = vld [vmem:[%s468_s15 + $0x38] sm:$0xff] }
  0x17   : > { %v180_v16 = vsub.f32 %v141_v9, %v479_v4  ;;  %v181_v20 = vsub.f32 %v142_v14, %v479_v4  ;;  %v182_v24 = vsub.f32 %v143_v18, %v479_v4  ;;  %v145_v26 = vld [vmem:[%s468_s15 + $0x40] sm:$0xff]  ;;  %v183_v28 = vsub.f32 %v144_v22, %v479_v4  ;;  %v146_v30 = vld [vmem:[%s468_s15 + $0x48] sm:$0xff]  ;;  %v147_v32 = vld [vmem:[%s468_s15 + $0x50] sm:$0xff] }
  0x18   : > { %v210_v11 = vsel %vm209_vm1, %v176_v6, 0.0  ;;  %v211_v12 = vsel %vm209_vm1, %v177_v7, 0.0  ;;  %v213_v13 = vsel %vm209_vm1, %v178_v8, 0.0  ;;  %v215_v17 = vsel %vm209_vm1, %v179_v10, 0.0  ;;  %v148_v36 = vld [vmem:[%s468_s15 + $0x58] sm:$0xff]  ;;  %v149_v41 = vld [vmem:[%s468_s15 + $0x60] sm:$0xff] }
  0x19   : > { %v212_v15 = vadd.f32 %v211_v12, %v210_v11  ;;  %v217_v21 = vsel %vm209_vm1, %v180_v16, 0.0  ;;  %v219_v25 = vsel %vm209_vm1, %v181_v20, 0.0  ;;  %v221_v29 = vsel %vm209_vm1, %v182_v24, 0.0  ;;  %v150_v50 = vld [vmem:[%s468_s15 + $0x68] sm:$0xff]  ;;  %v151_v58 = vld [vmem:[%s468_s15 + $0x70] sm:$0xff]  ;;  %v152_v1 = vld [vmem:[%s468_s15 + $0x78] sm:$0xff] }
  0x1a   : > { %v184_v33 = vsub.f32 %v145_v26, %v479_v4  ;;  %v223_v34 = vsel %vm209_vm1, %v183_v28, 0.0  ;;  %v185_v37 = vsub.f32 %v146_v30, %v479_v4  ;;  %v186_v39 = vsub.f32 %v147_v32, %v479_v4  ;;  %v153_v9 = vld [vmem:[%s468_s15 + $0x80] sm:$0xff]  ;;  %v156_v30 = vld [vmem:[%s468_s15 + $0x98] sm:$0xff] }
  0x1b   : > { %v214_v19 = vadd.f32 %v213_v13, %v212_v15  ;;  %v283_v43 = vmul.f32 %v176_v6, %v176_v6  ;;  %v284_v44 = vmul.f32 %v177_v7, %v177_v7  ;;  %v285_v45 = vmul.f32 %v178_v8, %v178_v8 }
  0x1c   : > { %v225_v38 = vsel %vm209_vm1, %v184_v33, 0.0  ;;  %v227_v42 = vsel %vm209_vm1, %v185_v37, 0.0  ;;  %v187_v46 = vsub.f32 %v148_v36, %v479_v4  ;;  %v229_v48 = vsel %vm209_vm1, %v186_v39, 0.0 }
  0x1d   : > { %v216_v23 = vadd.f32 %v215_v17, %v214_v19  ;;  %v286_v49 = vmul.f32 %v179_v10, %v179_v10  ;;  %v188_v51 = vsub.f32 %v149_v41, %v479_v4  ;;  %v287_v54 = vmul.f32 %v180_v16, %v180_v16  ;;  %v154_v16 = vld [vmem:[%s468_s15 + $0x88] sm:$0xff] }
  0x1e   : > { %v231_v53 = vsel %vm209_vm1, %v187_v46, 0.0  ;;  %v315_v55 = vsel %vm209_vm1, %v283_v43, 0.0  ;;  %v316_v56 = vsel %vm209_vm1, %v284_v44, 0.0  ;;  %v318_v57 = vsel %vm209_vm1, %v285_v45, 0.0  ;;  %v158_v45 = vld [vmem:[%s468_s15 + $0xa8] sm:$0xff] }
  0x1f   : > { %v218_v27 = vadd.f32 %v217_v21, %v216_v23  ;;  %v317_v60 = vadd.f32 %v316_v56, %v315_v55  ;;  %v189_v61 = vsub.f32 %v150_v50, %v479_v4  ;;  %v233_v62 = vsel %vm209_vm1, %v188_v51, 0.0  ;;  %v155_v23 = vld [vmem:[%s468_s15 + $0x90] sm:$0xff] }
  0x20   : > { %v288_v63 = vmul.f32 %v181_v20, %v181_v20  ;;  %v320_v0 = vsel %vm209_vm1, %v286_v49, 0.0  ;;  %v190_v5 = vsub.f32 %v151_v58, %v479_v4  ;;  %v289_v7 = vmul.f32 %v182_v24, %v182_v24 }
  0x21   : > { %v220_v31 = vadd.f32 %v219_v25, %v218_v27  ;;  %v319_v3 = vadd.f32 %v318_v57, %v317_v60  ;;  %v235_v6 = vsel %vm209_vm1, %v189_v61, 0.0  ;;  %v322_v8 = vsel %vm209_vm1, %v287_v54, 0.0 }
  0x22   : > { %v191_v12 = vsub.f32 %v152_v1, %v479_v4  ;;  %v237_v13 = vsel %vm209_vm1, %v190_v5, 0.0  ;;  %v290_v14 = vmul.f32 %v183_v28, %v183_v28  ;;  %v324_v15 = vsel %vm209_vm1, %v288_v63, 0.0 }
  0x23   : > { %v222_v35 = vadd.f32 %v221_v29, %v220_v31  ;;  %v321_v11 = vadd.f32 %v320_v0, %v319_v3  ;;  %v192_v19 = vsub.f32 %v153_v9, %v479_v4  ;;  %v291_v21 = vmul.f32 %v184_v33, %v184_v33 }
  0x24   : > { %v239_v20 = vsel %vm209_vm1, %v191_v12, 0.0  ;;  %v326_v22 = vsel %vm209_vm1, %v289_v7, 0.0  ;;  %v193_v26 = vsub.f32 %v154_v16, %v479_v4  ;;  %v292_v28 = vmul.f32 %v185_v37, %v185_v37 }
  0x25   : > { %v224_v40 = vadd.f32 %v223_v34, %v222_v35  ;;  %v323_v18 = vadd.f32 %v322_v8, %v321_v11  ;;  %v241_v27 = vsel %vm209_vm1, %v192_v19, 0.0  ;;  %v328_v29 = vsel %vm209_vm1, %v290_v14, 0.0 }
  0x26   : > { %v194_v34 = vsub.f32 %v155_v23, %v479_v4  ;;  %v243_v33 = vsel %vm209_vm1, %v193_v26, 0.0  ;;  %v293_v35 = vmul.f32 %v186_v39, %v186_v39  ;;  %v330_v36 = vsel %vm209_vm1, %v291_v21, 0.0 }
  0x27   : > { %v226_v47 = vadd.f32 %v225_v38, %v224_v40  ;;  %v325_v25 = vadd.f32 %v324_v15, %v323_v18  ;;  %v157_v38 = vld [vmem:[%s468_s15 + $0xa0] sm:$0xff]  ;;  %v294_v43 = vmul.f32 %v187_v46, %v187_v46  ;;  %v332_v44 = vsel %vm209_vm1, %v292_v28, 0.0 }
  0x28   : > { %v245_v37 = vsel %vm209_vm1, %v194_v34, 0.0  ;;  %v196_v49 = vsub.f32 %v157_v38, %v479_v4  ;;  %v295_v50 = vmul.f32 %v188_v51, %v188_v51  ;;  %v197_v56 = vsub.f32 %v158_v45, %v479_v4 }
  0x29   : > { %v228_v52 = vadd.f32 %v227_v42, %v226_v47  ;;  %v327_v32 = vadd.f32 %v326_v22, %v325_v25  ;;  %v195_v42 = vsub.f32 %v156_v30, %v479_v4  ;;  %v296_v57 = vmul.f32 %v189_v61, %v189_v61 }
  0x2a   : > { %v249_v46 = vsel %vm209_vm1, %v196_v49, 0.0  ;;  %v336_v58 = vsel %vm209_vm1, %v294_v43, 0.0  ;;  %v251_v51 = vsel %vm209_vm1, %v197_v56, 0.0  ;;  %v297_v0 = vmul.f32 %v190_v5, %v190_v5 }
  0x2b   : > { %v230_v59 = vadd.f32 %v229_v48, %v228_v52  ;;  %v329_v41 = vadd.f32 %v328_v29, %v327_v32  ;;  %v247_v39 = vsel %vm209_vm1, %v195_v42, 0.0  ;;  %v334_v52 = vsel %vm209_vm1, %v293_v35, 0.0 }
  0x2c   : > { %v338_v1 = vsel %vm209_vm1, %v295_v50, 0.0  ;;  %v298_v8 = vmul.f32 %v191_v12, %v191_v12  ;;  %v340_v9 = vsel %vm209_vm1, %v296_v57, 0.0  ;;  %v299_v15 = vmul.f32 %v192_v19, %v192_v19 }
  0x2d   : > { %v232_v2 = vadd.f32 %v231_v53, %v230_v59  ;;  %v331_v48 = vadd.f32 %v330_v36, %v329_v41  ;;  %v159_v53 = vld [vmem:[%s468_s15 + $0xb0] sm:$0xff]  ;;  %v160_v59 = vld [vmem:[%s468_s15 + $0xb8] sm:$0xff]  ;;  %v342_v16 = vsel %vm209_vm1, %v297_v0, 0.0  ;;  %v300_v22 = vmul.f32 %v193_v26, %v193_v26 }
  0x2e   : > { %v198_v63 = vsub.f32 %v159_v53, %v479_v4  ;;  %v199_v7 = vsub.f32 %v160_v59, %v479_v4  ;;  %v344_v23 = vsel %vm209_vm1, %v298_v8, 0.0  ;;  %v301_v29 = vmul.f32 %v194_v34, %v194_v34 }
  0x2f   : > { %v234_v10 = vadd.f32 %v233_v62, %v232_v2  ;;  %v333_v55 = vadd.f32 %v332_v44, %v331_v48  ;;  %v161_v2 = vld [vmem:[%s468_s15 + $0xc0] sm:$0xff]  ;;  %v346_v30 = vsel %vm209_vm1, %v299_v15, 0.0  ;;  %v302_v36 = vmul.f32 %v195_v42, %v195_v42 }
  0x30   : > { %v253_v61 = vsel %vm209_vm1, %v198_v63, 0.0  ;;  %v200_v14 = vsub.f32 %v161_v2, %v479_v4  ;;  %v255_v5 = vsel %vm209_vm1, %v199_v7, 0.0  ;;  %v348_v38 = vsel %vm209_vm1, %v300_v22, 0.0 }
  0x31   : > { %v236_v17 = vadd.f32 %v235_v6, %v234_v10  ;;  %v335_v62 = vadd.f32 %v334_v52, %v333_v55  ;;  %v162_v10 = vld [vmem:[%s468_s15 + $0xc8] sm:$0xff]  ;;  %v303_v44 = vmul.f32 %v196_v49, %v196_v49  ;;  %v350_v45 = vsel %vm209_vm1, %v301_v29, 0.0 }
  0x32   : > { %v201_v21 = vsub.f32 %v162_v10, %v479_v4  ;;  %v257_v12 = vsel %vm209_vm1, %v200_v14, 0.0  ;;  %v304_v52 = vmul.f32 %v197_v56, %v197_v56  ;;  %v352_v53 = vsel %vm209_vm1, %v302_v36, 0.0 }
  0x33   : > { %v238_v24 = vadd.f32 %v237_v13, %v236_v17  ;;  %v337_v6 = vadd.f32 %v336_v58, %v335_v62  ;;  %v163_v17 = vld [vmem:[%s468_s15 + $0xd0] sm:$0xff]  ;;  %v305_v49 = vmul.f32 %v198_v63, %v198_v63  ;;  %v354_v59 = vsel %vm209_vm1, %v303_v44, 0.0 }
  0x34   : > { %v202_v28 = vsub.f32 %v163_v17, %v479_v4  ;;  %v259_v19 = vsel %vm209_vm1, %v201_v21, 0.0  ;;  %v356_v56 = vsel %vm209_vm1, %v304_v52, 0.0  ;;  %v308_v10 = vmul.f32 %v201_v21, %v201_v21 }
  0x35   : > { %v240_v31 = vadd.f32 %v239_v20, %v238_v24  ;;  %v339_v13 = vadd.f32 %v338_v1, %v337_v6  ;;  %v164_v24 = vld [vmem:[%s468_s15 + $0xd8] sm:$0xff]  ;;  %v306_v1 = vmul.f32 %v199_v7, %v199_v7  ;;  %v358_v8 = vsel %vm209_vm1, %v305_v49, 0.0 }
  0x36   : > { %v203_v35 = vsub.f32 %v164_v24, %v479_v4  ;;  %v261_v26 = vsel %vm209_vm1, %v202_v28, 0.0 }
  0x37   : > { %v242_v40 = vadd.f32 %v241_v27, %v240_v31  ;;  %v341_v20 = vadd.f32 %v340_v9, %v339_v13  ;;  %v165_v31 = vld [vmem:[%s468_s15 + $0xe0] sm:$0xff] }
  0x38   : > { %v204_v43 = vsub.f32 %v165_v31, %v479_v4  ;;  %v263_v34 = vsel %vm209_vm1, %v203_v35, 0.0  ;;  %v310_v17 = vmul.f32 %v203_v35, %v203_v35 }
  0x39   : > { %v244_v47 = vadd.f32 %v243_v33, %v242_v40  ;;  %v343_v27 = vadd.f32 %v342_v16, %v341_v20  ;;  %v166_v40 = vld [vmem:[%s468_s15 + $0xe8] sm:$0xff] }
  0x3a   : > { %v205_v50 = vsub.f32 %v166_v40, %v479_v4  ;;  %v265_v42 = vsel %vm209_vm1, %v204_v43, 0.0 }
  0x3b   : > { %v246_v54 = vadd.f32 %v245_v37, %v244_v47  ;;  %v345_v33 = vadd.f32 %v344_v23, %v343_v27  ;;  %v167_v47 = vld [vmem:[%s468_s15 + $0xf0] sm:$0xff] }
  0x3c   : > { %v206_v57 = vsub.f32 %v167_v47, %v479_v4  ;;  %v267_v58 = vsel %vm209_vm1, %v205_v50, 0.0  ;;  %v312_v21 = vmul.f32 %v205_v50, %v205_v50  ;;  %v282_v50 = vld [vmem:[%s625_s2 + $0x1] sm:$0x1] }
  0x3d   : > { %v248_v60 = vadd.f32 %v247_v39, %v246_v54  ;;  %v347_v37 = vadd.f32 %v346_v30, %v345_v33  ;;  %v168_v54 = vld [vmem:[%s468_s15 + $0xf8] sm:$0xff] }
  0x3e   : > { %v269_v0 = vsel %vm209_vm1, %v206_v57, 0.0  ;;  %v372_v35 = vsel %vm209_vm1, %v312_v21, 0.0 }
  0x3f   : > { %v250_v3 = vadd.f32 %v249_v46, %v248_v60  ;;  %v349_v39 = vadd.f32 %v348_v38, %v347_v37 }
  0x41   : > { %v252_v11 = vadd.f32 %v251_v51, %v250_v3  ;;  %v351_v46 = vadd.f32 %v350_v45, %v349_v39  ;;  %v207_v51 = vsub.f32 %v168_v54, %v479_v4  ;;  %v309_v4 = vmul.f32 %v202_v28, %v202_v28 }
  0x42   : > { %v313_v28 = vmul.f32 %v206_v57, %v206_v57 }
  0x43   : > { %v254_v18 = vadd.f32 %v253_v61, %v252_v11  ;;  %v353_v62 = vadd.f32 %v352_v53, %v351_v46  ;;  %v271_v6 = vsel %vm209_vm1, %v207_v51, 0.0  ;;  %v307_v61 = vmul.f32 %v200_v14, %v200_v14 }
  0x44   : > { %v360_v11 = vsel %vm209_vm1, %v306_v1, 0.0  ;;  %v311_v14 = vmul.f32 %v204_v43, %v204_v43  ;;  %v366_v22 = vsel %vm209_vm1, %v309_v4, 0.0  ;;  %v314_v33 = vmul.f32 %v207_v51, %v207_v51 }
  0x45   : > { %v256_v25 = vadd.f32 %v255_v5, %v254_v18  ;;  %v355_v3 = vadd.f32 %v354_v59, %v353_v62  ;;  %v362_v15 = vsel %vm209_vm1, %v307_v61, 0.0  ;;  %v364_v18 = vsel %vm209_vm1, %v308_v10, 0.0 }
  0x46   : > { %v370_v29 = vsel %vm209_vm1, %v311_v14, 0.0  ;;  %v374_v38 = vsel %vm209_vm1, %v313_v28, 0.0  ;;  %v376_v37 = vsel %vm209_vm1, %v314_v33, 0.0 }
  0x47   : > { %v258_v32 = vadd.f32 %v257_v12, %v256_v25  ;;  %v357_v63 = vadd.f32 %v356_v56, %v355_v3  ;;  %v368_v25 = vsel %vm209_vm1, %v310_v17, 0.0 }
  0x49   : > { %v260_v41 = vadd.f32 %v259_v19, %v258_v32  ;;  %v359_v5 = vadd.f32 %v358_v8, %v357_v63  ;;  %v208_v32 = vld [vmem:[%s625_s2] sm:$0x1] }
  0x4b   : > { %v262_v48 = vadd.f32 %v261_v26, %v260_v41  ;;  %v361_v16 = vadd.f32 %v360_v11, %v359_v5 }
  0x4d   : > { %v264_v55 = vadd.f32 %v263_v34, %v262_v48  ;;  %v363_v12 = vadd.f32 %v362_v15, %v361_v16 }
  0x4f   : > { %v266_v60 = vadd.f32 %v265_v42, %v264_v55  ;;  %v365_v24 = vadd.f32 %v364_v18, %v363_v12 }
  0x51   : > { %v268_v2 = vadd.f32 %v267_v58, %v266_v60  ;;  %v367_v19 = vadd.f32 %v366_v22, %v365_v24 }
  0x53   : > { %v270_v9 = vadd.f32 %v269_v0, %v268_v2  ;;  %v369_v31 = vadd.f32 %v368_v25, %v367_v19 }
  0x55   : > { %v272_v13 = vadd.f32 %v271_v6, %v270_v9  ;;  %v371_v36 = vadd.f32 %v370_v29, %v369_v31 }
  0x57   : > { %v273_v7 = vrot.slane %v272_v13, 4  ;;  %v373_v41 = vadd.f32 %v372_v35, %v371_v36 }
  0x59   : > { %v274_v20 = vadd.f32 %v273_v7, %v272_v13  ;;  %v375_v43 = vadd.f32 %v374_v38, %v373_v41 }
  0x5b   : > { %v275_v23 = vrot.slane %v274_v20, 2  ;;  %v377_v34 = vadd.f32 %v376_v37, %v375_v43 }
  0x5d   : > { %v276_v27 = vadd.f32 %v275_v23, %v274_v20  ;;  %v378_v44 = vrot.slane %v377_v34, 4 }
  0x5f   : > { %v277_v30 = vrot.slane %v276_v27, 1  ;;  %v379_v45 = vadd.f32 %v378_v44, %v377_v34 }
  0x61   : > { %v278_v26 = vadd.f32 %v277_v30, %v276_v27  ;;  %v380_v47 = vrot.slane %v379_v45, 2 }
  0x63   : > { %v279_v40 = vadd.f32 %v278_v26, %v208_v32  ;;  %v381_v48 = vadd.f32 %v380_v47, %v379_v45 }
  0x65   : > { %281 = vst.msk [vmem:[%s625_s2] sm:$0x1] %vm280_vm2, %v279_v40  ;;  %v382_v39 = vrot.slane %v381_v48, 1 }
  0x67   : > { %v383_v42 = vadd.f32 %v382_v39, %v381_v48 }
  0x69   : > { %v384_v52 = vadd.f32 %v383_v42, %v282_v50 }
  0x6b   : > { %385 = vst.msk [vmem:[%s625_s2 + $0x1] sm:$0x1] %vm280_vm2, %v384_v52 }
  0x6c PF: > { %s12_s9 = sadd.s32 1, %s439_s9  }
  0x6d   : > { %p9_p5 = scmp.ge.s32.totalorder %s12_s9, 4  }
  0x6f   :  { %11 = sbr.rel (!%p9_p5) target bundleno = 1 (0x1), region = 58 }

// kernel: residual_conv.13
= control target key start
LH: loop header
LB: loop body
LE: loop exit
PB: predicated region body
PF: predicated region fallthrough
CT: control target
= control target key end

     0   :  { %s710_s12 = smov 0   ;;  %s905_s0 = inlined_call_operand.vmem [shape: f32[512,4], index: 0, kind: input, shape index: {}]   ;;  %s906_s1 = inlined_call_operand.vmem [shape: f32[1,4], index: 1, kind: input, shape index: {}]   ;;  %s907_s2 = inlined_call_operand.vmem [shape: f32[1,4], index: 2, kind: input, shape index: {}]   ;;  %s908_s3 = inlined_call_operand.vmem [shape: bf16[512,4], index: 3, kind: output, shape index: {}]  }
   0x1 LB: > { %s597_s13 = sadd.s32 4294967295, %s688_s12   ;;  %p601_p0 = scmp.ge.s32.totalorder %s688_s12, 1  ;;  %s688_s12 = sphi %s710_s12, %s13_s12  }
   0x2   : > { %p138_p1 = scmp.lt.s32.totalorder %s688_s12, 3 }
   0x4   : > { %p139_p2 = pnand %p601_p0, %p138_p1 }
   0x5   : > { %s602_s14 = sshll.u32 (!%p139_p2), %s597_s13, 5  ;;  %v724_v0 = vld [vmem:[%s906_s1] ss:$0 sm:$0xff] (!%p139_p2)  ;;  %vm508_vm0 = vcmask (!%p139_p2), 27648  }
   0x6   : > { %142 = sbr.rel (%p139_p2) target bundleno = 72 (0x48), region = 32  ;;  %p163_p3 = scmp.lt.s32.totalorder (!%p139_p2), %s602_s14, 63  ;;  %v734_v1 = vld [vmem:[%s907_s2] ss:$0 sm:$0xff] (!%p139_p2) }
   0xd   : > { %s910_s14 = smov (!%p163_p3, %s602_s14), 63 }
   0xe   : > { %s603_s15 = sshll.u32 %s910_s14, 3  ;;  %s605_s23 = sshll.u32 %s910_s14, 2 }
   0xf   : > { %s729_s20 = scalar_lea.vmem %s905_s0, %s603_s15  ;;  %s762_s26 = scalar_lea.vmem %s908_s3, %s605_s23 }
  0x10   : > { %v174_v2 = vld [vmem:[%s729_s20] sm:$0xff]  ;;  %v175_v3 = vld [vmem:[%s729_s20 + $0x8] sm:$0xff]  ;;  %v176_v4 = vld [vmem:[%s729_s20 + $0x10] sm:$0xff] }
  0x11   : > { %v213_v5 = vmul.f32 %v724_v0, %v174_v2  ;;  %v214_v6 = vmul.f32 %v724_v0, %v175_v3  ;;  %v215_v7 = vmul.f32 %v724_v0, %v176_v4  ;;  %v177_v8 = vld [vmem:[%s729_s20 + $0x18] sm:$0xff]  ;;  %v178_v9 = vld [vmem:[%s729_s20 + $0x20] sm:$0xff]  ;;  %v179_v10 = vld [vmem:[%s729_s20 + $0x28] sm:$0xff] }
  0x12   : > { %v216_v11 = vmul.f32 %v724_v0, %v177_v8  ;;  %v217_v12 = vmul.f32 %v724_v0, %v178_v9  ;;  %v218_v13 = vmul.f32 %v724_v0, %v179_v10  ;;  %v180_v14 = vld [vmem:[%s729_s20 + $0x30] sm:$0xff]  ;;  %v181_v15 = vld [vmem:[%s729_s20 + $0x38] sm:$0xff]  ;;  %v182_v31 = vld [vmem:[%s729_s20 + $0x40] sm:$0xff] }
  0x13   : > { %v252_v16 = vadd.f32 %v734_v1, %v213_v5  ;;  %v253_v17 = vadd.f32 %v734_v1, %v214_v6  ;;  %v254_v18 = vadd.f32 %v734_v1, %v215_v7  ;;  %v219_v19 = vmul.f32 %v724_v0, %v180_v14  ;;  %v183_v36 = vld [vmem:[%s729_s20 + $0x48] sm:$0xff]  ;;  %v184_v37 = vld [vmem:[%s729_s20 + $0x50] sm:$0xff]  ;;  %v185_v38 = vld [vmem:[%s729_s20 + $0x58] sm:$0xff] }
  0x14   : > { %v255_v20 = vadd.f32 %v734_v1, %v216_v11  ;;  %v256_v21 = vadd.f32 %v734_v1, %v217_v12  ;;  %v257_v22 = vadd.f32 %v734_v1, %v218_v13  ;;  %v220_v23 = vmul.f32 %v724_v0, %v181_v15  ;;  %v186_v50 = vld [vmem:[%s729_s20 + $0x60] sm:$0xff]  ;;  %v187_v2 = vld [vmem:[%s729_s20 + $0x68] sm:$0xff]  ;;  %v188_v5 = vld [vmem:[%s729_s20 + $0x70] sm:$0xff] }
  0x15   : > { %vm284_vm1 = vcmp.gt.f32.partialorder %v252_v16, 0.0  ;;  %v316_v24 = vmul.f32 0.2, %v252_v16  ;;  %vm285_vm2 = vcmp.gt.f32.partialorder %v253_v17, 0.0  ;;  %v317_v25 = vmul.f32 0.2, %v253_v17 }
  0x16   : > { %vm286_vm3 = vcmp.gt.f32.partialorder %v254_v18, 0.0  ;;  %v318_v26 = vmul.f32 0.2, %v254_v18  ;;  %vm287_vm4 = vcmp.gt.f32.partialorder %v255_v20, 0.0  ;;  %v319_v27 = vmul.f32 0.2, %v255_v20 }
  0x17   : > { %v348_v28 = vsel %vm284_vm1, %v252_v16, %v316_v24  ;;  %v349_v29 = vsel %vm285_vm2, %v253_v17, %v317_v25  ;;  %vm288_vm5 = vcmp.gt.f32.partialorder %v256_v21, 0.0  ;;  %v320_v30 = vmul.f32 0.2, %v256_v21  ;;  %v189_v13 = vld [vmem:[%s729_s20 + $0x78] sm:$0xff]  ;;  %v190_v14 = vld [vmem:[%s729_s20 + $0x80] sm:$0xff] }
  0x18   : > { %v642_v32 = vpack.c.bf16 %v348_v28, %v348_v28  ;;  %v643_v33 = vpack.c.bf16 %v349_v29, %v349_v29  ;;  %v350_v34 = vsel %vm286_vm3, %v254_v18, %v318_v26  ;;  %v351_v35 = vsel %vm287_vm4, %v255_v20, %v319_v27  ;;  %v192_v20 = vld [vmem:[%s729_s20 + $0x90] sm:$0xff] }
  0x19   : > { %v644_v39 = vpack.c.bf16 %v350_v34, %v350_v34  ;;  %v645_v40 = vpack.c.bf16 %v351_v35, %v351_v35  ;;  %v352_v41 = vsel %vm288_vm5, %v256_v21, %v320_v30  ;;  %vm289_vm6 = vcmp.gt.f32.partialorder %v257_v22, 0.0  ;;  %v193_v21 = vld [vmem:[%s729_s20 + $0x98] sm:$0xff] }
  0x1a   : > { %509 = vst.msk [vmem:[%s762_s26] sm:$0xf] %vm508_vm0, %v642_v32  ;;  %510 = vst.msk [vmem:[%s762_s26 + $0x4] sm:$0xf] %vm508_vm0, %v643_v33  ;;  %v646_v42 = vpack.c.bf16 %v352_v41, %v352_v41  ;;  %v321_v43 = vmul.f32 0.2, %v257_v22  ;;  %v258_v44 = vadd.f32 %v734_v1, %v219_v19  ;;  %v259_v45 = vadd.f32 %v734_v1, %v220_v23 }
  0x1b   : > { %511 = vst.msk [vmem:[%s762_s26 + $0x8] sm:$0xf] %vm508_vm0, %v644_v39  ;;  %512 = vst.msk [vmem:[%s762_s26 + $0xc] sm:$0xf] %vm508_vm0, %v645_v40  ;;  %v221_v46 = vmul.f32 %v724_v0, %v182_v31  ;;  %v222_v47 = vmul.f32 %v724_v0, %v183_v36  ;;  %v223_v48 = vmul.f32 %v724_v0, %v184_v37  ;;  %v191_v19 = vld [vmem:[%s729_s20 + $0x88] sm:$0xff]  ;;  %v194_v33 = vld [vmem:[%s729_s20 + $0xa0] sm:$0xff] }
  0x1c   : > { %v224_v49 = vmul.f32 %v724_v0, %v185_v38  ;;  %513 = vst.msk [vmem:[%s762_s26 + $0x10] sm:$0xf] %vm508_vm0, %v646_v42  ;;  %v353_v51 = vsel %vm289_vm6, %v257_v22, %v321_v43  ;;  %vm290_vm7 = vcmp.gt.f32.partialorder %v258_v44, 0.0  ;;  %v322_v52 = vmul.f32 0.2, %v258_v44 }
  0x1d   : > { %vm291_vm8 = vcmp.gt.f32.partialorder %v259_v45, 0.0  ;;  %v647_v53 = vpack.c.bf16 %v353_v51, %v353_v51  ;;  %v323_v54 = vmul.f32 0.2, %v259_v45  ;;  %v260_v55 = vadd.f32 %v734_v1, %v221_v46 }
  0x1e   : > { %v261_v56 = vadd.f32 %v734_v1, %v222_v47  ;;  %v354_v57 = vsel %vm290_vm7, %v258_v44, %v322_v52  ;;  %v262_v58 = vadd.f32 %v734_v1, %v223_v48  ;;  %v263_v59 = vadd.f32 %v734_v1, %v224_v49  ;;  %v195_v52 = vld [vmem:[%s729_s20 + $0xa8] sm:$0xff] }
  0x1f   : > { %v225_v60 = vmul.f32 %v724_v0, %v186_v50  ;;  %514 = vst.msk [vmem:[%s762_s26 + $0x14] sm:$0xf] %vm508_vm0, %v647_v53  ;;  %v648_v61 = vpack.c.bf16 %v354_v57, %v354_v57  ;;  %v355_v62 = vsel %vm291_vm8, %v259_v45, %v323_v54  ;;  %vm292_vm9 = vcmp.gt.f32.partialorder %v260_v55, 0.0 }
  0x20   : > { %v324_v63 = vmul.f32 0.2, %v260_v55  ;;  %v649_v3 = vpack.c.bf16 %v355_v62, %v355_v62  ;;  %vm293_vm10 = vcmp.gt.f32.partialorder %v261_v56, 0.0  ;;  %v325_v4 = vmul.f32 0.2, %v261_v56  ;;  %v198_v62 = vld [vmem:[%s729_s20 + $0xc0] sm:$0xff] }
  0x21   : > { %vm294_vm11 = vcmp.gt.f32.partialorder %v262_v58, 0.0  ;;  %515 = vst.msk [vmem:[%s762_s26 + $0x18] sm:$0xf] %vm508_vm0, %v648_v61  ;;  %v326_v7 = vmul.f32 0.2, %v262_v58  ;;  %vm295_vm12 = vcmp.gt.f32.partialorder %v263_v59, 0.0  ;;  %v264_v11 = vadd.f32 %v734_v1, %v225_v60 }
  0x22   : > { %v356_v6 = vsel %vm292_vm9, %v260_v55, %v324_v63  ;;  %v327_v8 = vmul.f32 0.2, %v263_v59  ;;  %516 = vst.msk [vmem:[%s762_s26 + $0x1c] sm:$0xf] %vm508_vm0, %v649_v3  ;;  %v357_v10 = vsel %vm293_vm10, %v261_v56, %v325_v4  ;;  %v226_v12 = vmul.f32 %v724_v0, %v187_v2  ;;  %v196_v56 = vld [vmem:[%s729_s20 + $0xb0] sm:$0xff]  ;;  %v197_v61 = vld [vmem:[%s729_s20 + $0xb8] sm:$0xff] }
  0x23   : > { %v650_v9 = vpack.c.bf16 %v356_v6, %v356_v6  ;;  %v651_v15 = vpack.c.bf16 %v357_v10, %v357_v10  ;;  %v358_v16 = vsel %vm294_vm11, %v262_v58, %v326_v7  ;;  %v227_v18 = vmul.f32 %v724_v0, %v188_v5  ;;  %v199_v63 = vld [vmem:[%s729_s20 + $0xc8] sm:$0xff]  ;;  %v200_v6 = vld [vmem:[%s729_s20 + $0xd0] sm:$0xff]  ;;  %v201_v7 = vld [vmem:[%s729_s20 + $0xd8] sm:$0xff] }
  0x24   : > { %v359_v17 = vsel %vm295_vm12, %v263_v59, %v327_v8  ;;  %v652_v22 = vpack.c.bf16 %v358_v16, %v358_v16  ;;  %vm296_vm13 = vcmp.gt.f32.partialorder %v264_v11, 0.0  ;;  %v328_v24 = vmul.f32 0.2, %v264_v11 }
  0x25   : > { %517 = vst.msk [vmem:[%s762_s26 + $0x20] sm:$0xf] %vm508_vm0, %v650_v9  ;;  %v653_v23 = vpack.c.bf16 %v359_v17, %v359_v17  ;;  %518 = vst.msk [vmem:[%s762_s26 + $0x24] sm:$0xf] %vm508_vm0, %v651_v15  ;;  %v265_v25 = vadd.f32 %v734_v1, %v226_v12  ;;  %v266_v26 = vadd.f32 %v734_v1, %v227_v18 }
  0x26   : > { %v228_v27 = vmul.f32 %v724_v0, %v189_v13  ;;  %v229_v28 = vmul.f32 %v724_v0, %v190_v14  ;;  %519 = vst.msk [vmem:[%s762_s26 + $0x28] sm:$0xf] %vm508_vm0, %v652_v22  ;;  %v360_v29 = vsel %vm296_vm13, %v264_v11, %v328_v24  ;;  %v230_v30 = vmul.f32 %v724_v0, %v191_v19 }
  0x27   : > { %520 = vst.msk [vmem:[%s762_s26 + $0x2c] sm:$0xf] %vm508_vm0, %v653_v23  ;;  %v231_v31 = vmul.f32 %v724_v0, %v192_v20  ;;  %v232_v32 = vmul.f32 %v724_v0, %v193_v21  ;;  %v654_v34 = vpack.c.bf16 %v360_v29, %v360_v29  ;;  %vm297_vm14 = vcmp.gt.f32.partialorder %v265_v25, 0.0 }
  0x28   : > { %v329_v35 = vmul.f32 0.2, %v265_v25  ;;  %vm298_vm15 = vcmp.gt.f32.partialorder %v266_v26, 0.0  ;;  %v330_v36 = vmul.f32 0.2, %v266_v26  ;;  %v267_v37 = vadd.f32 %v734_v1, %v228_v27 }
  0x29   : > { %v268_v38 = vadd.f32 %v734_v1, %v229_v28  ;;  %v269_v39 = vadd.f32 %v734_v1, %v230_v30  ;;  %521 = vst.msk [vmem:[%s762_s26 + $0x30] sm:$0xf] %vm508_vm0, %v654_v34  ;;  %v270_v41 = vadd.f32 %v734_v1, %v231_v31  ;;  %v271_v42 = vadd.f32 %v734_v1, %v232_v32  ;;  %v202_v31 = vld [vmem:[%s729_s20 + $0xe0] sm:$0xff] }
  0x2a   : > { %v361_v40 = vsel %vm297_vm14, %v265_v25, %v329_v35  ;;  %v233_v43 = vmul.f32 %v724_v0, %v194_v33  ;;  %v362_v45 = vsel %vm298_vm15, %v266_v26, %v330_v36  ;;  %vm299_vm1 = vcmp.gt.f32.partialorder %v267_v37, 0.0  ;;  %v203_v35 = vld [vmem:[%s729_s20 + $0xe8] sm:$0xff]  ;;  %v204_v36 = vld [vmem:[%s729_s20 + $0xf0] sm:$0xff] }
  0x2b   : > { %v655_v44 = vpack.c.bf16 %v361_v40, %v361_v40  ;;  %v331_v46 = vmul.f32 0.2, %v267_v37  ;;  %v656_v47 = vpack.c.bf16 %v362_v45, %v362_v45  ;;  %vm300_vm2 = vcmp.gt.f32.partialorder %v268_v38, 0.0 }
  0x2c   : > { %v332_v48 = vmul.f32 0.2, %v268_v38  ;;  %vm301_vm3 = vcmp.gt.f32.partialorder %v269_v39, 0.0  ;;  %v333_v50 = vmul.f32 0.2, %v269_v39  ;;  %vm302_vm4 = vcmp.gt.f32.partialorder %v270_v41, 0.0 }
  0x2d   : > { %522 = vst.msk [vmem:[%s762_s26 + $0x34] sm:$0xf] %vm508_vm0, %v655_v44  ;;  %v363_v49 = vsel %vm299_vm1, %v267_v37, %v331_v46  ;;  %v334_v51 = vmul.f32 0.2, %v270_v41  ;;  %523 = vst.msk [vmem:[%s762_s26 + $0x38] sm:$0xf] %vm508_vm0, %v656_v47  ;;  %v272_v60 = vadd.f32 %v734_v1, %v233_v43  ;;  %v234_v5 = vmul.f32 %v724_v0, %v195_v52 }
  0x2e   : > { %v657_v53 = vpack.c.bf16 %v363_v49, %v363_v49  ;;  %v364_v54 = vsel %vm300_vm2, %v268_v38, %v332_v48  ;;  %vm303_vm5 = vcmp.gt.f32.partialorder %v271_v42, 0.0  ;;  %v335_v55 = vmul.f32 0.2, %v271_v42  ;;  %v205_v44 = vld [vmem:[%s729_s20 + $0xf8] sm:$0xff] }
  0x2f   : > { %v658_v57 = vpack.c.bf16 %v364_v54, %v364_v54  ;;  %v365_v58 = vsel %vm301_vm3, %v269_v39, %v333_v50  ;;  %v366_v59 = vsel %vm302_vm4, %v270_v41, %v334_v51  ;;  %vm304_vm6 = vcmp.gt.f32.partialorder %v272_v60, 0.0 }
  0x30   : > { %524 = vst.msk [vmem:[%s762_s26 + $0x3c] sm:$0xf] %vm508_vm0, %v657_v53  ;;  %v659_v2 = vpack.c.bf16 %v365_v58, %v365_v58  ;;  %v660_v3 = vpack.c.bf16 %v366_v59, %v366_v59  ;;  %v367_v4 = vsel %vm303_vm5, %v271_v42, %v335_v55  ;;  %v336_v9 = vmul.f32 0.2, %v272_v60 }
  0x31   : > { %525 = vst.msk [vmem:[%s762_s26 + $0x40] sm:$0xf] %vm508_vm0, %v658_v57  ;;  %v661_v8 = vpack.c.bf16 %v367_v4, %v367_v4  ;;  %v235_v10 = vmul.f32 %v724_v0, %v196_v56  ;;  %v273_v11 = vadd.f32 %v734_v1, %v234_v5  ;;  %v236_v12 = vmul.f32 %v724_v0, %v197_v61 }
  0x32   : > { %526 = vst.msk [vmem:[%s762_s26 + $0x44] sm:$0xf] %vm508_vm0, %v659_v2  ;;  %527 = vst.msk [vmem:[%s762_s26 + $0x48] sm:$0xf] %vm508_vm0, %v660_v3  ;;  %v237_v13 = vmul.f32 %v724_v0, %v198_v62  ;;  %v238_v14 = vmul.f32 %v724_v0, %v199_v63  ;;  %v368_v15 = vsel %vm304_vm6, %v272_v60, %v336_v9 }
  0x33   : > { %528 = vst.msk [vmem:[%s762_s26 + $0x4c] sm:$0xf] %vm508_vm0, %v661_v8  ;;  %v274_v16 = vadd.f32 %v734_v1, %v235_v10  ;;  %v239_v17 = vmul.f32 %v724_v0, %v200_v6  ;;  %v240_v18 = vmul.f32 %v724_v0, %v201_v7  ;;  %v662_v19 = vpack.c.bf16 %v368_v15, %v368_v15 }
  0x34   : > { %vm305_vm7 = vcmp.gt.f32.partialorder %v273_v11, 0.0  ;;  %v337_v20 = vmul.f32 0.2, %v273_v11  ;;  %v275_v21 = vadd.f32 %v734_v1, %v236_v12  ;;  %v276_v23 = vadd.f32 %v734_v1, %v237_v13 }
  0x35   : > { %vm306_vm8 = vcmp.gt.f32.partialorder %v274_v16, 0.0  ;;  %v338_v22 = vmul.f32 0.2, %v274_v16  ;;  %v277_v24 = vadd.f32 %v734_v1, %v238_v14  ;;  %529 = vst.msk [vmem:[%s762_s26 + $0x50] sm:$0xf] %vm508_vm0, %v662_v19  ;;  %v278_v27 = vadd.f32 %v734_v1, %v239_v17 }
  0x36   : > { %v369_v25 = vsel %vm305_vm7, %v273_v11, %v337_v20  ;;  %vm307_vm9 = vcmp.gt.f32.partialorder %v275_v21, 0.0  ;;  %v339_v26 = vmul.f32 0.2, %v275_v21  ;;  %vm308_vm10 = vcmp.gt.f32.partialorder %v276_v23, 0.0 }
  0x37   : > { %v663_v28 = vpack.c.bf16 %v369_v25, %v369_v25  ;;  %v370_v29 = vsel %vm306_vm8, %v274_v16, %v338_v22  ;;  %v340_v30 = vmul.f32 0.2, %v276_v23  ;;  %vm309_vm11 = vcmp.gt.f32.partialorder %v277_v24, 0.0 }
  0x38   : > { %v664_v32 = vpack.c.bf16 %v370_v29, %v370_v29  ;;  %v371_v33 = vsel %vm307_vm9, %v275_v21, %v339_v26  ;;  %v341_v34 = vmul.f32 0.2, %v277_v24  ;;  %vm310_vm12 = vcmp.gt.f32.partialorder %v278_v27, 0.0 }
  0x39   : > { %530 = vst.msk [vmem:[%s762_s26 + $0x54] sm:$0xf] %vm508_vm0, %v663_v28  ;;  %v665_v37 = vpack.c.bf16 %v371_v33, %v371_v33  ;;  %v372_v38 = vsel %vm308_vm10, %v276_v23, %v340_v30  ;;  %v342_v39 = vmul.f32 0.2, %v278_v27  ;;  %v279_v42 = vadd.f32 %v734_v1, %v240_v18 }
  0x3a   : > { %531 = vst.msk [vmem:[%s762_s26 + $0x58] sm:$0xf] %vm508_vm0, %v664_v32  ;;  %v666_v40 = vpack.c.bf16 %v372_v38, %v372_v38  ;;  %v373_v41 = vsel %vm309_vm11, %v277_v24, %v341_v34  ;;  %v241_v43 = vmul.f32 %v724_v0, %v202_v31  ;;  %v242_v47 = vmul.f32 %v724_v0, %v203_v35 }
  0x3b   : > { %532 = vst.msk [vmem:[%s762_s26 + $0x5c] sm:$0xf] %vm508_vm0, %v665_v37  ;;  %v667_v45 = vpack.c.bf16 %v373_v41, %v373_v41  ;;  %v374_v46 = vsel %vm310_vm12, %v278_v27, %v342_v39  ;;  %v243_v48 = vmul.f32 %v724_v0, %v204_v36  ;;  %vm311_vm13 = vcmp.gt.f32.partialorder %v279_v42, 0.0 }
  0x3c   : > { %533 = vst.msk [vmem:[%s762_s26 + $0x60] sm:$0xf] %vm508_vm0, %v666_v40  ;;  %v668_v49 = vpack.c.bf16 %v374_v46, %v374_v46  ;;  %v343_v50 = vmul.f32 0.2, %v279_v42  ;;  %v280_v51 = vadd.f32 %v734_v1, %v241_v43  ;;  %v281_v52 = vadd.f32 %v734_v1, %v242_v47 }
  0x3d   : > { %534 = vst.msk [vmem:[%s762_s26 + $0x64] sm:$0xf] %vm508_vm0, %v667_v45  ;;  %v282_v53 = vadd.f32 %v734_v1, %v243_v48  ;;  %v244_v54 = vmul.f32 %v724_v0, %v205_v44 }
  0x3e   : > { %535 = vst.msk [vmem:[%s762_s26 + $0x68] sm:$0xf] %vm508_vm0, %v668_v49  ;;  %v375_v55 = vsel %vm311_vm13, %v279_v42, %v343_v50  ;;  %vm312_vm14 = vcmp.gt.f32.partialorder %v280_v51, 0.0  ;;  %v344_v56 = vmul.f32 0.2, %v280_v51  ;;  %vm313_vm15 = vcmp.gt.f32.partialorder %v281_v52, 0.0 }
  0x3f   : > { %v669_v57 = vpack.c.bf16 %v375_v55, %v375_v55  ;;  %v345_v58 = vmul.f32 0.2, %v281_v52  ;;  %vm314_vm1 = vcmp.gt.f32.partialorder %v282_v53, 0.0  ;;  %v346_v60 = vmul.f32 0.2, %v282_v53 }
  0x40   : > { %v376_v59 = vsel %vm312_vm14, %v280_v51, %v344_v56  ;;  %v283_v61 = vadd.f32 %v734_v1, %v244_v54 }
  0x41   : > { %536 = vst.msk [vmem:[%s762_s26 + $0x6c] sm:$0xf] %vm508_vm0, %v669_v57  ;;  %v670_v0 = vpack.c.bf16 %v376_v59, %v376_v59  ;;  %v377_v62 = vsel %vm313_vm15, %v281_v52, %v345_v58  ;;  %v378_v2 = vsel %vm314_vm1, %v282_v53, %v346_v60 }
  0x42   : > { %v671_v63 = vpack.c.bf16 %v377_v62, %v377_v62  ;;  %vm315_vm2 = vcmp.gt.f32.partialorder %v283_v61, 0.0  ;;  %v347_v3 = vmul.f32 0.2, %v283_v61  ;;  %v672_v4 = vpack.c.bf16 %v378_v2, %v378_v2 }
  0x43   : > { %537 = vst.msk [vmem:[%s762_s26 + $0x70] sm:$0xf] %vm508_vm0, %v670_v0 }
  0x44   : > { %538 = vst.msk [vmem:[%s762_s26 + $0x74] sm:$0xf] %vm508_vm0, %v671_v63  ;;  %v379_v5 = vsel %vm315_vm2, %v283_v61, %v347_v3  ;;  %539 = vst.msk [vmem:[%s762_s26 + $0x78] sm:$0xf] %vm508_vm0, %v672_v4 }
  0x45   : > { %v673_v6 = vpack.c.bf16 %v379_v5, %v379_v5 }
  0x47   : > { %540 = vst.msk [vmem:[%s762_s26 + $0x7c] sm:$0xf] %vm508_vm0, %v673_v6 }
  0x48 PF: > { %s13_s12 = sadd.s32 1, %s688_s12  }
  0x49   : > { %p10_p4 = scmp.ge.s32.totalorder %s13_s12, 4  }
  0x4b   :  { %12 = sbr.rel (!%p10_p4) target bundleno = 1 (0x1), region = 62 }

// kernel: residual_conv.16
= control target key start
LH: loop header
LB: loop body
LE: loop exit
PB: predicated region body
PF: predicated region fallthrough
CT: control target
= control target key end

     0   :  { %vm15_vm0 = vcmask 58368   ;;  %v160_v0 = vmov 0.0   ;;  %vm57_vm1 = vcmask 64512   ;;  %vm96_vm2 = vcmask 57344   ;;  %s292_s2 = inlined_call_operand.vmem [shape: f32[2,8], index: 2, kind: output, shape index: {}]   ;;  %s293_s0 = inlined_call_operand.vmem [shape: f32[128,8], index: 0, kind: input, shape index: {}]   ;;  %s294_s1 = inlined_call_operand.vmem [shape: f32[1,8], index: 1, kind: input, shape index: {}]  }
   0x1   :  { %16 = vst.msk [vmem:[%s292_s2] sm:$0x3] %vm15_vm0, %v160_v0  ;;  %v17_v1 = vld [vmem:[%s293_s0] sm:$0xff]  ;;  %v18_v2 = vld [vmem:[%s293_s0 + $0x8] sm:$0xff]  ;;  %v19_v3 = vld [vmem:[%s293_s0 + $0x10] sm:$0xff] }
   0x2   :  { %v191_v4 = vld [vmem:[%s294_s1] ss:$0 sm:$0xff]  ;;  %v20_v5 = vld [vmem:[%s293_s0 + $0x18] sm:$0xff]  ;;  %v22_v14 = vld [vmem:[%s293_s0 + $0x28] sm:$0xff] }
   0x3   :  { %v40_v6 = vsub.f32 %v17_v1, %v191_v4  ;;  %v41_v7 = vsub.f32 %v18_v2, %v191_v4  ;;  %v42_v8 = vsub.f32 %v19_v3, %v191_v4  ;;  %v21_v9 = vld [vmem:[%s293_s0 + $0x20] sm:$0xff]  ;;  %v43_v10 = vsub.f32 %v20_v5, %v191_v4  ;;  %v23_v18 = vld [vmem:[%s293_s0 + $0x30] sm:$0xff]  ;;  %v24_v22 = vld [vmem:[%s293_s0 + $0x38] sm:$0xff] }
   0x4   :  { %v44_v16 = vsub.f32 %v21_v9, %v191_v4  ;;  %v45_v20 = vsub.f32 %v22_v14, %v191_v4  ;;  %v46_v27 = vsub.f32 %v23_v18, %v191_v4  ;;  %v25_v29 = vld [vmem:[%s293_s0 + $0x40] sm:$0xff]  ;;  %v47_v32 = vsub.f32 %v24_v22, %v191_v4  ;;  %v26_v35 = vld [vmem:[%s293_s0 + $0x48] sm:$0xff]  ;;  %v27_v43 = vld [vmem:[%s293_s0 + $0x50] sm:$0xff] }
   0x5   :  { %v58_v11 = vsel %vm57_vm1, %v40_v6, 0.0  ;;  %v59_v12 = vsel %vm57_vm1, %v41_v7, 0.0  ;;  %v61_v13 = vsel %vm57_vm1, %v42_v8, 0.0  ;;  %v63_v17 = vsel %vm57_vm1, %v43_v10, 0.0  ;;  %v28_v50 = vld [vmem:[%s293_s0 + $0x58] sm:$0xff]  ;;  %v29_v57 = vld [vmem:[%s293_s0 + $0x60] sm:$0xff] }
   0x6   :  { %v60_v15 = vadd.f32 %v59_v12, %v58_v11  ;;  %v65_v21 = vsel %vm57_vm1, %v44_v16, 0.0  ;;  %v99_v24 = vmul.f32 %v40_v6, %v40_v6  ;;  %v100_v25 = vmul.f32 %v41_v7, %v41_v7  ;;  %v30_v0 = vld [vmem:[%s293_s0 + $0x68] sm:$0xff] }
   0x7   :  { %v101_v26 = vmul.f32 %v42_v8, %v42_v8  ;;  %v67_v28 = vsel %vm57_vm1, %v45_v20, 0.0  ;;  %v102_v31 = vmul.f32 %v43_v10, %v43_v10  ;;  %v69_v33 = vsel %vm57_vm1, %v46_v27, 0.0  ;;  %v31_v8 = vld [vmem:[%s293_s0 + $0x70] sm:$0xff] }
   0x8   :  { %v62_v19 = vadd.f32 %v61_v13, %v60_v15  ;;  %v103_v34 = vmul.f32 %v44_v16, %v44_v16  ;;  %v115_v37 = vsel %vm57_vm1, %v99_v24, 0.0  ;;  %v116_v38 = vsel %vm57_vm1, %v100_v25, 0.0  ;;  %v32_v15 = vld [vmem:[%s293_s0 + $0x78] sm:$0xff] }
   0x9   :  { %v118_v39 = vsel %vm57_vm1, %v101_v26, 0.0  ;;  %v48_v40 = vsub.f32 %v25_v29, %v191_v4  ;;  %v71_v41 = vsel %vm57_vm1, %v47_v32, 0.0  ;;  %v117_v42 = vadd.f32 %v116_v38, %v115_v37 }
   0xa   :  { %v64_v23 = vadd.f32 %v63_v17, %v62_v19  ;;  %v104_v45 = vmul.f32 %v45_v20, %v45_v20  ;;  %v120_v46 = vsel %vm57_vm1, %v102_v31, 0.0  ;;  %v49_v47 = vsub.f32 %v26_v35, %v191_v4 }
   0xb   :  { %v73_v48 = vsel %vm57_vm1, %v48_v40, 0.0  ;;  %v119_v49 = vadd.f32 %v118_v39, %v117_v42  ;;  %v105_v52 = vmul.f32 %v46_v27, %v46_v27  ;;  %v122_v53 = vsel %vm57_vm1, %v103_v34, 0.0 }
   0xc   :  { %v66_v30 = vadd.f32 %v65_v21, %v64_v23  ;;  %v50_v54 = vsub.f32 %v27_v43, %v191_v4  ;;  %v75_v55 = vsel %vm57_vm1, %v49_v47, 0.0  ;;  %v106_v59 = vmul.f32 %v47_v32, %v47_v32 }
   0xd   :  { %v121_v56 = vadd.f32 %v120_v46, %v119_v49  ;;  %v124_v60 = vsel %vm57_vm1, %v104_v45, 0.0  ;;  %v51_v61 = vsub.f32 %v28_v50, %v191_v4  ;;  %v107_v2 = vmul.f32 %v48_v40, %v48_v40 }
   0xe   :  { %v68_v36 = vadd.f32 %v67_v28, %v66_v30  ;;  %v77_v62 = vsel %vm57_vm1, %v50_v54, 0.0  ;;  %v126_v3 = vsel %vm57_vm1, %v105_v52, 0.0  ;;  %v52_v5 = vsub.f32 %v29_v57, %v191_v4 }
   0xf   :  { %v123_v63 = vadd.f32 %v122_v53, %v121_v56  ;;  %v79_v6 = vsel %vm57_vm1, %v51_v61, 0.0  ;;  %v108_v10 = vmul.f32 %v49_v47, %v49_v47  ;;  %v128_v11 = vsel %vm57_vm1, %v106_v59, 0.0  ;;  %v56_v53 = vld [vmem:[%s292_s2] sm:$0x1] }
  0x10   :  { %v70_v44 = vadd.f32 %v69_v33, %v68_v36  ;;  %v53_v12 = vsub.f32 %v30_v0, %v191_v4  ;;  %v81_v13 = vsel %vm57_vm1, %v52_v5, 0.0  ;;  %v109_v17 = vmul.f32 %v50_v54, %v50_v54 }
  0x11   :  { %v125_v7 = vadd.f32 %v124_v60, %v123_v63  ;;  %v130_v18 = vsel %vm57_vm1, %v107_v2, 0.0  ;;  %v54_v19 = vsub.f32 %v31_v8, %v191_v4  ;;  %v110_v23 = vmul.f32 %v51_v61, %v51_v61  ;;  %v98_v61 = vld [vmem:[%s292_s2 + $0x1] sm:$0x1] }
  0x12   :  { %v72_v51 = vadd.f32 %v71_v41, %v70_v44  ;;  %v83_v20 = vsel %vm57_vm1, %v53_v12, 0.0  ;;  %v132_v24 = vsel %vm57_vm1, %v108_v10, 0.0  ;;  %v55_v25 = vsub.f32 %v32_v15, %v191_v4 }
  0x13   :  { %v127_v14 = vadd.f32 %v126_v3, %v125_v7  ;;  %v85_v26 = vsel %vm57_vm1, %v54_v19, 0.0  ;;  %v111_v29 = vmul.f32 %v52_v5, %v52_v5  ;;  %v134_v30 = vsel %vm57_vm1, %v109_v17, 0.0 }
  0x14   :  { %v74_v58 = vadd.f32 %v73_v48, %v72_v51  ;;  %v87_v31 = vsel %vm57_vm1, %v55_v25, 0.0  ;;  %v112_v34 = vmul.f32 %v53_v12, %v53_v12  ;;  %v136_v35 = vsel %vm57_vm1, %v110_v23, 0.0 }
  0x15   :  { %v129_v21 = vadd.f32 %v128_v11, %v127_v14  ;;  %v113_v38 = vmul.f32 %v54_v19, %v54_v19  ;;  %v138_v39 = vsel %vm57_vm1, %v111_v29, 0.0  ;;  %v114_v41 = vmul.f32 %v55_v25, %v55_v25 }
  0x16   :  { %v76_v1 = vadd.f32 %v75_v55, %v74_v58  ;;  %v140_v42 = vsel %vm57_vm1, %v112_v34, 0.0 }
  0x17   :  { %v131_v27 = vadd.f32 %v130_v18, %v129_v21  ;;  %v142_v45 = vsel %vm57_vm1, %v113_v38, 0.0  ;;  %v144_v48 = vsel %vm57_vm1, %v114_v41, 0.0 }
  0x18   :  { %v78_v9 = vadd.f32 %v77_v62, %v76_v1 }
  0x19   :  { %v133_v32 = vadd.f32 %v132_v24, %v131_v27 }
  0x1a   :  { %v80_v16 = vadd.f32 %v79_v6, %v78_v9 }
  0x1b   :  { %v135_v36 = vadd.f32 %v134_v30, %v133_v32 }
  0x1c   :  { %v82_v22 = vadd.f32 %v81_v13, %v80_v16 }
  0x1d   :  { %v137_v4 = vadd.f32 %v136_v35, %v135_v36 }
  0x1e   :  { %v84_v28 = vadd.f32 %v83_v20, %v82_v22 }
  0x1f   :  { %v139_v43 = vadd.f32 %v138_v39, %v137_v4 }
  0x20   :  { %v86_v33 = vadd.f32 %v85_v26, %v84_v28 }
  0x21   :  { %v141_v46 = vadd.f32 %v140_v42, %v139_v43 }
  0x22   :  { %v88_v37 = vadd.f32 %v87_v31, %v86_v33 }
  0x23   :  { %v143_v49 = vadd.f32 %v142_v45, %v141_v46 }
  0x24   :  { %v89_v40 = vrot.slane %v88_v37, 4 }
  0x25   :  { %v145_v51 = vadd.f32 %v144_v48, %v143_v49 }
  0x26   :  { %v90_v44 = vadd.f32 %v89_v40, %v88_v37 }
  0x27   :  { %v146_v54 = vrot.slane %v145_v51, 4 }
  0x28   :  { %v91_v47 = vrot.slane %v90_v44, 2 }
  0x29   :  { %v147_v56 = vadd.f32 %v146_v54, %v145_v51 }
  0x2a   :  { %v92_v50 = vadd.f32 %v91_v47, %v90_v44 }
  0x2b   :  { %v148_v58 = vrot.slane %v147_v56, 2 }
  0x2c   :  { %v93_v52 = vrot.slane %v92_v50, 1 }
  0x2d   :  { %v149_v59 = vadd.f32 %v148_v58, %v147_v56 }
  0x2e   :  { %v94_v55 = vadd.f32 %v93_v52, %v92_v50 }
  0x2f   :  { %v150_v60 = vrot.slane %v149_v59, 1 }
  0x30   :  { %v95_v57 = vadd.f32 %v94_v55, %v56_v53 }
  0x31   :  { %v151_v62 = vadd.f32 %v150_v60, %v149_v59 }
  0x32   :  { %97 = vst.msk [vmem:[%s292_s2] sm:$0x1] %vm96_vm2, %v95_v57 }
  0x33   :  { %v152_v63 = vadd.f32 %v151_v62, %v98_v61 }
  0x35   :  { %153 = vst.msk [vmem:[%s292_s2 + $0x1] sm:$0x1] %vm96_vm2, %v152_v63 }

// kernel: residual_conv.18
= control target key start
LH: loop header
LB: loop body
LE: loop exit
PB: predicated region body
PF: predicated region fallthrough
CT: control target
= control target key end

     0   :  { %vm188_vm0 = vcmask 60416   ;;  %s417_s0 = inlined_call_operand.vmem [shape: f32[128,8], index: 0, kind: input, shape index: {}]   ;;  %s418_s1 = inlined_call_operand.vmem [shape: f32[1,8], index: 1, kind: input, shape index: {}]   ;;  %s419_s2 = inlined_call_operand.vmem [shape: f32[1,8], index: 2, kind: input, shape index: {}]   ;;  %s420_s3 = inlined_call_operand.vmem [shape: bf16[128,8], index: 3, kind: output, shape index: {}]  }
   0x1   :  { %v14_v0 = vld [vmem:[%s417_s0] sm:$0xff]  ;;  %v15_v4 = vld [vmem:[%s417_s0 + $0x8] sm:$0xff]  ;;  %v16_v5 = vld [vmem:[%s417_s0 + $0x10] sm:$0xff] }
   0x2   :  { %v269_v1 = vld [vmem:[%s418_s1] ss:$0 sm:$0xff]  ;;  %v17_v6 = vld [vmem:[%s417_s0 + $0x18] sm:$0xff]  ;;  %v19_v11 = vld [vmem:[%s417_s0 + $0x28] sm:$0xff] }
   0x3   :  { %v274_v2 = vld [vmem:[%s419_s2] ss:$0 sm:$0xff]  ;;  %v37_v3 = vmul.f32 %v269_v1, %v14_v0  ;;  %v38_v7 = vmul.f32 %v269_v1, %v15_v4  ;;  %v39_v8 = vmul.f32 %v269_v1, %v16_v5  ;;  %v40_v9 = vmul.f32 %v269_v1, %v17_v6  ;;  %v20_v12 = vld [vmem:[%s417_s0 + $0x30] sm:$0xff]  ;;  %v21_v17 = vld [vmem:[%s417_s0 + $0x38] sm:$0xff] }
   0x4   :  { %v18_v10 = vld [vmem:[%s417_s0 + $0x20] sm:$0xff]  ;;  %v42_v15 = vmul.f32 %v269_v1, %v19_v11  ;;  %v43_v16 = vmul.f32 %v269_v1, %v20_v12  ;;  %v44_v21 = vmul.f32 %v269_v1, %v21_v17  ;;  %v23_v34 = vld [vmem:[%s417_s0 + $0x48] sm:$0xff]  ;;  %v24_v38 = vld [vmem:[%s417_s0 + $0x50] sm:$0xff] }
   0x5   :  { %v60_v13 = vadd.f32 %v274_v2, %v37_v3  ;;  %v41_v14 = vmul.f32 %v269_v1, %v18_v10  ;;  %v61_v18 = vadd.f32 %v274_v2, %v38_v7  ;;  %v62_v19 = vadd.f32 %v274_v2, %v39_v8  ;;  %v22_v33 = vld [vmem:[%s417_s0 + $0x40] sm:$0xff]  ;;  %v25_v47 = vld [vmem:[%s417_s0 + $0x58] sm:$0xff]  ;;  %v27_v62 = vld [vmem:[%s417_s0 + $0x68] sm:$0xff] }
   0x6   :  { %v63_v20 = vadd.f32 %v274_v2, %v40_v9  ;;  %v65_v24 = vadd.f32 %v274_v2, %v42_v15  ;;  %v66_v42 = vadd.f32 %v274_v2, %v43_v16  ;;  %v67_v44 = vadd.f32 %v274_v2, %v44_v21  ;;  %v26_v58 = vld [vmem:[%s417_s0 + $0x60] sm:$0xff]  ;;  %v28_v63 = vld [vmem:[%s417_s0 + $0x70] sm:$0xff]  ;;  %v29_v12 = vld [vmem:[%s417_s0 + $0x78] sm:$0xff] }
   0x7   :  { %vm76_vm1 = vcmp.gt.f32.partialorder %v60_v13, 0.0  ;;  %v92_v22 = vmul.f32 0.2, %v60_v13  ;;  %v64_v23 = vadd.f32 %v274_v2, %v41_v14  ;;  %vm77_vm2 = vcmp.gt.f32.partialorder %v61_v18, 0.0 }
   0x8   :  { %v93_v25 = vmul.f32 0.2, %v61_v18  ;;  %vm78_vm3 = vcmp.gt.f32.partialorder %v62_v19, 0.0  ;;  %v94_v26 = vmul.f32 0.2, %v62_v19  ;;  %vm79_vm4 = vcmp.gt.f32.partialorder %v63_v20, 0.0 }
   0x9   :  { %v108_v27 = vsel %vm76_vm1, %v60_v13, %v92_v22  ;;  %v95_v28 = vmul.f32 0.2, %v63_v20  ;;  %vm80_vm5 = vcmp.gt.f32.partialorder %v64_v23, 0.0  ;;  %v96_v32 = vmul.f32 0.2, %v64_v23 }
   0xa   :  { %v227_v29 = vpack.c.bf16 %v108_v27, %v108_v27  ;;  %v109_v30 = vsel %vm77_vm2, %v61_v18, %v93_v25  ;;  %v110_v31 = vsel %vm78_vm3, %v62_v19, %v94_v26  ;;  %vm81_vm6 = vcmp.gt.f32.partialorder %v65_v24, 0.0 }
   0xb   :  { %v228_v35 = vpack.c.bf16 %v109_v30, %v109_v30  ;;  %v229_v36 = vpack.c.bf16 %v110_v31, %v110_v31  ;;  %v111_v37 = vsel %vm79_vm4, %v63_v20, %v95_v28  ;;  %v112_v40 = vsel %vm80_vm5, %v64_v23, %v96_v32 }
   0xc   :  { %189 = vst.msk [vmem:[%s420_s3] sm:$0xf] %vm188_vm0, %v227_v29  ;;  %v230_v39 = vpack.c.bf16 %v111_v37, %v111_v37  ;;  %v97_v41 = vmul.f32 0.2, %v65_v24  ;;  %v231_v43 = vpack.c.bf16 %v112_v40, %v112_v40  ;;  %v45_v45 = vmul.f32 %v269_v1, %v22_v33 }
   0xd   :  { %190 = vst.msk [vmem:[%s420_s3 + $0x4] sm:$0xf] %vm188_vm0, %v228_v35  ;;  %191 = vst.msk [vmem:[%s420_s3 + $0x8] sm:$0xf] %vm188_vm0, %v229_v36  ;;  %v46_v46 = vmul.f32 %v269_v1, %v23_v34  ;;  %vm82_vm7 = vcmp.gt.f32.partialorder %v66_v42, 0.0  ;;  %v47_v50 = vmul.f32 %v269_v1, %v24_v38  ;;  %vm83_vm8 = vcmp.gt.f32.partialorder %v67_v44, 0.0 }
   0xe   :  { %192 = vst.msk [vmem:[%s420_s3 + $0xc] sm:$0xf] %vm188_vm0, %v230_v39  ;;  %v113_v48 = vsel %vm81_vm6, %v65_v24, %v97_v41  ;;  %v98_v49 = vmul.f32 0.2, %v66_v42  ;;  %193 = vst.msk [vmem:[%s420_s3 + $0x10] sm:$0xf] %vm188_vm0, %v231_v43  ;;  %v68_v53 = vadd.f32 %v274_v2, %v45_v45  ;;  %v48_v57 = vmul.f32 %v269_v1, %v25_v47 }
   0xf   :  { %v232_v51 = vpack.c.bf16 %v113_v48, %v113_v48  ;;  %v99_v52 = vmul.f32 0.2, %v67_v44  ;;  %v69_v55 = vadd.f32 %v274_v2, %v46_v46  ;;  %v70_v56 = vadd.f32 %v274_v2, %v47_v50 }
  0x10   :  { %v114_v54 = vsel %vm82_vm7, %v66_v42, %v98_v49  ;;  %vm84_vm9 = vcmp.gt.f32.partialorder %v68_v53, 0.0  ;;  %v100_v61 = vmul.f32 0.2, %v68_v53  ;;  %v71_v6 = vadd.f32 %v274_v2, %v48_v57 }
  0x11   :  { %194 = vst.msk [vmem:[%s420_s3 + $0x14] sm:$0xf] %vm188_vm0, %v232_v51  ;;  %v233_v59 = vpack.c.bf16 %v114_v54, %v114_v54  ;;  %v115_v60 = vsel %vm83_vm8, %v67_v44, %v99_v52  ;;  %vm85_vm10 = vcmp.gt.f32.partialorder %v69_v55, 0.0  ;;  %v101_v3 = vmul.f32 0.2, %v69_v55 }
  0x12   :  { %v234_v0 = vpack.c.bf16 %v115_v60, %v115_v60  ;;  %vm86_vm11 = vcmp.gt.f32.partialorder %v70_v56, 0.0  ;;  %v116_v4 = vsel %vm84_vm9, %v68_v53, %v100_v61  ;;  %v102_v5 = vmul.f32 0.2, %v70_v56 }
  0x13   :  { %195 = vst.msk [vmem:[%s420_s3 + $0x18] sm:$0xf] %vm188_vm0, %v233_v59  ;;  %v49_v7 = vmul.f32 %v269_v1, %v26_v58  ;;  %v235_v8 = vpack.c.bf16 %v116_v4, %v116_v4  ;;  %v117_v9 = vsel %vm85_vm10, %v69_v55, %v101_v3  ;;  %v50_v10 = vmul.f32 %v269_v1, %v27_v62 }
  0x14   :  { %196 = vst.msk [vmem:[%s420_s3 + $0x1c] sm:$0xf] %vm188_vm0, %v234_v0  ;;  %v51_v11 = vmul.f32 %v269_v1, %v28_v63  ;;  %v236_v13 = vpack.c.bf16 %v117_v9, %v117_v9  ;;  %v118_v14 = vsel %vm86_vm11, %v70_v56, %v102_v5  ;;  %vm87_vm12 = vcmp.gt.f32.partialorder %v71_v6, 0.0 }
  0x15   :  { %v103_v15 = vmul.f32 0.2, %v71_v6  ;;  %197 = vst.msk [vmem:[%s420_s3 + $0x20] sm:$0xf] %vm188_vm0, %v235_v8  ;;  %v237_v16 = vpack.c.bf16 %v118_v14, %v118_v14  ;;  %v72_v17 = vadd.f32 %v274_v2, %v49_v7  ;;  %v73_v18 = vadd.f32 %v274_v2, %v50_v10 }
  0x16   :  { %v74_v19 = vadd.f32 %v274_v2, %v51_v11  ;;  %198 = vst.msk [vmem:[%s420_s3 + $0x24] sm:$0xf] %vm188_vm0, %v236_v13  ;;  %v52_v21 = vmul.f32 %v269_v1, %v29_v12 }
  0x17   :  { %v119_v20 = vsel %vm87_vm12, %v71_v6, %v103_v15  ;;  %199 = vst.msk [vmem:[%s420_s3 + $0x28] sm:$0xf] %vm188_vm0, %v237_v16  ;;  %vm88_vm13 = vcmp.gt.f32.partialorder %v72_v17, 0.0  ;;  %v104_v23 = vmul.f32 0.2, %v72_v17  ;;  %vm89_vm14 = vcmp.gt.f32.partialorder %v73_v18, 0.0 }
  0x18   :  { %v238_v22 = vpack.c.bf16 %v119_v20, %v119_v20  ;;  %v105_v24 = vmul.f32 0.2, %v73_v18  ;;  %vm90_vm15 = vcmp.gt.f32.partialorder %v74_v19, 0.0  ;;  %v106_v25 = vmul.f32 0.2, %v74_v19 }
  0x19   :  { %v75_v26 = vadd.f32 %v274_v2, %v52_v21  ;;  %v120_v1 = vsel %vm88_vm13, %v72_v17, %v104_v23 }
  0x1a   :  { %200 = vst.msk [vmem:[%s420_s3 + $0x2c] sm:$0xf] %vm188_vm0, %v238_v22  ;;  %v239_v27 = vpack.c.bf16 %v120_v1, %v120_v1  ;;  %v121_v28 = vsel %vm89_vm14, %v73_v18, %v105_v24  ;;  %v122_v29 = vsel %vm90_vm15, %v74_v19, %v106_v25 }
  0x1b   :  { %vm91_vm1 = vcmp.gt.f32.partialorder %v75_v26, 0.0  ;;  %v240_v30 = vpack.c.bf16 %v121_v28, %v121_v28  ;;  %v241_v31 = vpack.c.bf16 %v122_v29, %v122_v29  ;;  %v107_v32 = vmul.f32 0.2, %v75_v26 }
  0x1c   :  { %201 = vst.msk [vmem:[%s420_s3 + $0x30] sm:$0xf] %vm188_vm0, %v239_v27 }
  0x1d   :  { %202 = vst.msk [vmem:[%s420_s3 + $0x34] sm:$0xf] %vm188_vm0, %v240_v30  ;;  %203 = vst.msk [vmem:[%s420_s3 + $0x38] sm:$0xf] %vm188_vm0, %v241_v31  ;;  %v123_v2 = vsel %vm91_vm1, %v75_v26, %v107_v32 }
  0x1e   :  { %v242_v33 = vpack.c.bf16 %v123_v2, %v123_v2 }
  0x20   :  { %204 = vst.msk [vmem:[%s420_s3 + $0x3c] sm:$0xf] %vm188_vm0, %v242_v33 }

// kernel: residual_conv.14
= control target key start
LH: loop header
LB: loop body
LE: loop exit
PB: predicated region body
PF: predicated region fallthrough
CT: control target
= control target key end

     0   :  { %s2182_s18 = smov 0   ;;  %s2469_s0 = inlined_call_operand.vmem [shape: bf16[2,9,9,4], index: 0, kind: input, shape index: {}]   ;;  %s2470_s1 = inlined_call_operand.vmem [shape: bf16[2,9,9,4], index: 1, kind: input, shape index: {}]   ;;  %s2471_s2 = inlined_call_operand.vmem [shape: bf16[2,9,9,4], index: 2, kind: input, shape index: {}]   ;;  %s2472_s3 = inlined_call_operand.vmem [shape: bf16[2,9,9,4], index: 3, kind: input, shape index: {}]   ;;  %s2473_s4 = inlined_call_operand.vmem [shape: bf16[9,4,8], index: 4, kind: input, shape index: {}]   ;;  %s2474_s5 = inlined_call_operand.vmem [shape: f32[2,8,8,8], index: 5, kind: output, shape index: {}]  }
   0x1 LB: > { %s1774_s19 = sadd.s32 4294967295, %s2150_s18   ;;  %p1778_p0 = scmp.ge.s32.totalorder %s2150_s18, 1  ;;  %s2150_s18 = sphi %s2182_s18, %s15_s18  }
   0x2   : > { %p217_p1 = scmp.lt.s32.totalorder %s2150_s18, 3 }
   0x4   : > { %p218_p2 = pnand %p1778_p0, %p217_p1 }
   0x5   : > { %v1785_v0 = vld [vmem:[%s2473_s4 + $0x2] sm:$0x3] (!%p218_p2)  ;;  %vm338_vm0 = vcmask (!%p218_p2), 1041408   ;;  %v2196_v1 = vld [vmem:[%s2473_s4 + $0x8] sm:$0x3] (!%p218_p2)  ;;  %p260_p3 = scmp.lt.s32.totalorder (!%p218_p2), %s1774_s19, 1 }
   0x6   : > { %221 = sbr.rel (%p218_p2) target bundleno = 312 (0x138), region = 40  ;;  %2101 = vmatprep.subr.msk.bf16.mxu1 (!%p218_p2), %vm338_vm0, %v1785_v0  ;;  %2105 = vmatprep.subr.msk.bf16.mxu0 (!%p218_p2), %vm338_vm0, %v2196_v1  ;;  %v340_v2 = vsel (!%p218_p2), %vm338_vm0, %v1785_v0, 0  ;;  %v2204_v3 = vsel (!%p218_p2), %vm338_vm0, %v2196_v1, 0  ;;  %v294_v4 = vld [vmem:[%s2473_s4] sm:$0x3] (!%p218_p2)  ;;  %vm325_vm1 = vcmask (!%p218_p2), 31744  }
   0x7   : > { %1946 = vmatpush3.bf16.msra.mxu1 (!%p218_p2), %v340_v2  ;;  %1986 = vmatpush3.bf16.msra.mxu0 (!%p218_p2), %v2204_v3  ;;  %v1829_v5 = vld [vmem:[%s2473_s4 + $0xa] sm:$0x3] (!%p218_p2)  ;;  %v440_v6 = vsel (!%p218_p2), %vm338_vm0, %v294_v4, 0  ;;  %v1846_v9 = vld [vmem:[%s2473_s4 + $0xc] sm:$0x3] (!%p218_p2)  ;;  %vm1674_vm5 = vcmask (!%p218_p2), 64512  }
   0x8   : > { %2102 = vmatprep.subr.msk.bf16.mxu1 (!%p218_p2), %vm338_vm0, %v294_v4  ;;  %2107 = vmatprep.subr.msk.bf16.mxu0 (!%p218_p2), %vm338_vm0, %v1829_v5  ;;  %v1131_v7 = vsel (!%p218_p2), %vm338_vm0, %v1829_v5, 0  ;;  %v1802_v10 = vld [vmem:[%s2473_s4 + $0x4] sm:$0x3] (!%p218_p2)  ;;  %vm523_vm2 = vsmask.f32 (!%p218_p2), 3328  ;;  %v2256_v15 = vsel (!%p218_p2), %vm338_vm0, %v1846_v9, 0 }
   0x9   : > { %vm524_vm3 = vsmask.f32 (!%p218_p2), 7440  ;;  %v2259_v16 = vsel (!%p218_p2), %vm338_vm0, %v1802_v10, 0 }
   0xa   : > { %vm2282_vm4 = vmor (!%p218_p2), %vm523_vm2, %vm524_vm3 }
   0xd   : > { %s2478_s19 = smov (!%p260_p3, %s1774_s19), 1 }
   0xe   : > { %s2218_s28 = smul.u32 72, %s2478_s19 }
  0x10   : > { %s2224_s6 = scalar_lea.vmem %s2470_s1, %s2218_s28  ;;  %s2233_s9 = scalar_lea.vmem %s2472_s3, %s2218_s28 }
  0x11   : > { %v2120_v8 = vld [vmem:[%s2224_s6] ss:$8 sps:$4 sm:$0xff]   ;;  %v2122_v12 = vld [vmem:[%s2224_s6 + $0x10] ss:$8 sps:$4 sm:$0xff]   ;;  %s2248_s16 = scalar_lea.vmem %s2471_s2, %s2218_s28  ;;  %s2276_s21 = scalar_lea.vmem %s2469_s0, %s2218_s28 }
  0x12   : > { %v2121_v11 = vld [vmem:[%s2233_s9] ss:$8 sps:$4 sm:$0xff]   ;;  %1947 = vmatprep.mubr.msk.bf16.mxu1 %vm325_vm1, %v2120_v8  ;;  %v2123_v13 = vld [vmem:[%s2233_s9 + $0x10] ss:$8 sps:$4 sm:$0xff]   ;;  %v977_v19 = vld [vmem:[%s2248_s16 + $0x4] sm:$0x1] }
  0x13   : > { %1987 = vmatprep.mubr.msk.bf16.mxu0 %vm325_vm1, %v2121_v11  ;;  %1948 = vmatmul.mubr.msk.bf16.vlgmr.msra.gmra.mrb[0].mxu1 %vm325_vm1, %v2122_v12  ;;  %v2124_v14 = vld [vmem:[%s2224_s6 + $0x20] ss:$8 sps:$4 sm:$0xff]   ;;  %v2125_v17 = vld [vmem:[%s2224_s6 + $0x30] ss:$8 sps:$4 sm:$0xff]   ;;  %v979_v21 = vld [vmem:[%s2248_s16 + $0xc] sm:$0x1] }
  0x14   : > { %1956 = vmatpush3.bf16.msra.mxu1 %v440_v6  ;;  %1988 = vmatmul.mubr.msk.bf16.vlgmr.msra.gmra.mrb[0].mxu0 %vm325_vm1, %v2123_v13  ;;  %v976_v18 = vld [vmem:[%s2248_s16] sm:$0xf]  ;;  %v978_v20 = vld [vmem:[%s2248_s16 + $0x8] sm:$0xf]  ;;  %v1002_v24 = vshll.u32 %v977_v19, 16  ;;  %v1016_v27 = vshll.u32 %v979_v21, 16 }
  0x15   : > { %1996 = vmatpush3.bf16.msra.mxu0 %v1131_v7  ;;  %1951 = vmatprep.mubr.msk.bf16.mxu1 %vm325_vm1, %v2124_v14  ;;  %v993_v22 = vshrl.u32 %v976_v18, 16  ;;  %v996_v23 = vshll.u32 %v976_v18, 16  ;;  %v1007_v25 = vshrl.u32 %v978_v20, 16  ;;  %v1010_v26 = vshll.u32 %v978_v20, 16  ;;  %v980_v28 = vld [vmem:[%s2248_s16 + $0x10] sm:$0xf] }
  0x16   : > { %2108 = vmatprep.subr.msk.bf16.mxu0 %vm338_vm0, %v1846_v9  ;;  %2103 = vmatprep.subr.msk.bf16.mxu1 %vm338_vm0, %v1802_v10  ;;  %v981_v29 = vld [vmem:[%s2248_s16 + $0x14] sm:$0x1]  ;;  %v1004_v32 = vrot.slane %v1002_v24, 5  ;;  %v982_v34 = vld [vmem:[%s2248_s16 + $0x18] sm:$0xf]  ;;  %v1018_v36 = vrot.slane %v1016_v27, 5 }
  0x17   : > { %v995_v30 = vrot.slane %v993_v22, 4  ;;  %v998_v31 = vrot.slane %v996_v23, 5  ;;  %v1009_v33 = vrot.slane %v1007_v25, 4  ;;  %v1012_v35 = vrot.slane %v1010_v26, 5  ;;  %v983_v37 = vld [vmem:[%s2248_s16 + $0x1c] sm:$0x1] }
  0x18   : > { %v1021_v38 = vshrl.u32 %v980_v28, 16  ;;  %v1024_v39 = vshll.u32 %v980_v28, 16  ;;  %v1030_v41 = vshll.u32 %v981_v29, 16  ;;  %v1035_v42 = vshrl.u32 %v982_v34, 16  ;;  %v2126_v53 = vld [vmem:[%s2276_s21] ss:$8 sps:$4 sm:$0xff]  }
  0x19   : > { %v999_v40 = vor.u32 %v998_v31, %v995_v30  ;;  %v1038_v43 = vshll.u32 %v982_v34, 16  ;;  %v1013_v45 = vor.u32 %v1012_v35, %v1009_v33  ;;  %v1044_v48 = vshll.u32 %v983_v37, 16  ;;  %v2127_v59 = vld [vmem:[%s2276_s21 + $0x10] ss:$8 sps:$4 sm:$0xff]   ;;  %v984_v60 = vld [vmem:[%s2248_s16 + $0x20] sm:$0xf] }
  0x1a   : > { %v1023_v46 = vrot.slane %v1021_v38, 4  ;;  %v1026_v47 = vrot.slane %v1024_v39, 5  ;;  %v1032_v50 = vrot.slane %v1030_v41, 5  ;;  %v1037_v51 = vrot.slane %v1035_v42, 4  ;;  %v985_v61 = vld [vmem:[%s2248_s16 + $0x24] sm:$0x1] }
  0x1b   : > { %1952 = vmatmul.mubr.msk.bf16.gmra.mrb[4].mxu1 %vm325_vm1, %v2125_v17  ;;  %v1000_v49 = vrot.slane %v999_v40, 4  ;;  %v1040_v52 = vrot.slane %v1038_v43, 5  ;;  %v1014_v54 = vrot.slane %v1013_v45, 4  ;;  %v1046_v56 = vrot.slane %v1044_v48, 5  ;;  %v986_v0 = vld [vmem:[%s2248_s16 + $0x28] sm:$0xf] }
  0x1c   : > { %v1027_v55 = vor.u32 %v1026_v47, %v1023_v46  ;;  %1957 = vmatprep.mubr.msk.bf16.mxu1 %vm325_vm1, %v2126_v53  ;;  %v987_v2 = vld [vmem:[%s2248_s16 + $0x2c] sm:$0x1]  ;;  %v1049_v4 = vshrl.u32 %v984_v60, 16  ;;  %v1052_v7 = vshll.u32 %v984_v60, 16  ;;  %v1058_v8 = vshll.u32 %v985_v61, 16  ;;  %s1899_s28 = sshll.u32 %s2478_s19, 6 }
  0x1d   : > { %v1005_v57 = vsel %vm2282_vm4, %v1000_v49, %v1004_v32  ;;  %v1041_v58 = vor.u32 %v1040_v52, %v1037_v51  ;;  %v1019_v62 = vsel %vm2282_vm4, %v1014_v54, %v1018_v36  ;;  %v988_v9 = vld [vmem:[%s2248_s16 + $0x30] sm:$0xf]  ;;  %v2301_v10 = vld [vmem:[%s2473_s4 + $0x6] sm:$0x3]  ;;  %v1063_v13 = vshrl.u32 %v986_v0, 16 }
  0x1e   : > { %v1028_v63 = vrot.slane %v1027_v55, 4  ;;  %v1830_v5 = vcombine.low %v1005_v57, %v1019_v62  ;;  %v1051_v12 = vrot.slane %v1049_v4, 4  ;;  %v1066_v14 = vshll.u32 %v986_v0, 16  ;;  %v989_v17 = vld [vmem:[%s2248_s16 + $0x34] sm:$0x1] }
  0x1f   : > { %v1042_v6 = vrot.slane %v1041_v58, 4  ;;  %v1054_v19 = vrot.slane %v1052_v7, 5  ;;  %v1060_v20 = vrot.slane %v1058_v8, 5  ;;  %v1072_v21 = vshll.u32 %v987_v2, 16  ;;  %v990_v22 = vld [vmem:[%s2248_s16 + $0x38] sm:$0xf] }
  0x20   : > { %v1033_v11 = vsel %vm2282_vm4, %v1028_v63, %v1032_v50  ;;  %1997 = vmatprep.mubr.msk.bf16.mxu0 %vm325_vm1, %v1830_v5  ;;  %v2313_v23 = vld [vmem:[%s2473_s4 + $0xe] sm:$0x3]  ;;  %v1065_v25 = vrot.slane %v1063_v13, 4  ;;  %v1068_v26 = vrot.slane %v1066_v14, 5  ;;  %v991_v27 = vld [vmem:[%s2248_s16 + $0x3c] sm:$0x1] }
  0x21   : > { %v1047_v18 = vsel %vm2282_vm4, %v1042_v6, %v1046_v56  ;;  %v1077_v28 = vshrl.u32 %v988_v9, 16  ;;  %v1055_v29 = vor.u32 %v1054_v19, %v1051_v12  ;;  %v1074_v30 = vrot.slane %v1072_v21, 5  ;;  %v2130_v53 = vld [vmem:[%s2276_s21 + $0x8] ss:$8 sps:$4 sm:$0xff]   ;;  %v507_v54 = vld [vmem:[%s2276_s21] sm:$0xf] }
  0x22   : > { %v1831_v24 = vcombine.low %v1033_v11, %v1047_v18  ;;  %v1080_v31 = vshll.u32 %v988_v9, 16  ;;  %v1086_v32 = vshll.u32 %v989_v17, 16  ;;  %v1069_v33 = vor.u32 %v1068_v26, %v1065_v25  ;;  %v508_v56 = vld [vmem:[%s2276_s21 + $0x4] sm:$0x1]  ;;  %v509_v57 = vld [vmem:[%s2276_s21 + $0x8] sm:$0xf] }
  0x23   : > { %1958 = vmatmul.mubr.msk.bf16.vlgmr.msra.gmra.mrb[0].mxu1 %vm325_vm1, %v2127_v59  ;;  %v1079_v34 = vrot.slane %v1077_v28, 4  ;;  %v1091_v35 = vshrl.u32 %v990_v22, 16  ;;  %v1094_v36 = vshll.u32 %v990_v22, 16  ;;  %v1056_v37 = vrot.slane %v1055_v29, 4  ;;  %v510_v58 = vld [vmem:[%s2276_s21 + $0xc] sm:$0x1] }
  0x24   : > { %1966 = vmatpush3.bf16.msra.mxu1 %v2259_v16  ;;  %1998 = vmatmul.mubr.msk.bf16.vlgmr.msra.gmra.mrb[0].mxu0 %vm325_vm1, %v1831_v24  ;;  %v1082_v38 = vrot.slane %v1080_v31, 5  ;;  %v1100_v39 = vshll.u32 %v991_v27, 16  ;;  %v2128_v16 = vld [vmem:[%s2276_s21 + $0x20] ss:$8 sps:$4 sm:$0xff]   ;;  %v1070_v40 = vrot.slane %v1069_v33, 4  ;;  %v1088_v46 = vrot.slane %v1086_v32, 5 }
  0x25   : > { %2104 = vmatprep.subr.msk.bf16.mxu1 %vm338_vm0, %v2301_v10  ;;  %2006 = vmatpush3.bf16.msra.mxu0 %v2256_v15  ;;  %v1093_v41 = vrot.slane %v1091_v35, 4  ;;  %v1096_v42 = vrot.slane %v1094_v36, 5  ;;  %v1061_v43 = vsel %vm2282_vm4, %v1056_v37, %v1060_v20  ;;  %v2129_v15 = vld [vmem:[%s2276_s21 + $0x30] ss:$8 sps:$4 sm:$0xff]   ;;  %v527_v60 = vshrl.u32 %v507_v54, 16 }
  0x26   : > { %2109 = vmatprep.subr.msk.bf16.mxu0 %vm338_vm0, %v2313_v23  ;;  %v1083_v45 = vor.u32 %v1082_v38, %v1079_v34  ;;  %1961 = vmatprep.mubr.msk.bf16.mxu1 %vm325_vm1, %v2128_v16  ;;  %v1075_v47 = vsel %vm2282_vm4, %v1070_v40, %v1074_v30  ;;  %v1102_v49 = vrot.slane %v1100_v39, 5  ;;  %v530_v61 = vshll.u32 %v507_v54, 16  ;;  %v511_v63 = vld [vmem:[%s2276_s21 + $0x10] sm:$0xf]  ;;  %v512_v6 = vld [vmem:[%s2276_s21 + $0x14] sm:$0x1] }
  0x27   : > { %v1097_v48 = vor.u32 %v1096_v42, %v1093_v41  ;;  %v1832_v50 = vcombine.low %v1061_v43, %v1075_v47  ;;  %v536_v62 = vshll.u32 %v508_v56, 16  ;;  %v541_v2 = vshrl.u32 %v509_v57, 16  ;;  %v513_v11 = vld [vmem:[%s2276_s21 + $0x18] sm:$0xf]  ;;  %v514_v18 = vld [vmem:[%s2276_s21 + $0x1c] sm:$0x1] }
  0x28   : > { %v1084_v51 = vrot.slane %v1083_v45, 4  ;;  %v544_v4 = vshll.u32 %v509_v57, 16  ;;  %v550_v5 = vshll.u32 %v510_v58, 16  ;;  %v529_v7 = vrot.slane %v527_v60, 4  ;;  %v2131_v29 = vld [vmem:[%s2276_s21 + $0x18] ss:$8 sps:$4 sm:$0xff]  }
  0x29   : > { %v1098_v52 = vrot.slane %v1097_v48, 4  ;;  %2001 = vmatprep.mubr.msk.bf16.mxu0 %vm325_vm1, %v1832_v50  ;;  %v532_v8 = vrot.slane %v530_v61, 5  ;;  %v538_v9 = vrot.slane %v536_v62, 5  ;;  %v555_v12 = vshrl.u32 %v511_v63, 16  ;;  %v2132_v37 = vld [vmem:[%s2276_s21 + $0x28] ss:$8 sps:$4 sm:$0xff]  }
  0x2a   : > { %v1089_v55 = vsel %vm2282_vm4, %v1084_v51, %v1088_v46  ;;  %v543_v13 = vrot.slane %v541_v2, 4  ;;  %v546_v14 = vrot.slane %v544_v4, 5  ;;  %v552_v17 = vrot.slane %v550_v5, 5  ;;  %v515_v40 = vld [vmem:[%s2276_s21 + $0x20] sm:$0xf] }
  0x2b   : > { %1962 = vmatmul.mubr.msk.bf16.gmra.mrb[4].mxu1 %vm325_vm1, %v2129_v15  ;;  %v1103_v59 = vsel %vm2282_vm4, %v1098_v52, %v1102_v49  ;;  %v558_v19 = vshll.u32 %v511_v63, 16  ;;  %v533_v20 = vor.u32 %v532_v8, %v529_v7  ;;  %v557_v21 = vrot.slane %v555_v12, 4  ;;  %v516_v45 = vld [vmem:[%s2276_s21 + $0x24] sm:$0x1]  ;;  %v517_v46 = vld [vmem:[%s2276_s21 + $0x28] sm:$0xf] }
  0x2c   : > { %v1833_v0 = vcombine.low %v1089_v55, %v1103_v59  ;;  %v564_v22 = vshll.u32 %v512_v6, 16  ;;  %v569_v24 = vshrl.u32 %v513_v11, 16  ;;  %v547_v25 = vor.u32 %v546_v14, %v543_v13  ;;  %v518_v48 = vld [vmem:[%s2276_s21 + $0x2c] sm:$0x1]  ;;  %v519_v55 = vld [vmem:[%s2276_s21 + $0x30] sm:$0xf] }
  0x2d   : > { %v560_v26 = vrot.slane %v558_v19, 5  ;;  %v572_v27 = vshll.u32 %v513_v11, 16  ;;  %v578_v28 = vshll.u32 %v514_v18, 16  ;;  %v1369_v30 = vsel %vm338_vm0, %v2313_v23, 0  ;;  %v2360_v23 = vld [vmem:[%s2473_s4 + $0x10] sm:$0x3] }
  0x2e   : > { %2002 = vmatmul.mubr.msk.bf16.gmra.mrb[4].mxu0 %vm325_vm1, %v1833_v0  ;;  %v534_v31 = vrot.slane %v533_v20, 4  ;;  %v566_v32 = vrot.slane %v564_v22, 5  ;;  %v571_v33 = vrot.slane %v569_v24, 4  ;;  %v548_v34 = vrot.slane %v547_v25, 4  ;;  %v520_v60 = vld [vmem:[%s2276_s21 + $0x34] sm:$0x1] }
  0x2f   : > { %2007 = vmatprep.mubr.msk.bf16.mxu0 %vm325_vm1, %v2130_v53  ;;  %v561_v35 = vor.u32 %v560_v26, %v557_v21  ;;  %v574_v36 = vrot.slane %v572_v27, 5  ;;  %v580_v39 = vrot.slane %v578_v28, 5  ;;  %v783_v16 = vsel %vm338_vm0, %v2301_v10, 0  ;;  %v2133_v62 = vld [vmem:[%s2276_s21 + $0x38] ss:$8 sps:$4 sm:$0xff]  }
  0x30   : > { %v539_v38 = vsel %vm2282_vm4, %v534_v31, %v538_v9  ;;  %v553_v41 = vsel %vm2282_vm4, %v548_v34, %v552_v17  ;;  %v583_v15 = vshrl.u32 %v515_v40, 16  ;;  %v586_v49 = vshll.u32 %v515_v40, 16  ;;  %v521_v0 = vld [vmem:[%s2276_s21 + $0x38] sm:$0xf]  ;;  %v522_v2 = vld [vmem:[%s2276_s21 + $0x3c] sm:$0x1] }
  0x31   : > { %v562_v42 = vrot.slane %v561_v35, 4  ;;  %v575_v43 = vor.u32 %v574_v36, %v571_v33  ;;  %v1803_v47 = vcombine.low %v539_v38, %v553_v41  ;;  %v592_v10 = vshll.u32 %v516_v45, 16  ;;  %v2134_v14 = vld [vmem:[%s2224_s6 + $0x8] ss:$8 sps:$4 sm:$0xff]   ;;  %v2135_v35 = vld [vmem:[%s2224_s6 + $0x18] ss:$8 sps:$4 sm:$0xff]  }
  0x32   : > { %v597_v50 = vshrl.u32 %v517_v46, 16  ;;  %v585_v53 = vrot.slane %v583_v15, 4  ;;  %v600_v54 = vshll.u32 %v517_v46, 16  ;;  %v588_v56 = vrot.slane %v586_v49, 5  ;;  %v1873_v40 = vld [vmem:[%s2276_s21 + $0xc] sm:$0x1] }
  0x33   : > { %v567_v51 = vsel %vm2282_vm4, %v562_v42, %v566_v32  ;;  %v576_v52 = vrot.slane %v575_v43, 4  ;;  %1967 = vmatprep.mubr.msk.bf16.mxu1 %vm325_vm1, %v1803_v47  ;;  %v594_v57 = vrot.slane %v592_v10, 5  ;;  %v606_v59 = vshll.u32 %v518_v48, 16  ;;  %v1874_v41 = vld [vmem:[%s2276_s21 + $0x10] sm:$0xf] }
  0x34   : > { %v599_v58 = vrot.slane %v597_v50, 4  ;;  %v602_v63 = vrot.slane %v600_v54, 5  ;;  %v611_v4 = vshrl.u32 %v519_v55, 16  ;;  %v589_v6 = vor.u32 %v588_v56, %v585_v53  ;;  %v1875_v42 = vld [vmem:[%s2276_s21 + $0x14] sm:$0x1] }
  0x35   : > { %v581_v61 = vsel %vm2282_vm4, %v576_v52, %v580_v39  ;;  %v608_v7 = vrot.slane %v606_v59, 5  ;;  %v614_v8 = vshll.u32 %v519_v55, 16  ;;  %v620_v12 = vshll.u32 %v520_v60, 16  ;;  %v2138_v39 = vld [vmem:[%s2224_s6 + $0x28] ss:$8 sps:$4 sm:$0xff]  }
  0x36   : > { %2008 = vmatmul.mubr.msk.bf16.vlgmr.msra.gmra.mrb[0].mxu0 %vm325_vm1, %v2131_v29  ;;  %v1804_v5 = vcombine.low %v567_v51, %v581_v61  ;;  %v603_v9 = vor.u32 %v602_v63, %v599_v58  ;;  %v613_v11 = vrot.slane %v611_v4, 4  ;;  %v625_v13 = vshrl.u32 %v521_v0, 16  ;;  %v1876_v48 = vld [vmem:[%s2276_s21 + $0x18] sm:$0xf]  ;;  %v1877_v50 = vld [vmem:[%s2276_s21 + $0x1c] sm:$0x1] }
  0x37   : > { %2016 = vmatpush3.bf16.msra.mxu0 %v1369_v30  ;;  %2011 = vmatprep.mubr.msk.bf16.mxu0 %vm325_vm1, %v2132_v37  ;;  %v590_v17 = vrot.slane %v589_v6, 4  ;;  %v616_v18 = vrot.slane %v614_v8, 5  ;;  %v628_v19 = vshll.u32 %v521_v0, 16  ;;  %v634_v20 = vshll.u32 %v522_v2, 16  ;;  %v2136_v37 = vld [vmem:[%s2248_s16] ss:$8 sps:$4 sm:$0xff]  }
  0x38   : > { %2110 = vmatprep.subr.msk.bf16.mxu0 %vm338_vm0, %v2360_v23  ;;  %1968 = vmatmul.mubr.msk.bf16.vlgmr.msra.gmra.mrb[0].mxu1 %vm325_vm1, %v1804_v5  ;;  %v604_v21 = vrot.slane %v603_v9, 4  ;;  %v627_v22 = vrot.slane %v625_v13, 4  ;;  %v622_v26 = vrot.slane %v620_v12, 5  ;;  %v1599_v34 = vsel %vm338_vm0, %v2360_v23, 0  ;;  %v1878_v51 = vld [vmem:[%s2276_s21 + $0x20] sm:$0xf] }
  0x39   : > { %1976 = vmatpush3.bf16.msra.mxu1 %v783_v16  ;;  %v595_v24 = vsel %vm2282_vm4, %v590_v17, %v594_v57  ;;  %v617_v25 = vor.u32 %v616_v18, %v613_v11  ;;  %v630_v27 = vrot.slane %v628_v19, 5  ;;  %v636_v32 = vrot.slane %v634_v20, 5  ;;  %v1872_v16 = vld [vmem:[%s2276_s21 + $0x8] sm:$0xf]  ;;  %v2137_v52 = vld [vmem:[%s2248_s16 + $0x10] ss:$8 sps:$4 sm:$0xff]  }
  0x3a   : > { %2106 = vmatprep.subr.msk.bf16.mxu1 %vm338_vm0, %v2196_v1  ;;  %v609_v28 = vsel %vm2282_vm4, %v604_v21, %v608_v7  ;;  %v1461_v43 = vshrl.u32 %v1872_v16, 16  ;;  %v1464_v45 = vshll.u32 %v1872_v16, 16  ;;  %v1470_v23 = vshll.u32 %v1873_v40, 16  ;;  %v2139_v53 = vld [vmem:[%s2224_s6 + $0x38] ss:$8 sps:$4 sm:$0xff]   ;;  %s284_s6 = scalar_lea.vmem %s2474_s5, %s1899_s28 }
  0x3b   : > { %v1805_v29 = vcombine.low %v595_v24, %v609_v28  ;;  %v618_v30 = vrot.slane %v617_v25, 4  ;;  %v631_v31 = vor.u32 %v630_v27, %v627_v22  ;;  %v1475_v46 = vshrl.u32 %v1874_v41, 16  ;;  %v1879_v58 = vld [vmem:[%s2276_s21 + $0x24] sm:$0x1]  ;;  %v2140_v5 = vld [vmem:[%s2248_s16 + $0x20] ss:$8 sps:$4 sm:$0xff]  }
  0x3c   : > { %v1478_v15 = vshll.u32 %v1874_v41, 16  ;;  %v1484_v47 = vshll.u32 %v1875_v42, 16  ;;  %v1463_v49 = vrot.slane %v1461_v43, 4  ;;  %v1466_v10 = vrot.slane %v1464_v45, 5  ;;  %v1880_v17 = vld [vmem:[%s2276_s21 + $0x28] sm:$0xf] }
  0x3d   : > { %1971 = vmatprep.mubr.msk.bf16.mxu1 %vm325_vm1, %v1805_v29  ;;  %v623_v1 = vsel %vm2282_vm4, %v618_v30, %v622_v26  ;;  %v632_v33 = vrot.slane %v631_v31, 4  ;;  %v1472_v54 = vrot.slane %v1470_v23, 5  ;;  %v1477_v55 = vrot.slane %v1475_v46, 4  ;;  %v1881_v20 = vld [vmem:[%s2276_s21 + $0x2c] sm:$0x1] }
  0x3e   : > { %2012 = vmatmul.mubr.msk.bf16.gmra.mrb[4].mxu0 %vm325_vm1, %v2133_v62  ;;  %v1480_v56 = vrot.slane %v1478_v15, 5  ;;  %v1486_v57 = vrot.slane %v1484_v47, 5  ;;  %v1467_v59 = vor.u32 %v1466_v10, %v1463_v49  ;;  %v1489_v60 = vshrl.u32 %v1876_v48, 16  ;;  %v1882_v21 = vld [vmem:[%s2276_s21 + $0x30] sm:$0xf] }
  0x3f   : > { %2017 = vmatprep.mubr.msk.bf16.mxu0 %vm325_vm1, %v2134_v14  ;;  %v637_v36 = vsel %vm2282_vm4, %v632_v33, %v636_v32  ;;  %v1492_v61 = vshll.u32 %v1876_v48, 16  ;;  %v1498_v62 = vshll.u32 %v1877_v50, 16  ;;  %v1503_v0 = vshrl.u32 %v1878_v51, 16  ;;  %v1883_v22 = vld [vmem:[%s2276_s21 + $0x34] sm:$0x1] }
  0x40   : > { %v1806_v38 = vcombine.low %v623_v1, %v637_v36  ;;  %v1481_v63 = vor.u32 %v1480_v56, %v1477_v55  ;;  %v1506_v2 = vshll.u32 %v1878_v51, 16  ;;  %v1512_v4 = vshll.u32 %v1879_v58, 16  ;;  %v2141_v32 = vld [vmem:[%s2248_s16 + $0x30] ss:$8 sps:$4 sm:$0xff]   ;;  %v1885_v16 = vld [vmem:[%s2276_s21 + $0x3c] sm:$0x1] }
  0x41   : > { %v1468_v6 = vrot.slane %v1467_v59, 4  ;;  %v1491_v7 = vrot.slane %v1489_v60, 4  ;;  %v1494_v8 = vrot.slane %v1492_v61, 5  ;;  %v1500_v9 = vrot.slane %v1498_v62, 5  ;;  %v1884_v36 = vld [vmem:[%s2276_s21 + $0x38] sm:$0xf] }
  0x42   : > { %1972 = vmatmul.mubr.msk.bf16.gmra.mrb[4].mxu1 %vm325_vm1, %v1806_v38  ;;  %v1482_v11 = vrot.slane %v1481_v63, 4  ;;  %v1505_v12 = vrot.slane %v1503_v0, 4  ;;  %v1508_v13 = vrot.slane %v1506_v2, 5  ;;  %v1514_v14 = vrot.slane %v1512_v4, 5  ;;  %v1886_v43 = vld [vmem:[%s2276_s21 + $0x40] sm:$0xf] }
  0x43   : > { %1977 = vmatprep.mubr.msk.bf16.mxu1 %vm325_vm1, %v2136_v37  ;;  %v1473_v18 = vsel %vm2282_vm4, %v1468_v6, %v1472_v54  ;;  %v1495_v19 = vor.u32 %v1494_v8, %v1491_v7  ;;  %v1517_v26 = vshrl.u32 %v1880_v17, 16  ;;  %v1520_v27 = vshll.u32 %v1880_v17, 16  ;;  %v1887_v45 = vld [vmem:[%s2276_s21 + $0x44] sm:$0x1]  ;;  %v2142_v15 = vld [vmem:[%s2233_s9 + $0x20] ss:$8 sps:$4 sm:$0xff]  }
  0x44   : > { %v1487_v24 = vsel %vm2282_vm4, %v1482_v11, %v1486_v57  ;;  %v1509_v25 = vor.u32 %v1508_v13, %v1505_v12  ;;  %v1526_v30 = vshll.u32 %v1881_v20, 16  ;;  %v1531_v31 = vshrl.u32 %v1882_v21, 16  ;;  %v2143_v8 = vld [vmem:[%s2233_s9 + $0x30] ss:$8 sps:$4 sm:$0xff]  }
  0x45   : > { %v1889_v28 = vcombine.low %v1473_v18, %v1487_v24  ;;  %v1496_v29 = vrot.slane %v1495_v19, 4  ;;  %v1519_v33 = vrot.slane %v1517_v26, 4  ;;  %v1545_v23 = vshrl.u32 %v1884_v36, 16 }
  0x46   : > { %2018 = vmatmul.mubr.msk.bf16.vlgmr.msra.gmra.mrb[0].mxu0 %vm325_vm1, %v2135_v35  ;;  %v1510_v1 = vrot.slane %v1509_v25, 4  ;;  %v1534_v35 = vshll.u32 %v1882_v21, 16  ;;  %v1528_v37 = vrot.slane %v1526_v30, 5  ;;  %v1533_v38 = vrot.slane %v1531_v31, 4 }
  0x47   : > { %2026 = vmatpush3.bf16.msra.mxu0 %v1599_v34  ;;  %2021 = vmatprep.mubr.msk.bf16.mxu0 %vm325_vm1, %v2138_v39  ;;  %v1522_v34 = vrot.slane %v1520_v27, 5  ;;  %v1540_v39 = vshll.u32 %v1883_v22, 16  ;;  %v1548_v48 = vshll.u32 %v1884_v36, 16  ;;  %v1554_v49 = vshll.u32 %v1885_v16, 16 }
  0x48   : > { %v1515_v40 = vsel %vm2282_vm4, %v1510_v1, %v1514_v14  ;;  %v1536_v42 = vrot.slane %v1534_v35, 5  ;;  %v1547_v51 = vrot.slane %v1545_v23, 4  ;;  %v1562_v54 = vshll.u32 %v1886_v43, 16 }
  0x49   : > { %v1523_v41 = vor.u32 %v1522_v34, %v1519_v33  ;;  %v1542_v47 = vrot.slane %v1540_v39, 5  ;;  %v1568_v55 = vshll.u32 %v1887_v45, 16  ;;  %v1556_v60 = vrot.slane %v1554_v49, 5 }
  0x4a   : > { %1978 = vmatmul.mubr.msk.bf16.vlgmr.msra.gmra.mrb[0].mxu1 %vm325_vm1, %v2137_v52  ;;  %v1537_v50 = vor.u32 %v1536_v42, %v1533_v38  ;;  %v1559_v52 = vshrl.u32 %v1886_v43, 16  ;;  %v1564_v61 = vrot.slane %v1562_v54, 5 }
  0x4b   : > { %2036 = vmatpush3.bf16.msra.mxu1 %v2204_v3  ;;  %1981 = vmatprep.mubr.msk.bf16.mxu1 %vm325_vm1, %v2140_v5  ;;  %v1501_v3 = vsel %vm2282_vm4, %v1496_v29, %v1500_v9  ;;  %v1524_v10 = vrot.slane %v1523_v41, 4  ;;  %v1570_v4 = vrot.slane %v1568_v55, 5 }
  0x4c   : > { %v1890_v46 = vcombine.low %v1501_v3, %v1515_v40  ;;  %v1538_v57 = vrot.slane %v1537_v50, 4  ;;  %v1561_v58 = vrot.slane %v1559_v52, 4 }
  0x4d   : > { %v1529_v56 = vsel %vm2282_vm4, %v1524_v10, %v1528_v37 }
  0x4e   : > { %2022 = vmatmul.mubr.msk.bf16.gmra.mrb[4].mxu0 %vm325_vm1, %v2139_v53  ;;  %v1550_v53 = vrot.slane %v1548_v48, 5  ;;  %v1543_v62 = vsel %vm2282_vm4, %v1538_v57, %v1542_v47  ;;  %v1565_v2 = vor.u32 %v1564_v61, %v1561_v58 }
  0x4f   : > { %2027 = vmatprep.mubr.msk.bf16.mxu0 %vm325_vm1, %v1889_v28  ;;  %v1891_v63 = vcombine.low %v1529_v56, %v1543_v62 }
  0x50   : > { %v1551_v59 = vor.u32 %v1550_v53, %v1547_v51  ;;  %v1566_v6 = vrot.slane %v1565_v2, 4 }
  0x52   : > { %1982 = vmatmul.mubr.msk.bf16.gmra.mrb[4].mxu1 %vm325_vm1, %v2141_v32  ;;  %v1552_v0 = vrot.slane %v1551_v59, 4  ;;  %v1571_v7 = vsel %vm2282_vm4, %v1566_v6, %v1570_v4 }
  0x53   : > { %1991 = vmatprep.mubr.msk.bf16.mxu1 %vm325_vm1, %v2142_v15 }
  0x54   : > { %v1557_v5 = vsel %vm2282_vm4, %v1552_v0, %v1556_v60 }
  0x55   : > { %v1892_v9 = vcombine.low %v1557_v5, %v1571_v7 }
  0x56   : > { %2028 = vmatmul.mubr.msk.bf16.vlgmr.msra.gmra.mrb[0].mxu0 %vm325_vm1, %v1890_v46 }
  0x57   : > { %2031 = vmatprep.mubr.msk.bf16.mxu0 %vm325_vm1, %v1891_v63 }
  0x5e   : > { %2032 = vmatmul.mubr.msk.bf16.gmra.mrb[4].mxu0 %vm325_vm1, %v1892_v9  ;;  %1992 = vmatmul.mubr.msk.bf16.vlgmr.msra.gmra.mrb[4].mxu1 %vm325_vm1, %v2143_v8 }
 0x11d   : > { %v1979_v11 = vpop.f32.mrb[0].mxu1 }
 0x11e   : > { %v819_v12 = vpop.f32.mrb[1].mxu1 }
 0x11f   : > { %v1980_v13 = vpop.f32.mrb[2].mxu1 }
 0x120   : > { %v822_v14 = vpop.f32.mrb[3].mxu1 }
 0x129   : > { %v2029_v17 = vpop.f32.mrb[0].mxu0 }
 0x12a   : > { %v2037_v18 = vadd.f32 %v2029_v17, %v1979_v11  ;;  %v1635_v44 = vpop.f32.mrb[1].mxu0 }
 0x12b   : > { %v2038_v19 = vadd.f32 %v1635_v44, %v819_v12  ;;  %v2030_v20 = vpop.f32.mrb[2].mxu0 }
 0x12c   : > { %1677 = vst.msk [vmem:[%s284_s6 + $0x10] sm:$0xff] %vm1674_vm5, %v2037_v18  ;;  %v2039_v21 = vadd.f32 %v2030_v20, %v1980_v13  ;;  %v1638_v22 = vpop.f32.mrb[3].mxu0 }
 0x12d   : > { %1675 = vst.msk [vmem:[%s284_s6] sm:$0xff] %vm1674_vm5, %v2038_v19  ;;  %v2040_v24 = vadd.f32 %v1638_v22, %v822_v14 }
 0x12e   : > { %1678 = vst.msk [vmem:[%s284_s6 + $0x18] sm:$0xff] %vm1674_vm5, %v2039_v21 }
 0x12f   : > { %1676 = vst.msk [vmem:[%s284_s6 + $0x8] sm:$0xff] %vm1674_vm5, %v2040_v24 }
 0x131   : > { %v2033_v25 = vpop.f32.mrb[4].mxu0  ;;  %v1993_v27 = vpop.f32.mrb[4].mxu1 }
 0x132   : > { %v1651_v26 = vpop.f32.mrb[5].mxu0  ;;  %v2041_v29 = vadd.f32 %v2033_v25, %v1993_v27  ;;  %v953_v30 = vpop.f32.mrb[5].mxu1 }
 0x133   : > { %v2034_v28 = vpop.f32.mrb[6].mxu0  ;;  %v2042_v32 = vadd.f32 %v1651_v26, %v953_v30  ;;  %v1994_v1 = vpop.f32.mrb[6].mxu1 }
 0x134   : > { %v1654_v31 = vpop.f32.mrb[7].mxu0  ;;  %1681 = vst.msk [vmem:[%s284_s6 + $0x30] sm:$0xff] %vm1674_vm5, %v2041_v29  ;;  %v2043_v33 = vadd.f32 %v2034_v28, %v1994_v1  ;;  %v956_v34 = vpop.f32.mrb[7].mxu1 }
 0x135   : > { %1679 = vst.msk [vmem:[%s284_s6 + $0x20] sm:$0xff] %vm1674_vm5, %v2042_v32  ;;  %v2044_v35 = vadd.f32 %v1654_v31, %v956_v34 }
 0x136   : > { %1682 = vst.msk [vmem:[%s284_s6 + $0x38] sm:$0xff] %vm1674_vm5, %v2043_v33 }
 0x137   : > { %1680 = vst.msk [vmem:[%s284_s6 + $0x28] sm:$0xff] %vm1674_vm5, %v2044_v35 }
 0x138 PF: > { %s15_s18 = sadd.s32 1, %s2150_s18  }
 0x139   : > { %p12_p4 = scmp.ge.s32.totalorder %s15_s18, 4  }
 0x13b   :  { %14 = sbr.rel (!%p12_p4) target bundleno = 1 (0x1), region = 89 }

// kernel: residual_conv.21
= control target key start
LH: loop header
LB: loop body
LE: loop exit
PB: predicated region body
PF: predicated region fallthrough
CT: control target
= control target key end

     0   :  { %s2372_s21 = smov 0   ;;  %s2922_s0 = inlined_call_operand.vmem [shape: bf16[2,10,10,8], index: 0, kind: input, shape index: {}]   ;;  %s2923_s1 = inlined_call_operand.vmem [shape: bf16[9,8,8], index: 1, kind: input, shape index: {}]   ;;  %s2924_s2 = inlined_call_operand.vmem [shape: f32[1,8], index: 2, kind: input, shape index: {}]   ;;  %s2925_s3 = inlined_call_operand.vmem [shape: f32[2,8,8,8], index: 3, kind: input, shape index: {}]   ;;  %s2926_s4 = inlined_call_operand.vmem [shape: f32[1,8], index: 4, kind: input, shape index: {}]   ;;  %s2927_s5 = inlined_call_operand.vmem [shape: f32[1,8], index: 5, kind: input, shape index: {}]   ;;  %s2928_s6 = inlined_call_operand.vmem [shape: f32[2,8,8,8], index: 6, kind: output, shape index: {}]  }
   0x1 LB: > { %s1912_s22 = sadd.s32 4294967295, %s2335_s21   ;;  %p1916_p0 = scmp.ge.s32.totalorder %s2335_s21, 1  ;;  %s2335_s21 = sphi %s2372_s21, %s16_s21  }
   0x2   : > { %p222_p1 = scmp.lt.s32.totalorder %s2335_s21, 3 }
   0x4   : > { %p223_p2 = pnand %p1916_p0, %p222_p1 }
   0x5   : > { %v1922_v0 = vld [vmem:[%s2923_s1 + $0x4] sm:$0xf] (!%p223_p2)  ;;  %vm432_vm0 = vcmask (!%p223_p2), 1043456   ;;  %v2386_v1 = vld [vmem:[%s2923_s1 + $0x10] sm:$0xf] (!%p223_p2)  ;;  %p257_p3 = scmp.lt.s32.totalorder (!%p223_p2), %s1912_s22, 1 }
   0x6   : > { %226 = sbr.rel (%p223_p2) target bundleno = 338 (0x152), region = 44  ;;  %2298 = vmatprep.subr.msk.bf16.mxu1 (!%p223_p2), %vm432_vm0, %v1922_v0  ;;  %2302 = vmatprep.subr.msk.bf16.mxu0 (!%p223_p2), %vm432_vm0, %v2386_v1  ;;  %v434_v2 = vsel (!%p223_p2), %vm432_vm0, %v1922_v0, 0  ;;  %v2394_v3 = vsel (!%p223_p2), %vm432_vm0, %v2386_v1, 0  ;;  %v281_v4 = vld [vmem:[%s2923_s1] sm:$0xf] (!%p223_p2)  ;;  %vm419_vm3 = vcmask (!%p223_p2), 64512  }
   0x7   : > { %2143 = vmatpush3.bf16.msra.mxu1 (!%p223_p2), %v434_v2  ;;  %2183 = vmatpush3.bf16.msra.mxu0 (!%p223_p2), %v2394_v3  ;;  %v2014_v5 = vld [vmem:[%s2923_s1 + $0x14] sm:$0xf] (!%p223_p2)  ;;  %vm290_vm1 = vsmask.f32 (!%p223_p2), 3328  ;;  %vm291_vm2 = vsmask.f32 (!%p223_p2), 7440 }
   0x8   : > { %2299 = vmatprep.subr.msk.bf16.mxu1 (!%p223_p2), %vm432_vm0, %v281_v4  ;;  %2304 = vmatprep.subr.msk.bf16.mxu0 (!%p223_p2), %vm432_vm0, %v2014_v5  ;;  %v2433_v17 = vsel (!%p223_p2), %vm432_vm0, %v281_v4, 0  ;;  %v2446_v31 = vld [vmem:[%s2923_s1 + $0x18] sm:$0xf] (!%p223_p2)  ;;  %vm2450_vm4 = vmor (!%p223_p2), %vm290_vm1, %vm291_vm2  ;;  %v2462_v42 = vsel (!%p223_p2), %vm432_vm0, %v2014_v5, 0  ;;  %vm625_vm5 = vcmask (!%p223_p2), 1042432   ;;  %vm626_vm6 = vcmask (!%p223_p2), 1046532  }
   0x9   : > { %v2469_v47 = vsel (!%p223_p2), %vm432_vm0, %v2446_v31, 0  ;;  %vm2561_vm7 = vmor (!%p223_p2), %vm625_vm5, %vm626_vm6 }
   0xd   : > { %s2934_s22 = smov (!%p257_p3, %s1912_s22), 1 }
   0xe   : > { %s2308_s7 = smul.u32 80, %s2934_s22  ;;  %s2095_s23 = sshll.u32 %s2934_s22, 6 }
   0xf   : > { %s2879_s26 = scalar_lea.vmem %s2925_s3, %s2095_s23 }
  0x10   : > { %s2411_s10 = scalar_lea.vmem %s2922_s0, %s2308_s7  ;;  %v1793_v32 = vld [vmem:[%s2879_s26 + $0x10] sm:$0xff] }
  0x11   : > { %v2414_v6 = vld [vmem:[%s2411_s10] sm:$0xf]  ;;  %v2417_v7 = vld [vmem:[%s2411_s10 + $0x8] sm:$0xf]  ;;  %v2420_v8 = vld [vmem:[%s2411_s10 + $0x4] sm:$0x1] }
  0x12   : > { %v2423_v9 = vld [vmem:[%s2411_s10 + $0xc] sm:$0x1]  ;;  %v294_v10 = vshrl.u32 %v2414_v6, 16  ;;  %v297_v11 = vshll.u32 %v2414_v6, 16  ;;  %v303_v12 = vshll.u32 %v2420_v8, 16  ;;  %v308_v13 = vshrl.u32 %v2417_v7, 16 }
  0x13   : > { %v311_v14 = vshll.u32 %v2417_v7, 16  ;;  %v317_v15 = vshll.u32 %v2423_v9, 16  ;;  %v1973_v16 = vld [vmem:[%s2411_s10 + $0x8] sm:$0xf]  ;;  %v2436_v22 = vld [vmem:[%s2411_s10 + $0xc] sm:$0x1] }
  0x14   : > { %v296_v18 = vrot.slane %v294_v10, 4  ;;  %v299_v19 = vrot.slane %v297_v11, 5  ;;  %v305_v20 = vrot.slane %v303_v12, 5  ;;  %v310_v21 = vrot.slane %v308_v13, 4  ;;  %v1975_v25 = vld [vmem:[%s2411_s10 + $0x10] sm:$0xf] }
  0x15   : > { %v313_v23 = vrot.slane %v311_v14, 5  ;;  %v319_v24 = vrot.slane %v317_v15, 5  ;;  %v2440_v26 = vld [vmem:[%s2411_s10 + $0x14] sm:$0x1]  ;;  %v898_v28 = vshrl.u32 %v1973_v16, 16  ;;  %v901_v29 = vshll.u32 %v1973_v16, 16 }
  0x16   : > { %v300_v27 = vor.u32 %v299_v19, %v296_v18  ;;  %v907_v30 = vshll.u32 %v2436_v22, 16  ;;  %v912_v34 = vshrl.u32 %v1975_v25, 16  ;;  %v915_v35 = vshll.u32 %v1975_v25, 16  ;;  %v2456_v37 = vld [vmem:[%s2411_s10 + $0x10] sm:$0xf] }
  0x17   : > { %v314_v33 = vor.u32 %v313_v23, %v310_v21  ;;  %v921_v36 = vshll.u32 %v2440_v26, 16  ;;  %v900_v39 = vrot.slane %v898_v28, 4  ;;  %v903_v40 = vrot.slane %v901_v29, 5  ;;  %v2459_v41 = vld [vmem:[%s2411_s10 + $0x18] sm:$0xf] }
  0x18   : > { %v301_v38 = vrot.slane %v300_v27, 4  ;;  %v914_v44 = vrot.slane %v912_v34, 4  ;;  %v917_v45 = vrot.slane %v915_v35, 5  ;;  %v2465_v46 = vld [vmem:[%s2411_s10 + $0x14] sm:$0x1]  ;;  %v909_v50 = vrot.slane %v907_v30, 5 }
  0x19   : > { %v315_v43 = vrot.slane %v314_v33, 4  ;;  %v904_v49 = vor.u32 %v903_v40, %v900_v39  ;;  %v923_v51 = vrot.slane %v921_v36, 5  ;;  %v2476_v54 = vld [vmem:[%s2411_s10 + $0x1c] sm:$0x1]  ;;  %v322_v55 = vshrl.u32 %v2456_v37, 16 }
  0x1a   : > { %v306_v48 = vsel %vm2450_vm4, %v301_v38, %v305_v20  ;;  %v918_v53 = vor.u32 %v917_v45, %v914_v44  ;;  %v325_v56 = vshll.u32 %v2456_v37, 16  ;;  %v331_v59 = vshll.u32 %v2465_v46, 16  ;;  %v1977_v2 = vld [vmem:[%s2411_s10 + $0x18] sm:$0xf]  ;;  %v2490_v12 = vld [vmem:[%s2411_s10 + $0x1c] sm:$0x1] }
  0x1b   : > { %v320_v52 = vsel %vm2450_vm4, %v315_v43, %v319_v24  ;;  %v905_v58 = vrot.slane %v904_v49, 4  ;;  %v336_v60 = vshrl.u32 %v2459_v41, 16  ;;  %v324_v62 = vrot.slane %v322_v55, 4  ;;  %v1979_v18 = vld [vmem:[%s2411_s10 + $0x20] sm:$0xf] }
  0x1c   : > { %v1923_v57 = vcombine.low %v306_v48, %v320_v52  ;;  %v919_v61 = vrot.slane %v918_v53, 4  ;;  %v327_v63 = vrot.slane %v325_v56, 5  ;;  %v339_v0 = vshll.u32 %v2459_v41, 16  ;;  %v2496_v19 = vld [vmem:[%s2411_s10 + $0x24] sm:$0x1] }
  0x1d   : > { %v910_v4 = vsel %vm2450_vm4, %v905_v58, %v909_v50  ;;  %v1137_v5 = vrot.slane %v2436_v22, 5  ;;  %v338_v10 = vrot.slane %v336_v60, 4  ;;  %v345_v11 = vshll.u32 %v2476_v54, 16  ;;  %v2503_v36 = vld [vmem:[%s2411_s10 + $0x20] sm:$0xf] }
  0x1e   : > { %2144 = vmatprep.mubr.msk.bf16.mxu1 %vm419_vm3, %v1923_v57  ;;  %v924_v13 = vsel %vm2450_vm4, %v919_v61, %v923_v51  ;;  %v328_v14 = vor.u32 %v327_v63, %v324_v62  ;;  %v333_v15 = vrot.slane %v331_v59, 5  ;;  %v341_v16 = vrot.slane %v339_v0, 5  ;;  %v2508_v44 = vld [vmem:[%s2411_s10 + $0x24] sm:$0x1]  ;;  %v2512_v51 = vld [vmem:[%s2411_s10 + $0x28] sm:$0xf] }
  0x1f   : > { %v1990_v20 = vcombine.low %v910_v4, %v924_v13  ;;  %v1141_v21 = vrot.slane %v2440_v26, 5  ;;  %v347_v23 = vrot.slane %v345_v11, 5  ;;  %v926_v24 = vshrl.u32 %v1977_v2, 16  ;;  %v2518_v56 = vld [vmem:[%s2411_s10 + $0x2c] sm:$0x1] }
  0x20   : > { %v329_v25 = vrot.slane %v328_v14, 4  ;;  %v342_v27 = vor.u32 %v341_v16, %v338_v10  ;;  %v929_v28 = vshll.u32 %v1977_v2, 16  ;;  %v935_v29 = vshll.u32 %v2490_v12, 16  ;;  %v2524_v62 = vld [vmem:[%s2411_s10 + $0x30] sm:$0xf] }
  0x21   : > { %2184 = vmatprep.mubr.msk.bf16.mxu0 %vm419_vm3, %v1990_v20  ;;  %v928_v30 = vrot.slane %v926_v24, 4  ;;  %v940_v33 = vshrl.u32 %v1979_v18, 16  ;;  %v943_v34 = vshll.u32 %v1979_v18, 16  ;;  %v949_v35 = vshll.u32 %v2496_v19, 16  ;;  %v2529_v63 = vld [vmem:[%s2923_s1 + $0x8] sm:$0xf] }
  0x22   : > { %v334_v38 = vsel %vm2450_vm4, %v329_v25, %v333_v15  ;;  %v343_v39 = vrot.slane %v342_v27, 4  ;;  %v931_v40 = vrot.slane %v929_v28, 5  ;;  %v937_v43 = vrot.slane %v935_v29, 5  ;;  %v2534_v11 = vld [vmem:[%s2411_s10 + $0x38] sm:$0xf] }
  0x23   : > { %v942_v45 = vrot.slane %v940_v33, 4  ;;  %v945_v48 = vrot.slane %v943_v34, 5  ;;  %v951_v49 = vrot.slane %v949_v35, 5  ;;  %v1145_v50 = vrot.slane %v2490_v12, 5  ;;  %v2539_v18 = vld [vmem:[%s2411_s10 + $0x34] sm:$0x1] }
  0x24   : > { %v348_v52 = vsel %vm2450_vm4, %v343_v39, %v347_v23  ;;  %v932_v53 = vor.u32 %v931_v40, %v928_v30  ;;  %v1149_v55 = vrot.slane %v2496_v19, 5  ;;  %v350_v57 = vshrl.u32 %v2503_v36, 16  ;;  %v2545_v25 = vld [vmem:[%s2411_s10 + $0x3c] sm:$0x1]  ;;  %v1998_v34 = vld [vmem:[%s2411_s10 + $0x8] sm:$0xe] }
  0x25   : > { %v1924_v58 = vcombine.low %v334_v38, %v348_v52  ;;  %v946_v59 = vor.u32 %v945_v48, %v942_v45  ;;  %v353_v60 = vshll.u32 %v2503_v36, 16  ;;  %v359_v61 = vshll.u32 %v2508_v44, 16  ;;  %v2614_v19 = vld [vmem:[%s2411_s10 + $0x44] sm:$0x1] }
  0x26   : > { %v933_v0 = vrot.slane %v932_v53, 4  ;;  %v352_v2 = vrot.slane %v350_v57, 4  ;;  %v364_v4 = vshrl.u32 %v2512_v51, 16  ;;  %v367_v10 = vshll.u32 %v2512_v51, 16  ;;  %v2001_v57 = vld [vmem:[%s2411_s10 + $0x20] sm:$0xe] }
  0x27   : > { %2145 = vmatmul.mubr.msk.bf16.vlgmr.msra.gmra.mrb[0].mxu1 %vm419_vm3, %v1924_v58  ;;  %v947_v13 = vrot.slane %v946_v59, 4  ;;  %v355_v14 = vrot.slane %v353_v60, 5  ;;  %v361_v15 = vrot.slane %v359_v61, 5  ;;  %v373_v16 = vshll.u32 %v2518_v56, 16  ;;  %v2091_v53 = vld [vmem:[%s2926_s4] ss:$0 sm:$0xff] }
  0x28   : > { %2153 = vmatpush3.bf16.msra.mxu1 %v2433_v17  ;;  %v938_v20 = vsel %vm2450_vm4, %v933_v0, %v937_v43  ;;  %v366_v23 = vrot.slane %v364_v4, 4  ;;  %v369_v24 = vrot.slane %v367_v10, 5  ;;  %v378_v27 = vshrl.u32 %v2524_v62, 16  ;;  %v1999_v17 = vld [vmem:[%s2411_s10 + $0x10] sm:$0xe] }
  0x29   : > { %v952_v28 = vsel %vm2450_vm4, %v947_v13, %v951_v49  ;;  %v356_v29 = vor.u32 %v355_v14, %v352_v2  ;;  %v375_v30 = vrot.slane %v373_v16, 5  ;;  %v381_v33 = vshll.u32 %v2524_v62, 16  ;;  %2300 = vmatprep.subr.msk.bf16.mxu1 %vm432_vm0, %v2529_v63  ;;  %v2000_v43 = vld [vmem:[%s2411_s10 + $0x18] sm:$0xe]  ;;  %v2002_v0 = vld [vmem:[%s2411_s10 + $0x28] sm:$0xe] }
  0x2a   : > { %v1991_v35 = vcombine.low %v938_v20, %v952_v28  ;;  %v370_v38 = vor.u32 %v369_v24, %v366_v23  ;;  %v380_v39 = vrot.slane %v378_v27, 4  ;;  %v387_v40 = vshll.u32 %v2539_v18, 16 }
  0x2b   : > { %v357_v45 = vrot.slane %v356_v29, 4  ;;  %v383_v48 = vrot.slane %v381_v33, 5  ;;  %v392_v49 = vshrl.u32 %v2534_v11, 16  ;;  %v395_v52 = vshll.u32 %v2534_v11, 16  ;;  %v2584_v29 = vld [vmem:[%s2411_s10 + $0x34] sm:$0x1] }
  0x2c   : > { %2185 = vmatmul.mubr.msk.bf16.vlgmr.msra.gmra.mrb[0].mxu0 %vm419_vm3, %v1991_v35  ;;  %v371_v58 = vrot.slane %v370_v38, 4  ;;  %v389_v59 = vrot.slane %v387_v40, 5  ;;  %v401_v60 = vshll.u32 %v2545_v25, 16  ;;  %v2006_v61 = vrot.slane %v1998_v34, 9  ;;  %v2004_v38 = vld [vmem:[%s2411_s10 + $0x38] sm:$0xe] }
  0x2d   : > { %2193 = vmatpush3.bf16.msra.mxu0 %v2462_v42  ;;  %v362_v2 = vsel %vm2450_vm4, %v357_v45, %v361_v15  ;;  %v384_v4 = vor.u32 %v383_v48, %v380_v39  ;;  %v394_v10 = vrot.slane %v392_v49, 4  ;;  %v397_v13 = vrot.slane %v395_v52, 5  ;;  %v2581_v42 = vld [vmem:[%s2411_s10 + $0x2c] sm:$0x1]  ;;  %v2005_v45 = vld [vmem:[%s2411_s10 + $0x40] sm:$0xe] }
  0x2e   : > { %v376_v14 = vsel %vm2450_vm4, %v371_v58, %v375_v30  ;;  %v403_v16 = vrot.slane %v401_v60, 5  ;;  %v1138_v20 = vsel %vm2561_vm7, %v2006_v61, %v1137_v5  ;;  %v2007_v23 = vrot.slane %v1999_v17, 9  ;;  %2305 = vmatprep.subr.msk.bf16.mxu0 %vm432_vm0, %v2446_v31  ;;  %v2003_v30 = vld [vmem:[%s2411_s10 + $0x30] sm:$0xe]  ;;  %v2592_v31 = vld [vmem:[%s2411_s10 + $0x3c] sm:$0x1] }
  0x2f   : > { %v1925_v15 = vcombine.low %v362_v2, %v376_v14  ;;  %v385_v24 = vrot.slane %v384_v4, 4  ;;  %v398_v27 = vor.u32 %v397_v13, %v394_v10  ;;  %v2008_v28 = vrot.slane %v2000_v43, 9  ;;  %v2623_v48 = vld [vmem:[%s2923_s1 + $0xc] sm:$0xf]  ;;  %v602_v58 = vld [vmem:[%s2411_s10 + $0x8] sm:$0xe] }
  0x30   : > { %v1142_v22 = vsel %vm2561_vm7, %v2007_v23, %v1141_v21  ;;  %v2009_v5 = vrot.slane %v2001_v57, 9  ;;  %v2010_v33 = vrot.slane %v2002_v0, 9  ;;  %v1153_v39 = vrot.slane %v2581_v42, 5  ;;  %v604_v4 = vld [vmem:[%s2411_s10 + $0x18] sm:$0xe] }
  0x31   : > { %2148 = vmatprep.mubr.msk.bf16.mxu1 %vm419_vm3, %v1925_v15  ;;  %v390_v34 = vsel %vm2450_vm4, %v385_v24, %v389_v59  ;;  %v399_v17 = vrot.slane %v398_v27, 4  ;;  %v2015_v35 = vcombine.low %v1138_v20, %v1142_v22  ;;  %v1146_v26 = vsel %vm2561_vm7, %v2008_v28, %v1145_v50  ;;  %v603_v59 = vld [vmem:[%s2411_s10 + $0x10] sm:$0xe]  ;;  %v605_v20 = vld [vmem:[%s2411_s10 + $0x20] sm:$0xe] }
  0x32   : > { %v1150_v21 = vsel %vm2561_vm7, %v2009_v5, %v1149_v55  ;;  %v2011_v40 = vrot.slane %v2003_v30, 9  ;;  %v1157_v43 = vrot.slane %v2584_v29, 5  ;;  %v1931_v50 = vcombine.low %v2414_v6, %v2417_v7  ;;  %v2056_v55 = vld [vmem:[%s2923_s1 + $0x1c] sm:$0xf]  ;;  %v601_v7 = vld [vmem:[%s2411_s10] sm:$0xe] }
  0x33   : > { %v404_v12 = vsel %vm2450_vm4, %v399_v17, %v403_v16  ;;  %2194 = vmatprep.mubr.msk.bf16.mxu0 %vm419_vm3, %v2015_v35  ;;  %v2016_v52 = vcombine.low %v1146_v26, %v1150_v21  ;;  %v1154_v57 = vsel %vm2561_vm7, %v2010_v33, %v1153_v39  ;;  %v630_v60 = vrot.slane %v2420_v8, 5  ;;  %v2040_v5 = vld [vmem:[%s2411_s10 + $0x10] sm:$0xf]  ;;  %v606_v17 = vld [vmem:[%s2411_s10 + $0x28] sm:$0xe] }
  0x34   : > { %v1926_v49 = vcombine.low %v390_v34, %v404_v12  ;;  %v1158_v6 = vsel %vm2561_vm7, %v2011_v40, %v1157_v43  ;;  %v2012_v0 = vrot.slane %v2004_v38, 9  ;;  %v1161_v2 = vrot.slane %v2592_v31, 5  ;;  %v607_v35 = vld [vmem:[%s2411_s10 + $0x30] sm:$0xe]  ;;  %v2042_v26 = vld [vmem:[%s2411_s10 + $0x18] sm:$0xf] }
  0x35   : > { %v2017_v61 = vcombine.low %v1154_v57, %v1158_v6  ;;  %v634_v10 = vrot.slane %v2423_v9, 5  ;;  %v638_v13 = vrot.slane %v2465_v46, 5  ;;  %v2013_v14 = vrot.slane %v2005_v45, 9  ;;  %v2321_v38 = vld [vmem:[%s2411_s10 + $0x10] ss:$8 sps:$4 sm:$0xff]  }
  0x36   : > { %2149 = vmatmul.mubr.msk.bf16.gmra.mrb[4].mxu1 %vm419_vm3, %v1926_v49  ;;  %v1165_v16 = vrot.slane %v2614_v19, 5  ;;  %v642_v23 = vrot.slane %v2476_v54, 5  ;;  %v1939_v8 = vrot.slane %v601_v7, 9  ;;  %v1940_v15 = vrot.slane %v602_v58, 9  ;;  %v2686_v21 = vld [vmem:[%s2411_s10 + $0x38] sm:$0xe] }
  0x37   : > { %2154 = vmatprep.mubr.msk.bf16.mxu1 %vm419_vm3, %v1931_v50  ;;  %v1941_v24 = vrot.slane %v603_v59, 9  ;;  %v687_v9 = vsel %vm432_vm0, %v2529_v63, 0  ;;  %v2646_v46 = vsel %vm432_vm0, %v2056_v55, 0  ;;  %v1942_v27 = vrot.slane %v604_v4, 9  ;;  %v2689_v39 = vld [vmem:[%s2411_s10 + $0x14] sm:$0x1] }
  0x38   : > { %2195 = vmatmul.mubr.msk.bf16.vlgmr.msra.gmra.mrb[0].mxu0 %vm419_vm3, %v2016_v52  ;;  %v2650_v54 = vsel %vm432_vm0, %v2623_v48, 0  ;;  %v1162_v28 = vsel %vm2561_vm7, %v2012_v0, %v1161_v2  ;;  %v1166_v63 = vsel %vm2561_vm7, %v2013_v14, %v1165_v16  ;;  %v1943_v30 = vrot.slane %v605_v20, 9  ;;  %v2046_v52 = vld [vmem:[%s2411_s10 + $0x28] sm:$0xf]  ;;  %v2708_v59 = vld [vmem:[%s2411_s10 + $0x1c] sm:$0x1] }
  0x39   : > { %2203 = vmatpush3.bf16.msra.mxu0 %v2469_v47  ;;  %2198 = vmatprep.mubr.msk.bf16.mxu0 %vm419_vm3, %v2017_v61  ;;  %v646_v22 = vrot.slane %v2508_v44, 5  ;;  %v1932_v33 = vcombine.low %v2456_v37, %v2459_v41  ;;  %v2665_v47 = vsel %vm2561_vm7, %v1939_v8, %v630_v60  ;;  %v2669_v34 = vsel %vm2561_vm7, %v1940_v15, %v634_v10  ;;  %v2716_v2 = vld [vmem:[%s2411_s10 + $0x24] sm:$0x1]  ;;  %v2048_v20 = vld [vmem:[%s2411_s10 + $0x30] sm:$0xf] }
  0x3a   : > { %2306 = vmatprep.subr.msk.bf16.mxu0 %vm432_vm0, %v2056_v55  ;;  %v1933_v44 = vcombine.low %v2503_v36, %v2512_v51  ;;  %v2679_v37 = vsel %vm2561_vm7, %v1941_v24, %v638_v13  ;;  %v2683_v41 = vsel %vm2561_vm7, %v1942_v27, %v642_v23  ;;  %v2018_v40 = vcombine.low %v1162_v28, %v1166_v63  ;;  %v2044_v36 = vld [vmem:[%s2411_s10 + $0x20] sm:$0xf]  ;;  %v2727_v15 = vld [vmem:[%s2411_s10 + $0x2c] sm:$0x1]  ;;  %v2323_v27 = vld [vmem:[%s2411_s10 + $0x30] ss:$8 sps:$4 sm:$0xff]  }
  0x3b   : > { %v1934_v43 = vcombine.low %v2524_v62, %v2534_v11  ;;  %v1405_v12 = vshrl.u32 %v2040_v5, 16  ;;  %v1408_v50 = vshll.u32 %v2040_v5, 16  ;;  %v1948_v51 = vcombine.low %v2665_v47, %v2669_v34  ;;  %v2322_v23 = vld [vmem:[%s2411_s10 + $0x20] ss:$8 sps:$4 sm:$0xff]   ;;  %v2050_v5 = vld [vmem:[%s2411_s10 + $0x38] sm:$0xf] }
  0x3c   : > { %v2698_v45 = vsel %vm2561_vm7, %v1943_v30, %v646_v22  ;;  %v1944_v55 = vrot.slane %v606_v17, 9  ;;  %v1419_v49 = vshrl.u32 %v2042_v26, 16  ;;  %v1949_v62 = vcombine.low %v2679_v37, %v2683_v41  ;;  %v2738_v17 = vld [vmem:[%s2411_s10 + $0x34] sm:$0x1] }
  0x3d   : > { %v650_v11 = vrot.slane %v2518_v56, 5  ;;  %v1407_v57 = vrot.slane %v1405_v12, 4  ;;  %v1410_v6 = vrot.slane %v1408_v50, 5  ;;  %v1945_v7 = vrot.slane %v607_v35, 9  ;;  %v2052_v12 = vld [vmem:[%s2411_s10 + $0x40] sm:$0xf] }
  0x3e   : > { %2155 = vmatmul.mubr.msk.bf16.vlgmr.msra.gmra.mrb[0].mxu1 %vm419_vm3, %v1932_v33  ;;  %v654_v58 = vrot.slane %v2539_v18, 5  ;;  %v1421_v60 = vrot.slane %v1419_v49, 4  ;;  %v1422_v61 = vshll.u32 %v2042_v26, 16  ;;  %v1946_v56 = vrot.slane %v2686_v21, 9  ;;  %v2748_v21 = vld [vmem:[%s2411_s10 + $0x3c] sm:$0x1] }
  0x3f   : > { %2163 = vmatpush3.bf16.msra.mxu1 %v687_v9  ;;  %2158 = vmatprep.mubr.msk.bf16.mxu1 %vm419_vm3, %v1933_v44  ;;  %v1414_v0 = vshll.u32 %v2689_v39, 16  ;;  %v1433_v18 = vshrl.u32 %v2044_v36, 16  ;;  %v1436_v4 = vshll.u32 %v2044_v36, 16  ;;  %v1411_v10 = vor.u32 %v1410_v6, %v1407_v57  ;;  %v2054_v6 = vld [vmem:[%s2411_s10 + $0x48] sm:$0xf] }
  0x40   : > { %2199 = vmatmul.mubr.msk.bf16.gmra.mrb[4].mxu0 %vm419_vm3, %v2018_v40  ;;  %2301 = vmatprep.subr.msk.bf16.mxu1 %vm432_vm0, %v2623_v48  ;;  %v1424_v13 = vrot.slane %v1422_v61, 5  ;;  %v1447_v14 = vshrl.u32 %v2046_v52, 16  ;;  %v1450_v16 = vshll.u32 %v2046_v52, 16  ;;  %v2723_v48 = vsel %vm2561_vm7, %v1944_v55, %v650_v11 }
  0x41   : > { %2204 = vmatprep.mubr.msk.bf16.mxu0 %vm419_vm3, %v2321_v38  ;;  %v1428_v8 = vshll.u32 %v2708_v59, 16  ;;  %v1435_v24 = vrot.slane %v1433_v18, 4  ;;  %v1438_v9 = vrot.slane %v1436_v4, 5  ;;  %v658_v28 = vrot.slane %v2545_v25, 5  ;;  %v2745_v25 = vld [vmem:[%s2923_s1 + $0x20] sm:$0xf] }
  0x42   : > { %v1425_v63 = vor.u32 %v1424_v13, %v1421_v60  ;;  %v1449_v30 = vrot.slane %v1447_v14, 4  ;;  %v1452_v22 = vrot.slane %v1450_v16, 5  ;;  %v2734_v33 = vsel %vm2561_vm7, %v1945_v7, %v654_v58  ;;  %v2773_v13 = vld [vmem:[%s2411_s10 + $0x44] sm:$0x1] }
  0x43   : > { %v1416_v47 = vrot.slane %v1414_v0, 5  ;;  %v1442_v34 = vshll.u32 %v2716_v2, 16  ;;  %v1461_v35 = vshrl.u32 %v2048_v20, 16  ;;  %v1950_v26 = vcombine.low %v2698_v45, %v2723_v48 }
  0x44   : > { %v1412_v44 = vrot.slane %v1411_v10, 4  ;;  %v1439_v38 = vor.u32 %v1438_v9, %v1435_v24  ;;  %v1464_v40 = vshll.u32 %v2048_v20, 16  ;;  %v1426_v50 = vrot.slane %v1425_v63, 4  ;;  %v2776_v20 = vld [vmem:[%s2411_s10 + $0x4c] sm:$0x1] }
  0x45   : > { %v1430_v36 = vrot.slane %v1428_v8, 5  ;;  %v1463_v55 = vrot.slane %v1461_v35, 4  ;;  %v1475_v49 = vshrl.u32 %v2050_v5, 16  ;;  %v2755_v45 = vsel %vm2561_vm7, %v1946_v56, %v658_v28  ;;  %v2324_v8 = vld [vmem:[%s2411_s10 + $0x40] ss:$8 sps:$4 sm:$0xff]  }
  0x46   : > { %2159 = vmatmul.mubr.msk.bf16.gmra.mrb[4].mxu1 %vm419_vm3, %v1934_v43  ;;  %v1453_v52 = vor.u32 %v1452_v22, %v1449_v30  ;;  %v1456_v11 = vshll.u32 %v2727_v15, 16  ;;  %v1466_v57 = vrot.slane %v1464_v40, 5  ;;  %v2760_v7 = vrot.slane %v1442_v34, 5 }
  0x47   : > { %2164 = vmatprep.mubr.msk.bf16.mxu1 %vm419_vm3, %v1948_v51  ;;  %v1470_v43 = vshll.u32 %v2738_v17, 16  ;;  %v1477_v58 = vrot.slane %v1475_v49, 4  ;;  %v1478_v60 = vshll.u32 %v2050_v5, 16  ;;  %v1417_v51 = vsel %vm2450_vm4, %v1412_v44, %v1416_v47  ;;  %v1983_v49 = vld [vmem:[%s2411_s10 + $0x30] sm:$0xf] }
  0x48   : > { %2205 = vmatmul.mubr.msk.bf16.vlgmr.msra.gmra.mrb[0].mxu0 %vm419_vm3, %v2322_v23  ;;  %v1440_v61 = vrot.slane %v1439_v38, 4  ;;  %v1467_v56 = vor.u32 %v1466_v57, %v1463_v55  ;;  %v1489_v0 = vshrl.u32 %v2052_v12, 16  ;;  %v1431_v18 = vsel %vm2450_vm4, %v1426_v50, %v1430_v36  ;;  %v2065_v38 = vld [vmem:[%s2411_s10 + $0x10] sm:$0xe]  ;;  %v2066_v50 = vld [vmem:[%s2411_s10 + $0x18] sm:$0xe] }
  0x49   : > { %2213 = vmatpush3.bf16.msra.mxu0 %v2646_v46  ;;  %2208 = vmatprep.mubr.msk.bf16.mxu0 %vm419_vm3, %v2323_v27  ;;  %v1480_v4 = vrot.slane %v1478_v60, 5  ;;  %v1484_v10 = vshll.u32 %v2748_v21, 16  ;;  %v1492_v46 = vshll.u32 %v2052_v12, 16  ;;  %v1454_v14 = vrot.slane %v1453_v52, 4  ;;  %v2325_v57 = vld [vmem:[%s2411_s10 + $0x8] ss:$8 sps:$4 sm:$0xff]  }
  0x4a   : > { %2307 = vmatprep.subr.msk.bf16.mxu0 %vm432_vm0, %v2745_v25  ;;  %v1458_v16 = vrot.slane %v1456_v11, 5  ;;  %v1491_v23 = vrot.slane %v1489_v0, 4  ;;  %v1503_v48 = vshrl.u32 %v2054_v6, 16  ;;  %v1472_v24 = vrot.slane %v1470_v43, 5 }
  0x4b   : > { %v1481_v9 = vor.u32 %v1480_v4, %v1477_v58  ;;  %v1494_v27 = vrot.slane %v1492_v46, 5  ;;  %v1506_v28 = vshll.u32 %v2054_v6, 16  ;;  %v2057_v63 = vcombine.low %v1417_v51, %v1431_v18 }
  0x4c   : > { %v1468_v30 = vrot.slane %v1467_v56, 4  ;;  %v1498_v22 = vshll.u32 %v2773_v13, 16  ;;  %v1505_v5 = vrot.slane %v1503_v48, 4  ;;  %v1486_v34 = vrot.slane %v1484_v10, 5 }
  0x4d   : > { %v1482_v47 = vrot.slane %v1481_v9, 4  ;;  %v1508_v35 = vrot.slane %v1506_v28, 5  ;;  %v1512_v44 = vshll.u32 %v2776_v20, 16  ;;  %v1951_v40 = vcombine.low %v2734_v33, %v2755_v45  ;;  %v1987_v28 = vld [vmem:[%s2411_s10 + $0x40] sm:$0xf] }
  0x4e   : > { %2165 = vmatmul.mubr.msk.bf16.vlgmr.msra.gmra.mrb[0].mxu1 %vm419_vm3, %v1949_v62  ;;  %v1495_v12 = vor.u32 %v1494_v27, %v1491_v23  ;;  %v1445_v37 = vsel %vm2450_vm4, %v1440_v61, %v2760_v7  ;;  %v1459_v41 = vsel %vm2450_vm4, %v1454_v14, %v1458_v16  ;;  %v1981_v62 = vld [vmem:[%s2411_s10 + $0x28] sm:$0xf]  ;;  %v1473_v33 = vsel %vm2450_vm4, %v1468_v30, %v1472_v24  ;;  %v1985_v27 = vld [vmem:[%s2411_s10 + $0x38] sm:$0xf] }
  0x4f   : > { %2173 = vmatpush3.bf16.msra.mxu1 %v2650_v54  ;;  %2168 = vmatprep.mubr.msk.bf16.mxu1 %vm419_vm3, %v1950_v26  ;;  %v1509_v54 = vor.u32 %v1508_v35, %v1505_v5  ;;  %v1500_v26 = vrot.slane %v1498_v22, 5  ;;  %v2073_v36 = vrot.slane %v2065_v38, 9  ;;  %v1644_v55 = vrot.slane %v2689_v39, 5  ;;  %v2327_v38 = vld [vmem:[%s2411_s10 + $0x28] ss:$8 sps:$4 sm:$0xff]  }
  0x50   : > { %2209 = vmatmul.mubr.msk.bf16.gmra.mrb[4].mxu0 %vm419_vm3, %v2324_v8  ;;  %2303 = vmatprep.subr.msk.bf16.mxu1 %vm432_vm0, %v2386_v1  ;;  %v1487_v45 = vsel %vm2450_vm4, %v1482_v47, %v1486_v34  ;;  %v1514_v52 = vrot.slane %v1512_v44, 5  ;;  %v2074_v11 = vrot.slane %v2066_v50, 9  ;;  %v1648_v1 = vrot.slane %v2708_v59, 5  ;;  %v2067_v59 = vld [vmem:[%s2411_s10 + $0x20] sm:$0xe] }
  0x51   : > { %2214 = vmatprep.mubr.msk.bf16.mxu0 %vm419_vm3, %v2057_v63  ;;  %v1496_v6 = vrot.slane %v1495_v12, 4  ;;  %v1510_v7 = vrot.slane %v1509_v54, 4  ;;  %v954_v43 = vshrl.u32 %v1981_v62, 16  ;;  %v957_v58 = vshll.u32 %v1981_v62, 16  ;;  %v2326_v63 = vld [vmem:[%s2411_s10 + $0x18] ss:$8 sps:$4 sm:$0xff]  }
  0x52   : > { %v2058_v60 = vcombine.low %v1445_v37, %v1459_v41  ;;  %v968_v51 = vshrl.u32 %v1983_v49, 16  ;;  %v971_v61 = vshll.u32 %v1983_v49, 16  ;;  %v2059_v56 = vcombine.low %v1473_v33, %v1487_v45  ;;  %v2069_v44 = vld [vmem:[%s2411_s10 + $0x30] sm:$0xe] }
  0x53   : > { %v956_v39 = vrot.slane %v954_v43, 4  ;;  %v959_v0 = vrot.slane %v957_v58, 5  ;;  %v1701_v18 = vsel %vm432_vm0, %v2745_v25, 0  ;;  %v1501_v46 = vsel %vm2450_vm4, %v1496_v6, %v1500_v26  ;;  %v2068_v25 = vld [vmem:[%s2411_s10 + $0x28] sm:$0xe] }
  0x54   : > { %v970_v4 = vrot.slane %v968_v51, 4  ;;  %v973_v10 = vrot.slane %v971_v61, 5  ;;  %v1515_v14 = vsel %vm2450_vm4, %v1510_v7, %v1514_v52  ;;  %v1645_v16 = vsel %vm2561_vm7, %v2073_v36, %v1644_v55  ;;  %v2071_v6 = vld [vmem:[%s2411_s10 + $0x40] sm:$0xe]  ;;  %v2072_v7 = vld [vmem:[%s2411_s10 + $0x48] sm:$0xe] }
  0x55   : > { %v1649_v23 = vsel %vm2561_vm7, %v2074_v11, %v1648_v1  ;;  %v960_v48 = vor.u32 %v959_v0, %v956_v39  ;;  %v963_v8 = vshll.u32 %v2581_v42, 16  ;;  %v977_v9 = vshll.u32 %v2584_v29, 16  ;;  %v2070_v42 = vld [vmem:[%s2411_s10 + $0x38] sm:$0xe] }
  0x56   : > { %2169 = vmatmul.mubr.msk.bf16.gmra.mrb[4].mxu1 %vm419_vm3, %v1951_v40  ;;  %v974_v24 = vor.u32 %v973_v10, %v970_v4  ;;  %v2075_v30 = vrot.slane %v2067_v59, 9  ;;  %v1652_v22 = vrot.slane %v2716_v2, 5  ;;  %v2060_v5 = vcombine.low %v1501_v46, %v1515_v14 }
  0x57   : > { %2174 = vmatprep.mubr.msk.bf16.mxu1 %vm419_vm3, %v2325_v57  ;;  %v2082_v47 = vcombine.low %v1645_v16, %v1649_v23  ;;  %v2076_v34 = vrot.slane %v2068_v25, 9  ;;  %v1656_v35 = vrot.slane %v2727_v15, 5  ;;  %v982_v40 = vshrl.u32 %v1985_v27, 16  ;;  %v2328_v57 = vld [vmem:[%s2411_s10 + $0x38] ss:$8 sps:$4 sm:$0xff]   ;;  %s2897_s10 = scalar_lea.vmem %s2928_s6, %s2095_s23 }
  0x58   : > { %2215 = vmatmul.mubr.msk.bf16.vlgmr.msra.gmra.mrb[0].mxu0 %vm419_vm3, %v2058_v60  ;;  %v985_v12 = vshll.u32 %v1985_v27, 16  ;;  %v996_v29 = vshrl.u32 %v1987_v28, 16  ;;  %v999_v50 = vshll.u32 %v1987_v28, 16  ;;  %v961_v37 = vrot.slane %v960_v48, 4  ;;  %v1791_v27 = vld [vmem:[%s2879_s26] sm:$0xff] }
  0x59   : > { %2223 = vmatpush3.bf16.msra.mxu0 %v1701_v18  ;;  %2218 = vmatprep.mubr.msk.bf16.mxu0 %vm419_vm3, %v2059_v56  ;;  %v965_v41 = vrot.slane %v963_v8, 5  ;;  %v975_v54 = vrot.slane %v974_v24, 4  ;;  %v979_v62 = vrot.slane %v977_v9, 5  ;;  %v2077_v33 = vrot.slane %v2069_v44, 9 }
  0x5a   : > { %v1660_v26 = vrot.slane %v2738_v17, 5  ;;  %v2078_v2 = vrot.slane %v2070_v42, 9  ;;  %v1664_v36 = vrot.slane %v2748_v21, 5  ;;  %v984_v15 = vrot.slane %v982_v40, 4 }
  0x5b   : > { %v987_v55 = vrot.slane %v985_v12, 5  ;;  %v998_v49 = vrot.slane %v996_v29, 4  ;;  %v1001_v45 = vrot.slane %v999_v50, 5  ;;  %v991_v52 = vshll.u32 %v2592_v31, 16  ;;  %v2092_v50 = vld [vmem:[%s2927_s5] ss:$0 sm:$0xff] }
  0x5c   : > { %v966_v17 = vsel %vm2450_vm4, %v961_v37, %v965_v41  ;;  %v980_v21 = vsel %vm2450_vm4, %v975_v54, %v979_v62  ;;  %v1657_v11 = vsel %vm2561_vm7, %v2076_v34, %v1656_v35  ;;  %v1661_v1 = vsel %vm2561_vm7, %v2077_v33, %v1660_v26  ;;  %v1792_v34 = vld [vmem:[%s2879_s26 + $0x8] sm:$0xff] }
  0x5d   : > { %v1665_v31 = vsel %vm2561_vm7, %v2078_v2, %v1664_v36  ;;  %v1005_v43 = vshll.u32 %v2614_v19, 16  ;;  %v1992_v58 = vcombine.low %v966_v17, %v980_v21  ;;  %v988_v60 = vor.u32 %v987_v55, %v984_v15 }
  0x5e   : > { %2175 = vmatmul.mubr.msk.bf16.vlgmr.msra.gmra.mrb[0].mxu1 %vm419_vm3, %v2326_v63  ;;  %v1002_v51 = vor.u32 %v1001_v45, %v998_v49  ;;  %v2084_v56 = vcombine.low %v1661_v1, %v1665_v31  ;;  %v2079_v39 = vrot.slane %v2071_v6, 9  ;;  %v1668_v0 = vrot.slane %v2773_v13, 5  ;;  %v2090_v63 = vld [vmem:[%s2924_s2] ss:$0 sm:$0xff] }
  0x5f   : > { %2233 = vmatpush3.bf16.msra.mxu1 %v2394_v3  ;;  %2178 = vmatprep.mubr.msk.bf16.mxu1 %vm419_vm3, %v2327_v38  ;;  %v1653_v3 = vsel %vm2561_vm7, %v2075_v30, %v1652_v22  ;;  %v2080_v18 = vrot.slane %v2072_v7, 9  ;;  %v1672_v59 = vrot.slane %v2776_v20, 5  ;;  %v993_v4 = vrot.slane %v991_v52, 5  ;;  %v1794_v30 = vld [vmem:[%s2879_s26 + $0x18] sm:$0xff]  ;;  %v1797_v52 = vld [vmem:[%s2879_s26 + $0x30] sm:$0xff] }
  0x60   : > { %2219 = vmatmul.mubr.msk.bf16.gmra.mrb[4].mxu0 %vm419_vm3, %v2060_v5  ;;  %v2083_v61 = vcombine.low %v1653_v3, %v1657_v11  ;;  %v1007_v10 = vrot.slane %v1005_v43, 5  ;;  %v989_v46 = vrot.slane %v988_v60, 4  ;;  %v1003_v19 = vrot.slane %v1002_v51, 4  ;;  %v1795_v3 = vld [vmem:[%s2879_s26 + $0x20] sm:$0xff]  ;;  %v1796_v60 = vld [vmem:[%s2879_s26 + $0x28] sm:$0xff] }
  0x61   : > { %2224 = vmatprep.mubr.msk.bf16.mxu0 %vm419_vm3, %v2082_v47  ;;  %v1669_v14 = vsel %vm2561_vm7, %v2079_v39, %v1668_v0  ;;  %v1673_v13 = vsel %vm2561_vm7, %v2080_v18, %v1672_v59  ;;  %v1808_v5 = vmul.f32 %v2091_v53, %v1793_v32  ;;  %v1806_v44 = vmul.f32 %v2091_v53, %v1791_v27 }
  0x62   : > { %v994_v20 = vsel %vm2450_vm4, %v989_v46, %v993_v4  ;;  %v1008_v16 = vsel %vm2450_vm4, %v1003_v19, %v1007_v10  ;;  %v2085_v23 = vcombine.low %v1669_v14, %v1673_v13  ;;  %v1809_v12 = vmul.f32 %v2091_v53, %v1794_v30 }
  0x63   : > { %v1993_v25 = vcombine.low %v994_v20, %v1008_v16  ;;  %v1807_v54 = vmul.f32 %v2091_v53, %v1792_v34  ;;  %v1812_v7 = vmul.f32 %v2091_v53, %v1797_v52  ;;  %v1811_v46 = vmul.f32 %v2091_v53, %v1796_v60 }
  0x66   : > { %2179 = vmatmul.mubr.msk.bf16.gmra.mrb[4].mxu1 %vm419_vm3, %v2328_v57  ;;  %v1798_v57 = vld [vmem:[%s2879_s26 + $0x38] sm:$0xff] }
  0x67   : > { %2188 = vmatprep.mubr.msk.bf16.mxu1 %vm419_vm3, %v1992_v58  ;;  %v1813_v18 = vmul.f32 %v2091_v53, %v1798_v57 }
  0x68   : > { %2225 = vmatmul.mubr.msk.bf16.vlgmr.msra.gmra.mrb[0].mxu0 %vm419_vm3, %v2083_v61  ;;  %v1810_v61 = vmul.f32 %v2091_v53, %v1795_v3 }
  0x69   : > { %2228 = vmatprep.mubr.msk.bf16.mxu0 %vm419_vm3, %v2084_v56 }
  0x70   : > { %2229 = vmatmul.mubr.msk.bf16.gmra.mrb[4].mxu0 %vm419_vm3, %v2085_v23 }
  0x72   : > { %2189 = vmatmul.mubr.msk.bf16.vlgmr.msra.gmra.mrb[4].mxu1 %vm419_vm3, %v1993_v25 }
 0x131   : > { %v2176_v48 = vpop.f32.mrb[0].mxu1 }
 0x132   : > { %v842_v8 = vpop.f32.mrb[1].mxu1 }
 0x133   : > { %v2177_v24 = vpop.f32.mrb[2].mxu1 }
 0x134   : > { %v845_v9 = vpop.f32.mrb[3].mxu1 }
 0x13b   : > { %v2226_v28 = vpop.f32.mrb[0].mxu0 }
 0x13c   : > { %v2234_v22 = vadd.f32 %v2226_v28, %v2176_v48  ;;  %v1737_v47 = vpop.f32.mrb[1].mxu0 }
 0x13d   : > { %v2235_v35 = vadd.f32 %v1737_v47, %v842_v8  ;;  %v2227_v42 = vpop.f32.mrb[2].mxu0 }
 0x13e   : > { %v1785_v38 = vadd.f32 %v2234_v22, %v2090_v63  ;;  %v2236_v40 = vadd.f32 %v2227_v42, %v2177_v24  ;;  %v1740_v29 = vpop.f32.mrb[3].mxu0 }
 0x13f   : > { %v1783_v37 = vadd.f32 %v2235_v35, %v2090_v63  ;;  %v2237_v41 = vadd.f32 %v1740_v29, %v845_v9 }
 0x140   : > { %v1816_v62 = vadd.f32 %v1808_v5, %v1785_v38  ;;  %v1786_v33 = vadd.f32 %v2236_v40, %v2090_v63 }
 0x141   : > { %v1814_v26 = vadd.f32 %v1806_v44, %v1783_v37  ;;  %v1784_v2 = vadd.f32 %v2237_v41, %v2090_v63 }
 0x142   : > { %v1831_v36 = vadd.f32 %v2092_v50, %v1816_v62  ;;  %v1817_v15 = vadd.f32 %v1809_v12, %v1786_v33 }
 0x143   : > { %v1829_v55 = vadd.f32 %v2092_v50, %v1814_v26  ;;  %v1815_v49 = vadd.f32 %v1807_v54, %v1784_v2  ;;  %v2230_v45 = vpop.f32.mrb[4].mxu0 }
 0x144   : > { %1839 = vst.msk [vmem:[%s2897_s10 + $0x10] sm:$0xff] %vm419_vm3, %v1831_v36  ;;  %v1832_v17 = vadd.f32 %v2092_v50, %v1817_v15  ;;  %v1753_v21 = vpop.f32.mrb[5].mxu0 }
 0x145   : > { %1837 = vst.msk [vmem:[%s2897_s10] sm:$0xff] %vm419_vm3, %v1829_v55  ;;  %v1830_v11 = vadd.f32 %v2092_v50, %v1815_v49  ;;  %v2190_v1 = vpop.f32.mrb[4].mxu1  ;;  %v2231_v31 = vpop.f32.mrb[6].mxu0 }
 0x146   : > { %1840 = vst.msk [vmem:[%s2897_s10 + $0x18] sm:$0xff] %vm419_vm3, %v1832_v17  ;;  %v2238_v6 = vadd.f32 %v2230_v45, %v2190_v1  ;;  %v1088_v43 = vpop.f32.mrb[5].mxu1  ;;  %v1756_v58 = vpop.f32.mrb[7].mxu0 }
 0x147   : > { %1838 = vst.msk [vmem:[%s2897_s10 + $0x8] sm:$0xff] %vm419_vm3, %v1830_v11  ;;  %v2239_v51 = vadd.f32 %v1753_v21, %v1088_v43  ;;  %v2191_v56 = vpop.f32.mrb[6].mxu1 }
 0x148   : > { %v1789_v39 = vadd.f32 %v2238_v6, %v2090_v63  ;;  %v2240_v0 = vadd.f32 %v2231_v31, %v2191_v56  ;;  %v1091_v59 = vpop.f32.mrb[7].mxu1 }
 0x149   : > { %v1787_v4 = vadd.f32 %v2239_v51, %v2090_v63  ;;  %v2241_v10 = vadd.f32 %v1756_v58, %v1091_v59 }
 0x14a   : > { %v1820_v19 = vadd.f32 %v1812_v7, %v1789_v39  ;;  %v1790_v14 = vadd.f32 %v2240_v0, %v2090_v63 }
 0x14b   : > { %v1818_v13 = vadd.f32 %v1810_v61, %v1787_v4  ;;  %v1788_v20 = vadd.f32 %v2241_v10, %v2090_v63 }
 0x14c   : > { %v1835_v16 = vadd.f32 %v2092_v50, %v1820_v19  ;;  %v1821_v23 = vadd.f32 %v1813_v18, %v1790_v14 }
 0x14d   : > { %v1833_v25 = vadd.f32 %v2092_v50, %v1818_v13  ;;  %v1819_v48 = vadd.f32 %v1811_v46, %v1788_v20 }
 0x14e   : > { %1843 = vst.msk [vmem:[%s2897_s10 + $0x30] sm:$0xff] %vm419_vm3, %v1835_v16  ;;  %v1836_v8 = vadd.f32 %v2092_v50, %v1821_v23 }
 0x14f   : > { %1841 = vst.msk [vmem:[%s2897_s10 + $0x20] sm:$0xff] %vm419_vm3, %v1833_v25  ;;  %v1834_v24 = vadd.f32 %v2092_v50, %v1819_v48 }
 0x150   : > { %1844 = vst.msk [vmem:[%s2897_s10 + $0x38] sm:$0xff] %vm419_vm3, %v1836_v8 }
 0x151   : > { %1842 = vst.msk [vmem:[%s2897_s10 + $0x28] sm:$0xff] %vm419_vm3, %v1834_v24 }
 0x152 PF: > { %s16_s21 = sadd.s32 1, %s2335_s21  }
 0x153   : > { %p13_p4 = scmp.ge.s32.totalorder %s16_s21, 4  }
 0x155   :  { %15 = sbr.rel (!%p13_p4) target bundleno = 1 (0x1), region = 87 }

</bundles_post_ra>
